<compile_context>
chip_gen: v5e
topology: v5e:2x2
jax: 0.10.0
libtpu: 0.0.40
codegen_flags: <defaults>
</compile_context>

<pallas_src>
import functools

import jax
import jax.numpy as jnp
from jax.experimental import pallas as pl
from jax.experimental.pallas import tpu as pltpu


def _round_up(n, m):
    return ((n + m - 1) // m) * m


def _choose_block(B):
    """Batch tile (multiple of 8) and padded batch; prefer >=2 grid steps."""
    Bp8 = _round_up(max(B, 1), 8)
    BB = min(256, Bp8)
    if Bp8 // BB < 2 and Bp8 >= 16:
        BB = _round_up((Bp8 + 1) // 2, 8)      # 2 grid steps -> both TCs on v7x
    Bp = _round_up(Bp8, BB)
    return BB, Bp


def lstm_fc_kernel(x_ref, w_ih_ref, w_hh_ref, b_ref,
                   fc1_w_ref, fc1_b_ref, fc2_w_ref, fc2_b_ref,
                   out_ref, xw_ref, h_ref, c_ref, *, hidden_pad):
    # x_ref: (T, BB, D) time-major batch block; all weights pre-transposed and
    # gate-padded so each gate occupies its own Hp-aligned 128-lane group.
    T, BB, D = x_ref.shape
    Hp = hidden_pad

    # Hoisted input projection: one (T*BB, D) x (D, 4Hp) matmul + bias, written
    # to VMEM scratch so the recurrence only touches one step's slab at a time.
    # (T, BB) merge/split is tile-exact because BB is always a multiple of 8.
    x2d = x_ref[...].reshape(T * BB, D)
    xw_ref[...] = (
        jnp.dot(x2d, w_ih_ref[...], preferred_element_type=jnp.float32)
        + b_ref[...]
    ).reshape(T, BB, 4 * Hp)

    h_ref[...] = jnp.zeros_like(h_ref)
    c_ref[...] = jnp.zeros_like(c_ref)

    w_hh = w_hh_ref[...]                         # (Hp, 4Hp)
    # TODO(synk): on v5e/v6e, hold W_hh in MXU weight registers across the T
    # steps (pltpu.matmul_push_rhs / matmul_acc_lhs / matmul_pop) to drop the
    # redundant per-step weight pushes from the serial chain; skipped here
    # because the explicit-MXU path has per-chip tile constraints not
    # validated in this environment.
    for t in range(T):                           # T small & static: unroll
        gates = xw_ref[t] + jnp.dot(h_ref[...], w_hh,
                                    preferred_element_type=jnp.float32)
        sig = jax.nn.sigmoid(gates)              # one full-width EUP pass
        i = sig[:, 0 * Hp:1 * Hp]                # slices are 128-lane aligned
        f = sig[:, 1 * Hp:2 * Hp]
        o = sig[:, 3 * Hp:4 * Hp]
        g = jnp.tanh(gates[:, 2 * Hp:3 * Hp])
        c = f * c_ref[...] + i * g
        c_ref[...] = c
        h_ref[...] = o * jnp.tanh(c)

    # fc1 (ReLU) + fc2; fc2 output is lane-padded to a multiple of 128.
    z1 = jnp.maximum(
        jnp.dot(h_ref[...], fc1_w_ref[...], preferred_element_type=jnp.float32)
        + fc1_b_ref[...], 0.0)
    out_ref[...] = (
        jnp.dot(z1, fc2_w_ref[...], preferred_element_type=jnp.float32)
        + fc2_b_ref[...])


def lstm_forward(x, params, hidden_size, num_classes):
    B, T, D = x.shape
    H = hidden_size
    Hp = _round_up(H, 128)                       # vreg-aligned gate groups
    Cp = _round_up(num_classes, 128)             # lane-dense output width
    BB, Bp = _choose_block(B)

    # One-time layout plumbing OUTSIDE the kernel.  All padding is zero, so
    # padded gate lanes give g = tanh(0) = 0 -> c_pad = 0 -> h_pad = 0, and the
    # padded rows of W_hh / fc1_w contribute exactly 0: results are bit-exact
    # vs. the unpadded f32 math.
    def pad_gate_cols(w):                        # (rows, 4H) -> (rows, 4Hp)
        out = jnp.zeros((w.shape[0], 4 * Hp), jnp.float32)
        for k in range(4):
            out = out.at[:, k * Hp:k * Hp + H].set(w[:, k * H:(k + 1) * H])
        return out

    w_ih_t = pad_gate_cols(params["w_ih"].T)                     # (D, 4Hp)
    w_hh_t = jnp.zeros((Hp, 4 * Hp), jnp.float32).at[:H, :].set(
        pad_gate_cols(params["w_hh"].T))                         # (Hp, 4Hp)
    b = pad_gate_cols(params["b"])                               # (1, 4Hp)
    fc1_w_t = jnp.zeros((Hp, 256), jnp.float32).at[:H, :].set(
        params["fc1_w"].T)                                       # (Hp, 256)
    fc1_b = params["fc1_b"]                                      # (1, 256)
    fc2_w_t = jnp.zeros((256, Cp), jnp.float32).at[:, :num_classes].set(
        params["fc2_w"].T)                                       # (256, Cp)
    fc2_b = jnp.zeros((1, Cp), jnp.float32).at[:, :num_classes].set(
        params["fc2_b"])                                         # (1, Cp)
    # Time-major, batch-padded x.
    # TODO(synk): at scale, produce x time-major upstream (or use
    # allow_input_fusion) to avoid this extra HBM round trip before the kernel.
    x_tm = jnp.zeros((T, Bp, D), jnp.float32).at[:, :B, :].set(
        jnp.transpose(x, (1, 0, 2)))                             # (T, Bp, D)

    def full(arr):
        return pl.BlockSpec(arr.shape, lambda i, _nd=arr.ndim: (0,) * _nd)

    kernel = functools.partial(lstm_fc_kernel, hidden_pad=Hp)
    out_p = pl.pallas_call(
        kernel,
        out_shape=jax.ShapeDtypeStruct((Bp, Cp), jnp.float32),
        grid=(Bp // BB,),
        in_specs=[
            pl.BlockSpec((T, BB, D), lambda i: (0, i, 0)),       # x, time-major
            full(w_ih_t), full(w_hh_t), full(b),
            full(fc1_w_t), full(fc1_b), full(fc2_w_t), full(fc2_b),
        ],
        out_specs=pl.BlockSpec((BB, Cp), lambda i: (i, 0)),
        scratch_shapes=[
            pltpu.VMEM((T, BB, 4 * Hp), jnp.float32),            # xw
            pltpu.VMEM((BB, Hp), jnp.float32),                   # h
            pltpu.VMEM((BB, Hp), jnp.float32),                   # c
        ],
        compiler_params=pltpu.CompilerParams(
            dimension_semantics=("parallel",)),                  # 2nd TC (v7x)
    )(x_tm, w_ih_t, w_hh_t, b, fc1_w_t, fc1_b, fc2_w_t, fc2_b)

    return out_p[:B, :num_classes]


def init_params(key, input_size, hidden_size, num_classes):
    """PyTorch-convention parameters (w_* are (out, in), gate order [i,f,g,o])."""
    ks = jax.random.split(key, 8)
    H = hidden_size
    s = 1.0 / jnp.sqrt(H)
    u = lambda k, shape, bound: jax.random.uniform(
        k, shape, jnp.float32, -bound, bound)
    w_ih = u(ks[0], (4 * H, input_size), s)
    w_hh = u(ks[1], (4 * H, H), s)
    b_ih = u(ks[2], (4 * H,), s)
    b_hh = u(ks[3], (4 * H,), s)
    fc1_w = u(ks[4], (256, H), 1.0 / jnp.sqrt(H))
    fc1_b = u(ks[5], (256,), 1.0 / jnp.sqrt(H))
    fc2_w = u(ks[6], (num_classes, 256), 1.0 / jnp.sqrt(256.0))
    fc2_b = u(ks[7], (num_classes,), 1.0 / jnp.sqrt(256.0))
    return {
        "w_ih": w_ih, "w_hh": w_hh,
        "b": (b_ih + b_hh).reshape(1, 4 * H),
        "fc1_w": fc1_w, "fc1_b": fc1_b.reshape(1, 256),
        "fc2_w": fc2_w, "fc2_b": fc2_b.reshape(1, num_classes),
    }


def reference_forward(x, params, hidden_size):
    """Pure-JAX reference mirroring torch.nn.LSTM + fc1(ReLU) + fc2."""
    B, T, _ = x.shape
    H = hidden_size
    h = jnp.zeros((B, H), jnp.float32)
    c = jnp.zeros((B, H), jnp.float32)
    for t in range(T):
        gates = x[:, t, :] @ params["w_ih"].T + h @ params["w_hh"].T + params["b"]
        i = jax.nn.sigmoid(gates[:, 0 * H:1 * H])
        f = jax.nn.sigmoid(gates[:, 1 * H:2 * H])
        g = jnp.tanh(gates[:, 2 * H:3 * H])
        o = jax.nn.sigmoid(gates[:, 3 * H:4 * H])
        c = f * c + i * g
        h = o * jnp.tanh(c)
    z1 = jnp.maximum(h @ params["fc1_w"].T + params["fc1_b"], 0.0)
    return z1 @ params["fc2_w"].T + params["fc2_b"]


if __name__ == "__main__":
    B, T, input_size, hidden_size, num_classes = 2, 8, 16, 32, 10

    key = jax.random.PRNGKey(0)
    k_x, k_p = jax.random.split(key)
    x = jax.random.normal(k_x, (B, T, input_size), jnp.float32)
    params = init_params(k_p, input_size, hidden_size, num_classes)

    out = lstm_forward(x, params, hidden_size, num_classes)
    out = jax.block_until_ready(out)

    ref = reference_forward(x, params, hidden_size)
    assert out.shape == (B, num_classes)
    assert jnp.allclose(out, ref, atol=1e-5, rtol=1e-5)

    print("KERNEL_OK")
</pallas_src>

<mosaic_0001>
module attributes {stable_mosaic.version = 11 : i64} {
  func.func @lstm_fc_kernel(%arg0: i32, %arg1: memref<8x8x16xf32, #tpu.memory_space<vmem>>, %arg2: memref<16x512xf32, #tpu.memory_space<vmem>>, %arg3: memref<128x512xf32, #tpu.memory_space<vmem>>, %arg4: memref<1x512xf32, #tpu.memory_space<vmem>>, %arg5: memref<128x256xf32, #tpu.memory_space<vmem>>, %arg6: memref<1x256xf32, #tpu.memory_space<vmem>>, %arg7: memref<256x128xf32, #tpu.memory_space<vmem>>, %arg8: memref<1x128xf32, #tpu.memory_space<vmem>>, %arg9: memref<8x128xf32, #tpu.memory_space<vmem>>, %arg10: memref<8x8x512xf32, #tpu.memory_space<vmem>>, %arg11: memref<8x128xf32, #tpu.memory_space<vmem>>, %arg12: memref<8x128xf32, #tpu.memory_space<vmem>>) attributes {dimension_semantics = [#tpu.dimension_semantics<parallel>], iteration_bounds = array<i64: 1>, scalar_prefetch = 0 : i64, scratch_operands = 3 : i64, tpu.core_type = #tpu.core_type<tc>, window_params = [{transform_indices = @transform_0, window_bounds = array<i64: 8, 8, 16>}, {pipeline_mode = #tpu.pipeline_mode<synchronous>, transform_indices = @transform_1, window_bounds = array<i64: 16, 512>}, {pipeline_mode = #tpu.pipeline_mode<synchronous>, transform_indices = @transform_2, window_bounds = array<i64: 128, 512>}, {pipeline_mode = #tpu.pipeline_mode<synchronous>, transform_indices = @transform_3, window_bounds = array<i64: 1, 512>}, {pipeline_mode = #tpu.pipeline_mode<synchronous>, transform_indices = @transform_4, window_bounds = array<i64: 128, 256>}, {pipeline_mode = #tpu.pipeline_mode<synchronous>, transform_indices = @transform_5, window_bounds = array<i64: 1, 256>}, {pipeline_mode = #tpu.pipeline_mode<synchronous>, transform_indices = @transform_6, window_bounds = array<i64: 256, 128>}, {pipeline_mode = #tpu.pipeline_mode<synchronous>, transform_indices = @transform_7, window_bounds = array<i64: 1, 128>}, {transform_indices = @transform_8, window_bounds = array<i64: 8, 128>}]} {
    %c0 = arith.constant 0 : index
    %c0_0 = arith.constant 0 : index
    %c0_1 = arith.constant 0 : index
    %0 = vector.load %arg1[%c0, %c0_0, %c0_1] : memref<8x8x16xf32, #tpu.memory_space<vmem>>, vector<8x8x16xf32>
    %1 = vector.shape_cast %0 : vector<8x8x16xf32> to vector<64x16xf32>
    %c0_2 = arith.constant 0 : index
    %c0_3 = arith.constant 0 : index
    %2 = vector.load %arg2[%c0_2, %c0_3] : memref<16x512xf32, #tpu.memory_space<vmem>>, vector<16x512xf32>
    %cst = arith.constant dense<0.000000e+00> : vector<64x512xf32>
    %3 = tpu.matmul %1, %2, %cst {dimension_numbers = #tpu.dot_dimension_numbers<[1], [0], [0], [1], [0, 0, 1, 1], [], []>} : vector<64x16xf32>, vector<16x512xf32>, vector<64x512xf32> -> vector<64x512xf32>
    %c0_4 = arith.constant 0 : index
    %c0_5 = arith.constant 0 : index
    %4 = vector.load %arg4[%c0_4, %c0_5] : memref<1x512xf32, #tpu.memory_space<vmem>>, vector<1x512xf32>
    %5 = vector.broadcast %4 : vector<1x512xf32> to vector<64x512xf32>
    %6 = arith.addf %3, %5 : vector<64x512xf32>
    %7 = vector.shape_cast %6 : vector<64x512xf32> to vector<8x8x512xf32>
    %c0_6 = arith.constant 0 : index
    %c0_7 = arith.constant 0 : index
    %c0_8 = arith.constant 0 : index
    %8 = vector.load %arg10[%c0_6, %c0_7, %c0_8] : memref<8x8x512xf32, #tpu.memory_space<vmem>>, vector<8x8x512xf32>
    tpu.vector_store %arg10[%c0_6, %c0_7, %c0_8], %7 {strides = array<i32>} : memref<8x8x512xf32, #tpu.memory_space<vmem>>, vector<8x8x512xf32>,
    %cst_9 = arith.constant 0.000000e+00 : f32
    %9 = vector.broadcast %cst_9 : f32 to vector<8x128xf32>
    %c0_10 = arith.constant 0 : index
    %c0_11 = arith.constant 0 : index
    %10 = vector.load %arg11[%c0_10, %c0_11] : memref<8x128xf32, #tpu.memory_space<vmem>>, vector<8x128xf32>
    tpu.vector_store %arg11[%c0_10, %c0_11], %9 {strides = array<i32>} : memref<8x128xf32, #tpu.memory_space<vmem>>, vector<8x128xf32>,
    %cst_12 = arith.constant 0.000000e+00 : f32
    %11 = vector.broadcast %cst_12 : f32 to vector<8x128xf32>
    %c0_13 = arith.constant 0 : index
    %c0_14 = arith.constant 0 : index
    %12 = vector.load %arg12[%c0_13, %c0_14] : memref<8x128xf32, #tpu.memory_space<vmem>>, vector<8x128xf32>
    tpu.vector_store %arg12[%c0_13, %c0_14], %11 {strides = array<i32>} : memref<8x128xf32, #tpu.memory_space<vmem>>, vector<8x128xf32>,
    %c0_15 = arith.constant 0 : index
    %c0_16 = arith.constant 0 : index
    %13 = vector.load %arg3[%c0_15, %c0_16] : memref<128x512xf32, #tpu.memory_space<vmem>>, vector<128x512xf32>
    %c0_17 = arith.constant 0 : index
    %c0_18 = arith.constant 0 : index
    %c0_19 = arith.constant 0 : index
    %14 = vector.load %arg10[%c0_17, %c0_18, %c0_19] : memref<8x8x512xf32, #tpu.memory_space<vmem>>, vector<1x8x512xf32>
    %15 = vector.shape_cast %14 : vector<1x8x512xf32> to vector<8x512xf32>
    %c0_20 = arith.constant 0 : index
    %c0_21 = arith.constant 0 : index
    %16 = vector.load %arg11[%c0_20, %c0_21] : memref<8x128xf32, #tpu.memory_space<vmem>>, vector<8x128xf32>
    %cst_22 = arith.constant dense<0.000000e+00> : vector<8x512xf32>
    %17 = tpu.matmul %16, %13, %cst_22 {dimension_numbers = #tpu.dot_dimension_numbers<[1], [0], [0], [1], [0, 0, 1, 1], [], []>} : vector<8x128xf32>, vector<128x512xf32>, vector<8x512xf32> -> vector<8x512xf32>
    %18 = arith.addf %15, %17 : vector<8x512xf32>
    %19 = arith.negf %18 : vector<8x512xf32>
    %20 = math.exp %19 : vector<8x512xf32>
    %cst_23 = arith.constant 1.000000e+00 : f32
    %21 = vector.broadcast %cst_23 : f32 to vector<8x512xf32>
    %22 = arith.addf %21, %20 : vector<8x512xf32>
    %23 = arith.divf %21, %22 : vector<8x512xf32>
    %24 = vector.extract_strided_slice %23 {offsets = [0, 0], sizes = [8, 128], strides = [1, 1]} : vector<8x512xf32> to vector<8x128xf32>
    %25 = vector.extract_strided_slice %23 {offsets = [0, 128], sizes = [8, 128], strides = [1, 1]} : vector<8x512xf32> to vector<8x128xf32>
    %26 = vector.extract_strided_slice %23 {offsets = [0, 384], sizes = [8, 128], strides = [1, 1]} : vector<8x512xf32> to vector<8x128xf32>
    %27 = vector.extract_strided_slice %18 {offsets = [0, 256], sizes = [8, 128], strides = [1, 1]} : vector<8x512xf32> to vector<8x128xf32>
    %28 = math.tanh %27 : vector<8x128xf32>
    %c0_24 = arith.constant 0 : index
    %c0_25 = arith.constant 0 : index
    %29 = vector.load %arg12[%c0_24, %c0_25] : memref<8x128xf32, #tpu.memory_space<vmem>>, vector<8x128xf32>
    %30 = arith.mulf %25, %29 : vector<8x128xf32>
    %31 = arith.mulf %24, %28 : vector<8x128xf32>
    %32 = arith.addf %30, %31 : vector<8x128xf32>
    %c0_26 = arith.constant 0 : index
    %c0_27 = arith.constant 0 : index
    %33 = vector.load %arg12[%c0_26, %c0_27] : memref<8x128xf32, #tpu.memory_space<vmem>>, vector<8x128xf32>
    tpu.vector_store %arg12[%c0_26, %c0_27], %32 {strides = array<i32>} : memref<8x128xf32, #tpu.memory_space<vmem>>, vector<8x128xf32>,
    %34 = math.tanh %32 : vector<8x128xf32>
    %35 = arith.mulf %26, %34 : vector<8x128xf32>
    %c0_28 = arith.constant 0 : index
    %c0_29 = arith.constant 0 : index
    %36 = vector.load %arg11[%c0_28, %c0_29] : memref<8x128xf32, #tpu.memory_space<vmem>>, vector<8x128xf32>
    tpu.vector_store %arg11[%c0_28, %c0_29], %35 {strides = array<i32>} : memref<8x128xf32, #tpu.memory_space<vmem>>, vector<8x128xf32>,
    %c1 = arith.constant 1 : index
    %c0_30 = arith.constant 0 : index
    %c0_31 = arith.constant 0 : index
    %37 = vector.load %arg10[%c1, %c0_30, %c0_31] : memref<8x8x512xf32, #tpu.memory_space<vmem>>, vector<1x8x512xf32>
    %38 = vector.shape_cast %37 : vector<1x8x512xf32> to vector<8x512xf32>
    %c0_32 = arith.constant 0 : index
    %c0_33 = arith.constant 0 : index
    %39 = vector.load %arg11[%c0_32, %c0_33] : memref<8x128xf32, #tpu.memory_space<vmem>>, vector<8x128xf32>
    %cst_34 = arith.constant dense<0.000000e+00> : vector<8x512xf32>
    %40 = tpu.matmul %39, %13, %cst_34 {dimension_numbers = #tpu.dot_dimension_numbers<[1], [0], [0], [1], [0, 0, 1, 1], [], []>} : vector<8x128xf32>, vector<128x512xf32>, vector<8x512xf32> -> vector<8x512xf32>
    %41 = arith.addf %38, %40 : vector<8x512xf32>
    %42 = arith.negf %41 : vector<8x512xf32>
    %43 = math.exp %42 : vector<8x512xf32>
    %cst_35 = arith.constant 1.000000e+00 : f32
    %44 = vector.broadcast %cst_35 : f32 to vector<8x512xf32>
    %45 = arith.addf %44, %43 : vector<8x512xf32>
    %46 = arith.divf %44, %45 : vector<8x512xf32>
    %47 = vector.extract_strided_slice %46 {offsets = [0, 0], sizes = [8, 128], strides = [1, 1]} : vector<8x512xf32> to vector<8x128xf32>
    %48 = vector.extract_strided_slice %46 {offsets = [0, 128], sizes = [8, 128], strides = [1, 1]} : vector<8x512xf32> to vector<8x128xf32>
    %49 = vector.extract_strided_slice %46 {offsets = [0, 384], sizes = [8, 128], strides = [1, 1]} : vector<8x512xf32> to vector<8x128xf32>
    %50 = vector.extract_strided_slice %41 {offsets = [0, 256], sizes = [8, 128], strides = [1, 1]} : vector<8x512xf32> to vector<8x128xf32>
    %51 = math.tanh %50 : vector<8x128xf32>
    %c0_36 = arith.constant 0 : index
    %c0_37 = arith.constant 0 : index
    %52 = vector.load %arg12[%c0_36, %c0_37] : memref<8x128xf32, #tpu.memory_space<vmem>>, vector<8x128xf32>
    %53 = arith.mulf %48, %52 : vector<8x128xf32>
    %54 = arith.mulf %47, %51 : vector<8x128xf32>
    %55 = arith.addf %53, %54 : vector<8x128xf32>
    %c0_38 = arith.constant 0 : index
    %c0_39 = arith.constant 0 : index
    %56 = vector.load %arg12[%c0_38, %c0_39] : memref<8x128xf32, #tpu.memory_space<vmem>>, vector<8x128xf32>
    tpu.vector_store %arg12[%c0_38, %c0_39], %55 {strides = array<i32>} : memref<8x128xf32, #tpu.memory_space<vmem>>, vector<8x128xf32>,
    %57 = math.tanh %55 : vector<8x128xf32>
    %58 = arith.mulf %49, %57 : vector<8x128xf32>
    %c0_40 = arith.constant 0 : index
    %c0_41 = arith.constant 0 : index
    %59 = vector.load %arg11[%c0_40, %c0_41] : memref<8x128xf32, #tpu.memory_space<vmem>>, vector<8x128xf32>
    tpu.vector_store %arg11[%c0_40, %c0_41], %58 {strides = array<i32>} : memref<8x128xf32, #tpu.memory_space<vmem>>, vector<8x128xf32>,
    %c2 = arith.constant 2 : index
    %c0_42 = arith.constant 0 : index
    %c0_43 = arith.constant 0 : index
    %60 = vector.load %arg10[%c2, %c0_42, %c0_43] : memref<8x8x512xf32, #tpu.memory_space<vmem>>, vector<1x8x512xf32>
    %61 = vector.shape_cast %60 : vector<1x8x512xf32> to vector<8x512xf32>
    %c0_44 = arith.constant 0 : index
    %c0_45 = arith.constant 0 : index
    %62 = vector.load %arg11[%c0_44, %c0_45] : memref<8x128xf32, #tpu.memory_space<vmem>>, vector<8x128xf32>
    %cst_46 = arith.constant dense<0.000000e+00> : vector<8x512xf32>
    %63 = tpu.matmul %62, %13, %cst_46 {dimension_numbers = #tpu.dot_dimension_numbers<[1], [0], [0], [1], [0, 0, 1, 1], [], []>} : vector<8x128xf32>, vector<128x512xf32>, vector<8x512xf32> -> vector<8x512xf32>
    %64 = arith.addf %61, %63 : vector<8x512xf32>
    %65 = arith.negf %64 : vector<8x512xf32>
    %66 = math.exp %65 : vector<8x512xf32>
    %cst_47 = arith.constant 1.000000e+00 : f32
    %67 = vector.broadcast %cst_47 : f32 to vector<8x512xf32>
    %68 = arith.addf %67, %66 : vector<8x512xf32>
    %69 = arith.divf %67, %68 : vector<8x512xf32>
    %70 = vector.extract_strided_slice %69 {offsets = [0, 0], sizes = [8, 128], strides = [1, 1]} : vector<8x512xf32> to vector<8x128xf32>
    %71 = vector.extract_strided_slice %69 {offsets = [0, 128], sizes = [8, 128], strides = [1, 1]} : vector<8x512xf32> to vector<8x128xf32>
    %72 = vector.extract_strided_slice %69 {offsets = [0, 384], sizes = [8, 128], strides = [1, 1]} : vector<8x512xf32> to vector<8x128xf32>
    %73 = vector.extract_strided_slice %64 {offsets = [0, 256], sizes = [8, 128], strides = [1, 1]} : vector<8x512xf32> to vector<8x128xf32>
    %74 = math.tanh %73 : vector<8x128xf32>
    %c0_48 = arith.constant 0 : index
    %c0_49 = arith.constant 0 : index
    %75 = vector.load %arg12[%c0_48, %c0_49] : memref<8x128xf32, #tpu.memory_space<vmem>>, vector<8x128xf32>
    %76 = arith.mulf %71, %75 : vector<8x128xf32>
    %77 = arith.mulf %70, %74 : vector<8x128xf32>
    %78 = arith.addf %76, %77 : vector<8x128xf32>
    %c0_50 = arith.constant 0 : index
    %c0_51 = arith.constant 0 : index
    %79 = vector.load %arg12[%c0_50, %c0_51] : memref<8x128xf32, #tpu.memory_space<vmem>>, vector<8x128xf32>
    tpu.vector_store %arg12[%c0_50, %c0_51], %78 {strides = array<i32>} : memref<8x128xf32, #tpu.memory_space<vmem>>, vector<8x128xf32>,
    %80 = math.tanh %78 : vector<8x128xf32>
    %81 = arith.mulf %72, %80 : vector<8x128xf32>
    %c0_52 = arith.constant 0 : index
    %c0_53 = arith.constant 0 : index
    %82 = vector.load %arg11[%c0_52, %c0_53] : memref<8x128xf32, #tpu.memory_space<vmem>>, vector<8x128xf32>
    tpu.vector_store %arg11[%c0_52, %c0_53], %81 {strides = array<i32>} : memref<8x128xf32, #tpu.memory_space<vmem>>, vector<8x128xf32>,
    %c3 = arith.constant 3 : index
    %c0_54 = arith.constant 0 : index
    %c0_55 = arith.constant 0 : index
    %83 = vector.load %arg10[%c3, %c0_54, %c0_55] : memref<8x8x512xf32, #tpu.memory_space<vmem>>, vector<1x8x512xf32>
    %84 = vector.shape_cast %83 : vector<1x8x512xf32> to vector<8x512xf32>
    %c0_56 = arith.constant 0 : index
    %c0_57 = arith.constant 0 : index
    %85 = vector.load %arg11[%c0_56, %c0_57] : memref<8x128xf32, #tpu.memory_space<vmem>>, vector<8x128xf32>
    %cst_58 = arith.constant dense<0.000000e+00> : vector<8x512xf32>
    %86 = tpu.matmul %85, %13, %cst_58 {dimension_numbers = #tpu.dot_dimension_numbers<[1], [0], [0], [1], [0, 0, 1, 1], [], []>} : vector<8x128xf32>, vector<128x512xf32>, vector<8x512xf32> -> vector<8x512xf32>
    %87 = arith.addf %84, %86 : vector<8x512xf32>
    %88 = arith.negf %87 : vector<8x512xf32>
    %89 = math.exp %88 : vector<8x512xf32>
    %cst_59 = arith.constant 1.000000e+00 : f32
    %90 = vector.broadcast %cst_59 : f32 to vector<8x512xf32>
    %91 = arith.addf %90, %89 : vector<8x512xf32>
    %92 = arith.divf %90, %91 : vector<8x512xf32>
    %93 = vector.extract_strided_slice %92 {offsets = [0, 0], sizes = [8, 128], strides = [1, 1]} : vector<8x512xf32> to vector<8x128xf32>
    %94 = vector.extract_strided_slice %92 {offsets = [0, 128], sizes = [8, 128], strides = [1, 1]} : vector<8x512xf32> to vector<8x128xf32>
    %95 = vector.extract_strided_slice %92 {offsets = [0, 384], sizes = [8, 128], strides = [1, 1]} : vector<8x512xf32> to vector<8x128xf32>
    %96 = vector.extract_strided_slice %87 {offsets = [0, 256], sizes = [8, 128], strides = [1, 1]} : vector<8x512xf32> to vector<8x128xf32>
    %97 = math.tanh %96 : vector<8x128xf32>
    %c0_60 = arith.constant 0 : index
    %c0_61 = arith.constant 0 : index
    %98 = vector.load %arg12[%c0_60, %c0_61] : memref<8x128xf32, #tpu.memory_space<vmem>>, vector<8x128xf32>
    %99 = arith.mulf %94, %98 : vector<8x128xf32>
    %100 = arith.mulf %93, %97 : vector<8x128xf32>
    %101 = arith.addf %99, %100 : vector<8x128xf32>
    %c0_62 = arith.constant 0 : index
    %c0_63 = arith.constant 0 : index
    %102 = vector.load %arg12[%c0_62, %c0_63] : memref<8x128xf32, #tpu.memory_space<vmem>>, vector<8x128xf32>
    tpu.vector_store %arg12[%c0_62, %c0_63], %101 {strides = array<i32>} : memref<8x128xf32, #tpu.memory_space<vmem>>, vector<8x128xf32>,
    %103 = math.tanh %101 : vector<8x128xf32>
    %104 = arith.mulf %95, %103 : vector<8x128xf32>
    %c0_64 = arith.constant 0 : index
    %c0_65 = arith.constant 0 : index
    %105 = vector.load %arg11[%c0_64, %c0_65] : memref<8x128xf32, #tpu.memory_space<vmem>>, vector<8x128xf32>
    tpu.vector_store %arg11[%c0_64, %c0_65], %104 {strides = array<i32>} : memref<8x128xf32, #tpu.memory_space<vmem>>, vector<8x128xf32>,
    %c4 = arith.constant 4 : index
    %c0_66 = arith.constant 0 : index
    %c0_67 = arith.constant 0 : index
    %106 = vector.load %arg10[%c4, %c0_66, %c0_67] : memref<8x8x512xf32, #tpu.memory_space<vmem>>, vector<1x8x512xf32>
    %107 = vector.shape_cast %106 : vector<1x8x512xf32> to vector<8x512xf32>
    %c0_68 = arith.constant 0 : index
    %c0_69 = arith.constant 0 : index
    %108 = vector.load %arg11[%c0_68, %c0_69] : memref<8x128xf32, #tpu.memory_space<vmem>>, vector<8x128xf32>
    %cst_70 = arith.constant dense<0.000000e+00> : vector<8x512xf32>
    %109 = tpu.matmul %108, %13, %cst_70 {dimension_numbers = #tpu.dot_dimension_numbers<[1], [0], [0], [1], [0, 0, 1, 1], [], []>} : vector<8x128xf32>, vector<128x512xf32>, vector<8x512xf32> -> vector<8x512xf32>
    %110 = arith.addf %107, %109 : vector<8x512xf32>
    %111 = arith.negf %110 : vector<8x512xf32>
    %112 = math.exp %111 : vector<8x512xf32>
    %cst_71 = arith.constant 1.000000e+00 : f32
    %113 = vector.broadcast %cst_71 : f32 to vector<8x512xf32>
    %114 = arith.addf %113, %112 : vector<8x512xf32>
    %115 = arith.divf %113, %114 : vector<8x512xf32>
    %116 = vector.extract_strided_slice %115 {offsets = [0, 0], sizes = [8, 128], strides = [1, 1]} : vector<8x512xf32> to vector<8x128xf32>
    %117 = vector.extract_strided_slice %115 {offsets = [0, 128], sizes = [8, 128], strides = [1, 1]} : vector<8x512xf32> to vector<8x128xf32>
    %118 = vector.extract_strided_slice %115 {offsets = [0, 384], sizes = [8, 128], strides = [1, 1]} : vector<8x512xf32> to vector<8x128xf32>
    %119 = vector.extract_strided_slice %110 {offsets = [0, 256], sizes = [8, 128], strides = [1, 1]} : vector<8x512xf32> to vector<8x128xf32>
    %120 = math.tanh %119 : vector<8x128xf32>
    %c0_72 = arith.constant 0 : index
    %c0_73 = arith.constant 0 : index
    %121 = vector.load %arg12[%c0_72, %c0_73] : memref<8x128xf32, #tpu.memory_space<vmem>>, vector<8x128xf32>
    %122 = arith.mulf %117, %121 : vector<8x128xf32>
    %123 = arith.mulf %116, %120 : vector<8x128xf32>
    %124 = arith.addf %122, %123 : vector<8x128xf32>
    %c0_74 = arith.constant 0 : index
    %c0_75 = arith.constant 0 : index
    %125 = vector.load %arg12[%c0_74, %c0_75] : memref<8x128xf32, #tpu.memory_space<vmem>>, vector<8x128xf32>
    tpu.vector_store %arg12[%c0_74, %c0_75], %124 {strides = array<i32>} : memref<8x128xf32, #tpu.memory_space<vmem>>, vector<8x128xf32>,
    %126 = math.tanh %124 : vector<8x128xf32>
    %127 = arith.mulf %118, %126 : vector<8x128xf32>
    %c0_76 = arith.constant 0 : index
    %c0_77 = arith.constant 0 : index
    %128 = vector.load %arg11[%c0_76, %c0_77] : memref<8x128xf32, #tpu.memory_space<vmem>>, vector<8x128xf32>
    tpu.vector_store %arg11[%c0_76, %c0_77], %127 {strides = array<i32>} : memref<8x128xf32, #tpu.memory_space<vmem>>, vector<8x128xf32>,
    %c5 = arith.constant 5 : index
    %c0_78 = arith.constant 0 : index
    %c0_79 = arith.constant 0 : index
    %129 = vector.load %arg10[%c5, %c0_78, %c0_79] : memref<8x8x512xf32, #tpu.memory_space<vmem>>, vector<1x8x512xf32>
    %130 = vector.shape_cast %129 : vector<1x8x512xf32> to vector<8x512xf32>
    %c0_80 = arith.constant 0 : index
    %c0_81 = arith.constant 0 : index
    %131 = vector.load %arg11[%c0_80, %c0_81] : memref<8x128xf32, #tpu.memory_space<vmem>>, vector<8x128xf32>
    %cst_82 = arith.constant dense<0.000000e+00> : vector<8x512xf32>
    %132 = tpu.matmul %131, %13, %cst_82 {dimension_numbers = #tpu.dot_dimension_numbers<[1], [0], [0], [1], [0, 0, 1, 1], [], []>} : vector<8x128xf32>, vector<128x512xf32>, vector<8x512xf32> -> vector<8x512xf32>
    %133 = arith.addf %130, %132 : vector<8x512xf32>
    %134 = arith.negf %133 : vector<8x512xf32>
    %135 = math.exp %134 : vector<8x512xf32>
    %cst_83 = arith.constant 1.000000e+00 : f32
    %136 = vector.broadcast %cst_83 : f32 to vector<8x512xf32>
    %137 = arith.addf %136, %135 : vector<8x512xf32>
    %138 = arith.divf %136, %137 : vector<8x512xf32>
    %139 = vector.extract_strided_slice %138 {offsets = [0, 0], sizes = [8, 128], strides = [1, 1]} : vector<8x512xf32> to vector<8x128xf32>
    %140 = vector.extract_strided_slice %138 {offsets = [0, 128], sizes = [8, 128], strides = [1, 1]} : vector<8x512xf32> to vector<8x128xf32>
    %141 = vector.extract_strided_slice %138 {offsets = [0, 384], sizes = [8, 128], strides = [1, 1]} : vector<8x512xf32> to vector<8x128xf32>
    %142 = vector.extract_strided_slice %133 {offsets = [0, 256], sizes = [8, 128], strides = [1, 1]} : vector<8x512xf32> to vector<8x128xf32>
    %143 = math.tanh %142 : vector<8x128xf32>
    %c0_84 = arith.constant 0 : index
    %c0_85 = arith.constant 0 : index
    %144 = vector.load %arg12[%c0_84, %c0_85] : memref<8x128xf32, #tpu.memory_space<vmem>>, vector<8x128xf32>
    %145 = arith.mulf %140, %144 : vector<8x128xf32>
    %146 = arith.mulf %139, %143 : vector<8x128xf32>
    %147 = arith.addf %145, %146 : vector<8x128xf32>
    %c0_86 = arith.constant 0 : index
    %c0_87 = arith.constant 0 : index
    %148 = vector.load %arg12[%c0_86, %c0_87] : memref<8x128xf32, #tpu.memory_space<vmem>>, vector<8x128xf32>
    tpu.vector_store %arg12[%c0_86, %c0_87], %147 {strides = array<i32>} : memref<8x128xf32, #tpu.memory_space<vmem>>, vector<8x128xf32>,
    %149 = math.tanh %147 : vector<8x128xf32>
    %150 = arith.mulf %141, %149 : vector<8x128xf32>
    %c0_88 = arith.constant 0 : index
    %c0_89 = arith.constant 0 : index
    %151 = vector.load %arg11[%c0_88, %c0_89] : memref<8x128xf32, #tpu.memory_space<vmem>>, vector<8x128xf32>
    tpu.vector_store %arg11[%c0_88, %c0_89], %150 {strides = array<i32>} : memref<8x128xf32, #tpu.memory_space<vmem>>, vector<8x128xf32>,
    %c6 = arith.constant 6 : index
    %c0_90 = arith.constant 0 : index
    %c0_91 = arith.constant 0 : index
    %152 = vector.load %arg10[%c6, %c0_90, %c0_91] : memref<8x8x512xf32, #tpu.memory_space<vmem>>, vector<1x8x512xf32>
    %153 = vector.shape_cast %152 : vector<1x8x512xf32> to vector<8x512xf32>
    %c0_92 = arith.constant 0 : index
    %c0_93 = arith.constant 0 : index
    %154 = vector.load %arg11[%c0_92, %c0_93] : memref<8x128xf32, #tpu.memory_space<vmem>>, vector<8x128xf32>
    %cst_94 = arith.constant dense<0.000000e+00> : vector<8x512xf32>
    %155 = tpu.matmul %154, %13, %cst_94 {dimension_numbers = #tpu.dot_dimension_numbers<[1], [0], [0], [1], [0, 0, 1, 1], [], []>} : vector<8x128xf32>, vector<128x512xf32>, vector<8x512xf32> -> vector<8x512xf32>
    %156 = arith.addf %153, %155 : vector<8x512xf32>
    %157 = arith.negf %156 : vector<8x512xf32>
    %158 = math.exp %157 : vector<8x512xf32>
    %cst_95 = arith.constant 1.000000e+00 : f32
    %159 = vector.broadcast %cst_95 : f32 to vector<8x512xf32>
    %160 = arith.addf %159, %158 : vector<8x512xf32>
    %161 = arith.divf %159, %160 : vector<8x512xf32>
    %162 = vector.extract_strided_slice %161 {offsets = [0, 0], sizes = [8, 128], strides = [1, 1]} : vector<8x512xf32> to vector<8x128xf32>
    %163 = vector.extract_strided_slice %161 {offsets = [0, 128], sizes = [8, 128], strides = [1, 1]} : vector<8x512xf32> to vector<8x128xf32>
    %164 = vector.extract_strided_slice %161 {offsets = [0, 384], sizes = [8, 128], strides = [1, 1]} : vector<8x512xf32> to vector<8x128xf32>
    %165 = vector.extract_strided_slice %156 {offsets = [0, 256], sizes = [8, 128], strides = [1, 1]} : vector<8x512xf32> to vector<8x128xf32>
    %166 = math.tanh %165 : vector<8x128xf32>
    %c0_96 = arith.constant 0 : index
    %c0_97 = arith.constant 0 : index
    %167 = vector.load %arg12[%c0_96, %c0_97] : memref<8x128xf32, #tpu.memory_space<vmem>>, vector<8x128xf32>
    %168 = arith.mulf %163, %167 : vector<8x128xf32>
    %169 = arith.mulf %162, %166 : vector<8x128xf32>
    %170 = arith.addf %168, %169 : vector<8x128xf32>
    %c0_98 = arith.constant 0 : index
    %c0_99 = arith.constant 0 : index
    %171 = vector.load %arg12[%c0_98, %c0_99] : memref<8x128xf32, #tpu.memory_space<vmem>>, vector<8x128xf32>
    tpu.vector_store %arg12[%c0_98, %c0_99], %170 {strides = array<i32>} : memref<8x128xf32, #tpu.memory_space<vmem>>, vector<8x128xf32>,
    %172 = math.tanh %170 : vector<8x128xf32>
    %173 = arith.mulf %164, %172 : vector<8x128xf32>
    %c0_100 = arith.constant 0 : index
    %c0_101 = arith.constant 0 : index
    %174 = vector.load %arg11[%c0_100, %c0_101] : memref<8x128xf32, #tpu.memory_space<vmem>>, vector<8x128xf32>
    tpu.vector_store %arg11[%c0_100, %c0_101], %173 {strides = array<i32>} : memref<8x128xf32, #tpu.memory_space<vmem>>, vector<8x128xf32>,
    %c7 = arith.constant 7 : index
    %c0_102 = arith.constant 0 : index
    %c0_103 = arith.constant 0 : index
    %175 = vector.load %arg10[%c7, %c0_102, %c0_103] : memref<8x8x512xf32, #tpu.memory_space<vmem>>, vector<1x8x512xf32>
    %176 = vector.shape_cast %175 : vector<1x8x512xf32> to vector<8x512xf32>
    %c0_104 = arith.constant 0 : index
    %c0_105 = arith.constant 0 : index
    %177 = vector.load %arg11[%c0_104, %c0_105] : memref<8x128xf32, #tpu.memory_space<vmem>>, vector<8x128xf32>
    %cst_106 = arith.constant dense<0.000000e+00> : vector<8x512xf32>
    %178 = tpu.matmul %177, %13, %cst_106 {dimension_numbers = #tpu.dot_dimension_numbers<[1], [0], [0], [1], [0, 0, 1, 1], [], []>} : vector<8x128xf32>, vector<128x512xf32>, vector<8x512xf32> -> vector<8x512xf32>
    %179 = arith.addf %176, %178 : vector<8x512xf32>
    %180 = arith.negf %179 : vector<8x512xf32>
    %181 = math.exp %180 : vector<8x512xf32>
    %cst_107 = arith.constant 1.000000e+00 : f32
    %182 = vector.broadcast %cst_107 : f32 to vector<8x512xf32>
    %183 = arith.addf %182, %181 : vector<8x512xf32>
    %184 = arith.divf %182, %183 : vector<8x512xf32>
    %185 = vector.extract_strided_slice %184 {offsets = [0, 0], sizes = [8, 128], strides = [1, 1]} : vector<8x512xf32> to vector<8x128xf32>
    %186 = vector.extract_strided_slice %184 {offsets = [0, 128], sizes = [8, 128], strides = [1, 1]} : vector<8x512xf32> to vector<8x128xf32>
    %187 = vector.extract_strided_slice %184 {offsets = [0, 384], sizes = [8, 128], strides = [1, 1]} : vector<8x512xf32> to vector<8x128xf32>
    %188 = vector.extract_strided_slice %179 {offsets = [0, 256], sizes = [8, 128], strides = [1, 1]} : vector<8x512xf32> to vector<8x128xf32>
    %189 = math.tanh %188 : vector<8x128xf32>
    %c0_108 = arith.constant 0 : index
    %c0_109 = arith.constant 0 : index
    %190 = vector.load %arg12[%c0_108, %c0_109] : memref<8x128xf32, #tpu.memory_space<vmem>>, vector<8x128xf32>
    %191 = arith.mulf %186, %190 : vector<8x128xf32>
    %192 = arith.mulf %185, %189 : vector<8x128xf32>
    %193 = arith.addf %191, %192 : vector<8x128xf32>
    %c0_110 = arith.constant 0 : index
    %c0_111 = arith.constant 0 : index
    %194 = vector.load %arg12[%c0_110, %c0_111] : memref<8x128xf32, #tpu.memory_space<vmem>>, vector<8x128xf32>
    tpu.vector_store %arg12[%c0_110, %c0_111], %193 {strides = array<i32>} : memref<8x128xf32, #tpu.memory_space<vmem>>, vector<8x128xf32>,
    %195 = math.tanh %193 : vector<8x128xf32>
    %196 = arith.mulf %187, %195 : vector<8x128xf32>
    %c0_112 = arith.constant 0 : index
    %c0_113 = arith.constant 0 : index
    %197 = vector.load %arg11[%c0_112, %c0_113] : memref<8x128xf32, #tpu.memory_space<vmem>>, vector<8x128xf32>
    tpu.vector_store %arg11[%c0_112, %c0_113], %196 {strides = array<i32>} : memref<8x128xf32, #tpu.memory_space<vmem>>, vector<8x128xf32>,
    %c0_114 = arith.constant 0 : index
    %c0_115 = arith.constant 0 : index
    %198 = vector.load %arg11[%c0_114, %c0_115] : memref<8x128xf32, #tpu.memory_space<vmem>>, vector<8x128xf32>
    %c0_116 = arith.constant 0 : index
    %c0_117 = arith.constant 0 : index
    %199 = vector.load %arg5[%c0_116, %c0_117] : memref<128x256xf32, #tpu.memory_space<vmem>>, vector<128x256xf32>
    %cst_118 = arith.constant dense<0.000000e+00> : vector<8x256xf32>
    %200 = tpu.matmul %198, %199, %cst_118 {dimension_numbers = #tpu.dot_dimension_numbers<[1], [0], [0], [1], [0, 0, 1, 1], [], []>} : vector<8x128xf32>, vector<128x256xf32>, vector<8x256xf32> -> vector<8x256xf32>
    %c0_119 = arith.constant 0 : index
    %c0_120 = arith.constant 0 : index
    %201 = vector.load %arg6[%c0_119, %c0_120] : memref<1x256xf32, #tpu.memory_space<vmem>>, vector<1x256xf32>
    %202 = vector.broadcast %201 : vector<1x256xf32> to vector<8x256xf32>
    %203 = arith.addf %200, %202 : vector<8x256xf32>
    %cst_121 = arith.constant 0.000000e+00 : f32
    %204 = vector.broadcast %cst_121 : f32 to vector<8x256xf32>
    %205 = arith.maximumf %203, %204 : vector<8x256xf32>
    %c0_122 = arith.constant 0 : index
    %c0_123 = arith.constant 0 : index
    %206 = vector.load %arg7[%c0_122, %c0_123] : memref<256x128xf32, #tpu.memory_space<vmem>>, vector<256x128xf32>
    %cst_124 = arith.constant dense<0.000000e+00> : vector<8x128xf32>
    %207 = tpu.matmul %205, %206, %cst_124 {dimension_numbers = #tpu.dot_dimension_numbers<[1], [0], [0], [1], [0, 0, 1, 1], [], []>} : vector<8x256xf32>, vector<256x128xf32>, vector<8x128xf32> -> vector<8x128xf32>
    %c0_125 = arith.constant 0 : index
    %c0_126 = arith.constant 0 : index
    %208 = vector.load %arg8[%c0_125, %c0_126] : memref<1x128xf32, #tpu.memory_space<vmem>>, vector<1x128xf32>
    %209 = vector.broadcast %208 : vector<1x128xf32> to vector<8x128xf32>
    %210 = arith.addf %207, %209 : vector<8x128xf32>
    %c0_127 = arith.constant 0 : index
    %c0_128 = arith.constant 0 : index
    %211 = vector.load %arg9[%c0_127, %c0_128] : memref<8x128xf32, #tpu.memory_space<vmem>>, vector<8x128xf32>
    tpu.vector_store %arg9[%c0_127, %c0_128], %210 {strides = array<i32>} : memref<8x128xf32, #tpu.memory_space<vmem>>, vector<8x128xf32>,
    return
  }
  func.func @transform_0(%arg0: i32) -> (i32, i32, i32) {
    %c0_i32 = arith.constant 0 : i32
    %c0_i32_0 = arith.constant 0 : i32
    %c0_i32_1 = arith.constant 0 : i32
    return %c0_i32, %arg0, %c0_i32_0 : i32, i32, i32
  }
  func.func @transform_1(%arg0: i32) -> (i32, i32) {
    %c0_i32 = arith.constant 0 : i32
    %c0_i32_0 = arith.constant 0 : i32
    %c0_i32_1 = arith.constant 0 : i32
    return %c0_i32, %c0_i32_0 : i32, i32
  }
  func.func @transform_2(%arg0: i32) -> (i32, i32) {
    %c0_i32 = arith.constant 0 : i32
    %c0_i32_0 = arith.constant 0 : i32
    %c0_i32_1 = arith.constant 0 : i32
    return %c0_i32, %c0_i32_0 : i32, i32
  }
  func.func @transform_3(%arg0: i32) -> (i32, i32) {
    %c0_i32 = arith.constant 0 : i32
    %c0_i32_0 = arith.constant 0 : i32
    %c0_i32_1 = arith.constant 0 : i32
    return %c0_i32, %c0_i32_0 : i32, i32
  }
  func.func @transform_4(%arg0: i32) -> (i32, i32) {
    %c0_i32 = arith.constant 0 : i32
    %c0_i32_0 = arith.constant 0 : i32
    %c0_i32_1 = arith.constant 0 : i32
    return %c0_i32, %c0_i32_0 : i32, i32
  }
  func.func @transform_5(%arg0: i32) -> (i32, i32) {
    %c0_i32 = arith.constant 0 : i32
    %c0_i32_0 = arith.constant 0 : i32
    %c0_i32_1 = arith.constant 0 : i32
    return %c0_i32, %c0_i32_0 : i32, i32
  }
  func.func @transform_6(%arg0: i32) -> (i32, i32) {
    %c0_i32 = arith.constant 0 : i32
    %c0_i32_0 = arith.constant 0 : i32
    %c0_i32_1 = arith.constant 0 : i32
    return %c0_i32, %c0_i32_0 : i32, i32
  }
  func.func @transform_7(%arg0: i32) -> (i32, i32) {
    %c0_i32 = arith.constant 0 : i32
    %c0_i32_0 = arith.constant 0 : i32
    %c0_i32_1 = arith.constant 0 : i32
    return %c0_i32, %c0_i32_0 : i32, i32
  }
  func.func @transform_8(%arg0: i32) -> (i32, i32) {
    %c0_i32 = arith.constant 0 : i32
    %c0_i32_0 = arith.constant 0 : i32
    return %arg0, %c0_i32 : i32, i32
  }
}

</mosaic_0001>

<bundles_post_ra>
// kernel: tpu_custom_call.1
= control target key start
LH: loop header
LB: loop body
LE: loop exit
PB: predicated region body
PF: predicated region fallthrough
CT: control target
= control target key end

     0   :  { %13 = vsyncpa [#allocation6], 0  ;;  %s3338_s0 = inlined_call_operand.hbm [shape: f32[8,8,16], index: 0, kind: input, shape index: {}]   ;;  %s3339_s1 = inlined_call_operand.hbm [shape: f32[16,512], index: 1, kind: input, shape index: {}]   ;;  %s3340_s2 = inlined_call_operand.hbm [shape: f32[128,512], index: 2, kind: input, shape index: {}]   ;;  %s3341_s3 = inlined_call_operand.hbm [shape: f32[1,512], index: 3, kind: input, shape index: {}]   ;;  %s3342_s4 = inlined_call_operand.hbm [shape: f32[128,256], index: 4, kind: input, shape index: {}]   ;;  %s3343_s5 = inlined_call_operand.vmem [shape: f32[1,256], index: 5, kind: input, shape index: {}]   ;;  %s3344_s6 = inlined_call_operand.hbm [shape: f32[256,128], index: 6, kind: input, shape index: {}]   ;;  %s3345_s7 = inlined_call_operand.vmem [shape: f32[1,128], index: 7, kind: input, shape index: {}]   ;;  %s3346_s8 = inlined_call_operand.hbm [shape: f32[8,128], index: 8, kind: output, shape index: {}]  }
   0x1   :  { %14 = vsyncpa [#allocation9], 0 }
   0x2   :  { %15 = vsyncpa [#allocation12], 0 }
   0x3   :  { %16 = vsyncpa [#allocation15], 0  ;;  %s35_s29 = sshll.u32 %s3339_s1, 4  ;;  %s36_s29 = int_to_ptr.hbm [resolvable:$true] %s35_s29 }
   0x4   :  { %17 = vsyncpa [#allocation7], 0  ;;  %s2301_s30 = smov [#allocation8]   ;;  %s62_s12 = sshll.u32 %s3341_s3, 4  ;;  %s63_s12 = int_to_ptr.hbm [resolvable:$true] %s62_s12 }
   0x5   :  { %s37_s9 = sshll.u32 %s2301_s30, 4  ;;  %s2302_s13 = smov 512   ;;  %s38_s9 = int_to_ptr.vmem [resolvable:$true] %s37_s9 }
   0x6   :  { %s2303_s14 = smov 32   ;;  %s2304_s15 = smov [#allocation11]  }
   0x7   :  { %43 = dma.hbm_to_vmem [thread:$0]  %s36_s29, 1024, %s38_s9, [#allocation9], %s2302_s13, %s2302_s13, %s2303_s14  }
   0x8   :  { %s64_s16 = sshll.u32 %s2304_s15, 4  ;;  %s22_s19 = sshll.u32 %s3338_s0, 4  ;;  %s65_s16 = int_to_ptr.vmem [resolvable:$true] %s64_s16  ;;  %s23_s19 = int_to_ptr.hbm [resolvable:$true] %s22_s19 }
   0x9   :  { %67 = dma.hbm_to_vmem [thread:$0]  %s63_s12, 64, %s65_s16, [#allocation12]  }
   0xa   :  { %s2305_s1 = smov [#allocation5]   ;;  %s48_s3 = sshll.u32 %s3340_s2, 4  ;;  %s49_s3 = int_to_ptr.hbm [resolvable:$true] %s48_s3 }
   0xb   :  { %s24_s20 = sshll.u32 %s2305_s1, 4  ;;  %s2306_s23 = smov 128   ;;  %s25_s20 = int_to_ptr.vmem [resolvable:$true] %s24_s20 }
   0xc   :  { %s2307_s24 = smov 8   ;;  %s2308_s25 = smov [#allocation10]  }
   0xd   :  { %30 = dma.hbm_to_vmem [thread:$0]  %s23_s19, 1024, %s25_s20, [#allocation6], %s2306_s23, %s2306_s23, %s2307_s24  }
   0xe   :  { %s50_s26 = sshll.u32 %s2308_s25, 4  ;;  %s72_s0 = sshll.u32 %s3342_s4, 4  ;;  %s51_s26 = int_to_ptr.vmem [resolvable:$true] %s50_s26  ;;  %s73_s0 = int_to_ptr.hbm [resolvable:$true] %s72_s0 }
   0xf   :  { %56 = dma.hbm_to_vmem [thread:$0]  %s49_s3, 8192, %s51_s26, [#allocation9], %s2302_s13, %s2302_s13, %s2303_s14  }
  0x10   :  { %s2309_s29 = smov [#allocation13]   ;;  %s87_s2 = sshll.u32 %s3344_s6, 4  ;;  %s88_s2 = int_to_ptr.hbm [resolvable:$true] %s87_s2 }
  0x11   :  { %s74_s30 = sshll.u32 %s2309_s29, 4  ;;  %s2310_s11 = smov 256   ;;  %s75_s30 = int_to_ptr.vmem [resolvable:$true] %s74_s30 }
  0x12   :  { %s2311_s12 = smov 16   ;;  %s2312_s15 = smov [#allocation14]  }
  0x13   :  { %80 = dma.hbm_to_vmem [thread:$0]  %s73_s0, 4096, %s75_s30, [#allocation12], %s2310_s11, %s2310_s11, %s2311_s12  }
  0x14   :  { %s89_s16 = sshll.u32 %s2312_s15, 4  ;;  %s90_s16 = int_to_ptr.vmem [resolvable:$true] %s89_s16 }
  0x15   :  { %95 = dma.hbm_to_vmem [thread:$0]  %s88_s2, 4096, %s90_s16, [#allocation15], %s2306_s23, %s2306_s23, %s2307_s24  }
  0x16   :  { %2291 = dma.done.wait [#allocation6], 1024  }
  0x17   :  { %2292 = vsyncadd [#allocation6], 4294966272 }
  0x18   :  { %2293 = dma.done.wait [#allocation9], 9216  }
  0x19   :  { %2294 = vsyncadd [#allocation9], 4294958080 }
  0x1a   :  { %2295 = dma.done.wait [#allocation12], 4160  }
  0x1b   :  { %2296 = vsyncadd [#allocation12], 4294963136 }
  0x1c   :  { %2297 = dma.done.wait [#allocation15], 4096  }
  0x1d   :  { %2298 = vsyncadd [#allocation15], 4294963200  ;;  %v134_v0 = vld [vmem:[#allocation8 + $0x20] sm:$0xff]  ;;  %v135_v1 = vld [vmem:[#allocation8 + $0x28] sm:$0xff]  ;;  %vm148_vm0 = vcmask 130048   ;;  %s2314_s17 = smov [#allocation16]  }
  0x1e   :  { %v136_v2 = vld [vmem:[#allocation8 + $0x30] sm:$0xff]  ;;  %187 = vmatpush.msra.mxu0 %v134_v0  ;;  %228 = vmatpush.msra.mxu1 %v135_v1  ;;  %v137_v3 = vld [vmem:[#allocation8 + $0x38] sm:$0xff]  ;;  %v130_v4 = vld [vmem:[#allocation8] sm:$0xff]  ;;  %s1845_s18 = sshll.u32 %s2314_s17, 4  ;;  %s1846_s18 = int_to_ptr.vmem [resolvable:$true] %s1845_s18 }
  0x1f   :  { %v131_v5 = vld [vmem:[#allocation8 + $0x8] sm:$0xff]  ;;  %269 = vmatpush.msra.mxu2 %v136_v2  ;;  %310 = vmatpush.msra.mxu3 %v137_v3  ;;  %v132_v6 = vld [vmem:[#allocation8 + $0x10] sm:$0xff]  ;;  %v133_v7 = vld [vmem:[#allocation8 + $0x18] sm:$0xff] }
  0x20   :  { %v122_v8 = vld [vmem:[#allocation5] sm:$0xff]  ;;  %188 = vmatpush.msra.mxu0 %v130_v4  ;;  %229 = vmatpush.msra.mxu1 %v131_v5  ;;  %v2380_v10 = vld [vmem:[#allocation10 + $0x1e8] sm:$0xff]  ;;  %v2384_v11 = vld [vmem:[#allocation10 + $0x1f8] sm:$0xff] }
  0x21   :  { %270 = vmatpush.msra.mxu2 %v132_v6  ;;  %311 = vmatpush.msra.mxu3 %v133_v7  ;;  %v2378_v9 = vld [vmem:[#allocation10 + $0x1e0] sm:$0xff]  ;;  %v2390_v13 = vld [vmem:[#allocation10 + $0x1c8] sm:$0xff]  ;;  %v2394_v14 = vld [vmem:[#allocation10 + $0x1d8] sm:$0xff] }
  0x22   :  { %1860 = vmatmul.msk.f32.vlgmr.msra.gmra.mxu0 %vm148_vm0, %v122_v8  ;;  %1868 = vmatmul.msk.f32.vlgmr.msra.gmra.mxu1 %vm148_vm0, %v122_v8  ;;  %v2388_v12 = vld [vmem:[#allocation10 + $0x1c0] sm:$0xff]  ;;  %v2396_v15 = vld [vmem:[#allocation10 + $0x1f0] sm:$0xff]  ;;  %v2401_v17 = vld [vmem:[#allocation10 + $0x1a8] sm:$0xff] }
  0x23   :  { %1876 = vmatmul.msk.f32.vlgmr.msra.gmra.mxu2 %vm148_vm0, %v122_v8  ;;  %1884 = vmatmul.msk.f32.vlgmr.msra.gmra.mxu3 %vm148_vm0, %v122_v8  ;;  %v2399_v16 = vld [vmem:[#allocation10 + $0x1a0] sm:$0xff]  ;;  %v2404_v18 = vld [vmem:[#allocation10 + $0x1d0] sm:$0xff]  ;;  %v2408_v19 = vld [vmem:[#allocation10 + $0x1b8] sm:$0xff] }
  0x24   :  { %440 = vmatpush.msrb.mxu0 %v2378_v9  ;;  %460 = vmatpush.msrb.mxu1 %v2380_v10  ;;  %v123_v20 = vld [vmem:[#allocation5 + $0x8] sm:$0xff]  ;;  %v2412_v21 = vld [vmem:[#allocation10 + $0x1b0] sm:$0xff]  ;;  %v2416_v22 = vld [vmem:[#allocation10 + $0x180] sm:$0xff] }
  0x25   :  { %500 = vmatpush.msrb.mxu3 %v2384_v11  ;;  %480 = vmatpush.msrb.mxu2 %v2396_v15  ;;  %v2418_v23 = vld [vmem:[#allocation10 + $0x188] sm:$0xff]  ;;  %v2424_v24 = vld [vmem:[#allocation10 + $0x198] sm:$0xff]  ;;  %v2426_v25 = vld [vmem:[#allocation10 + $0x190] sm:$0xff] }
  0x26   :  { %441 = vmatpush.msrb.mxu0 %v2388_v12  ;;  %461 = vmatpush.msrb.mxu1 %v2390_v13  ;;  %v2430_v26 = vld [vmem:[#allocation10 + $0x160] sm:$0xff]  ;;  %v2432_v27 = vld [vmem:[#allocation10 + $0x168] sm:$0xff]  ;;  %v2436_v28 = vld [vmem:[#allocation10 + $0x178] sm:$0xff] }
  0x27   :  { %501 = vmatpush.msrb.mxu3 %v2394_v14  ;;  %481 = vmatpush.msrb.mxu2 %v2404_v18  ;;  %v2438_v29 = vld [vmem:[#allocation10 + $0x170] sm:$0xff]  ;;  %v2441_v30 = vld [vmem:[#allocation10 + $0x140] sm:$0xff]  ;;  %v2443_v31 = vld [vmem:[#allocation10 + $0x148] sm:$0xff] }
  0x28   :  { %442 = vmatpush.msrb.mxu0 %v2399_v16  ;;  %462 = vmatpush.msrb.mxu1 %v2401_v17  ;;  %v2448_v32 = vld [vmem:[#allocation10 + $0x158] sm:$0xff]  ;;  %v2450_v33 = vld [vmem:[#allocation10 + $0x150] sm:$0xff]  ;;  %v2456_v35 = vld [vmem:[#allocation10 + $0x120] sm:$0xff] }
  0x29   :  { %502 = vmatpush.msrb.mxu3 %v2408_v19  ;;  %482 = vmatpush.msrb.mxu2 %v2412_v21  ;;  %v124_v34 = vld [vmem:[#allocation5 + $0x10] sm:$0xff]  ;;  %v2458_v36 = vld [vmem:[#allocation10 + $0x128] sm:$0xff]  ;;  %v2464_v37 = vld [vmem:[#allocation10 + $0x138] sm:$0xff] }
  0x2a   :  { %1861 = vmatmul.msk.f32.gmra.mxu0 %vm148_vm0, %v123_v20  ;;  %1869 = vmatmul.msk.f32.gmra.mxu1 %vm148_vm0, %v123_v20  ;;  %v2466_v38 = vld [vmem:[#allocation10 + $0x130] sm:$0xff]  ;;  %v2470_v39 = vld [vmem:[#allocation10 + $0x100] sm:$0xff]  ;;  %v2472_v40 = vld [vmem:[#allocation10 + $0x108] sm:$0xff] }
  0x2b   :  { %1877 = vmatmul.msk.f32.gmra.mxu2 %vm148_vm0, %v123_v20  ;;  %1885 = vmatmul.msk.f32.gmra.mxu3 %vm148_vm0, %v123_v20  ;;  %v2476_v41 = vld [vmem:[#allocation10 + $0x118] sm:$0xff]  ;;  %v2478_v42 = vld [vmem:[#allocation10 + $0x110] sm:$0xff]  ;;  %v2481_v43 = vld [vmem:[#allocation10 + $0xe0] sm:$0xff] }
  0x2c   :  { %443 = vmatpush.msrb.mxu0 %v2416_v22  ;;  %463 = vmatpush.msrb.mxu1 %v2418_v23  ;;  %v2483_v44 = vld [vmem:[#allocation10 + $0xe8] sm:$0xff]  ;;  %v2488_v45 = vld [vmem:[#allocation10 + $0xf8] sm:$0xff]  ;;  %v2490_v46 = vld [vmem:[#allocation10 + $0xf0] sm:$0xff] }
  0x2d   :  { %503 = vmatpush.msrb.mxu3 %v2424_v24  ;;  %483 = vmatpush.msrb.mxu2 %v2426_v25  ;;  %v125_v47 = vld [vmem:[#allocation5 + $0x18] sm:$0xff]  ;;  %v2496_v48 = vld [vmem:[#allocation10 + $0xc0] sm:$0xff]  ;;  %v2498_v49 = vld [vmem:[#allocation10 + $0xc8] sm:$0xff] }
  0x2e   :  { %444 = vmatpush.msrb.mxu0 %v2430_v26  ;;  %464 = vmatpush.msrb.mxu1 %v2432_v27  ;;  %v2504_v50 = vld [vmem:[#allocation10 + $0xd8] sm:$0xff]  ;;  %v2506_v51 = vld [vmem:[#allocation10 + $0xd0] sm:$0xff]  ;;  %v2510_v52 = vld [vmem:[#allocation10 + $0xa0] sm:$0xff] }
  0x2f   :  { %504 = vmatpush.msrb.mxu3 %v2436_v28  ;;  %484 = vmatpush.msrb.mxu2 %v2438_v29  ;;  %3434 = vst [vmem:[#allocation22_spill] sm:$0xff] %v2504_v50  ;;  %v2512_v53 = vld [vmem:[#allocation10 + $0xa8] sm:$0xff]  ;;  %v2516_v54 = vld [vmem:[#allocation10 + $0xb8] sm:$0xff]  ;;  %v2518_v55 = vld [vmem:[#allocation10 + $0xb0] sm:$0xff] }
  0x30   :  { %445 = vmatpush.msrb.mxu0 %v2441_v30  ;;  %465 = vmatpush.msrb.mxu1 %v2443_v31  ;;  %3435 = vst [vmem:[#allocation23_spill] sm:$0xff] %v2506_v51  ;;  %v2521_v56 = vld [vmem:[#allocation10 + $0x80] sm:$0xff]  ;;  %v2523_v57 = vld [vmem:[#allocation10 + $0x88] sm:$0xff]  ;;  %v2528_v58 = vld [vmem:[#allocation10 + $0x98] sm:$0xff] }
  0x31   :  { %505 = vmatpush.msrb.mxu3 %v2448_v32  ;;  %485 = vmatpush.msrb.mxu2 %v2450_v33  ;;  %3436 = vst [vmem:[#allocation24_spill] sm:$0xff] %v2510_v52  ;;  %v2530_v59 = vld [vmem:[#allocation10 + $0x90] sm:$0xff]  ;;  %v126_v60 = vld [vmem:[#allocation5 + $0x20] sm:$0xff]  ;;  %v2538_v62 = vld [vmem:[#allocation10 + $0x68] sm:$0xff] }
  0x32   :  { %1862 = vmatmul.msk.f32.gmra.mxu0 %vm148_vm0, %v124_v34  ;;  %1870 = vmatmul.msk.f32.gmra.mxu1 %vm148_vm0, %v124_v34  ;;  %3437 = vst [vmem:[#allocation25_spill] sm:$0xff] %v2512_v53  ;;  %v2536_v61 = vld [vmem:[#allocation10 + $0x60] sm:$0xff]  ;;  %v2544_v63 = vld [vmem:[#allocation10 + $0x78] sm:$0xff]  ;;  %v2546_v0 = vld [vmem:[#allocation10 + $0x70] sm:$0xff] }
  0x33   :  { %1878 = vmatmul.msk.f32.gmra.mxu2 %vm148_vm0, %v124_v34  ;;  %1886 = vmatmul.msk.f32.gmra.mxu3 %vm148_vm0, %v124_v34  ;;  %3438 = vst [vmem:[#allocation26_spill] sm:$0xff] %v2516_v54  ;;  %v2550_v1 = vld [vmem:[#allocation10 + $0x40] sm:$0xff]  ;;  %v2552_v2 = vld [vmem:[#allocation10 + $0x48] sm:$0xff]  ;;  %v2556_v3 = vld [vmem:[#allocation10 + $0x58] sm:$0xff] }
  0x34   :  { %446 = vmatpush.msrb.mxu0 %v2456_v35  ;;  %466 = vmatpush.msrb.mxu1 %v2458_v36  ;;  %3439 = vst [vmem:[#allocation27_spill] sm:$0xff] %v2518_v55  ;;  %v2558_v4 = vld [vmem:[#allocation10 + $0x50] sm:$0xff]  ;;  %v2561_v5 = vld [vmem:[#allocation10 + $0x20] sm:$0xff]  ;;  %v2563_v6 = vld [vmem:[#allocation10 + $0x28] sm:$0xff] }
  0x35   :  { %506 = vmatpush.msrb.mxu3 %v2464_v37  ;;  %486 = vmatpush.msrb.mxu2 %v2466_v38  ;;  %3440 = vst [vmem:[#allocation28_spill] sm:$0xff] %v2521_v56  ;;  %v2568_v7 = vld [vmem:[#allocation10 + $0x30] sm:$0xff]  ;;  %v2570_v8 = vld [vmem:[#allocation10 + $0x38] sm:$0xff]  ;;  %v127_v20 = vld [vmem:[#allocation5 + $0x28] sm:$0xff] }
  0x36   :  { %447 = vmatpush.msrb.mxu0 %v2470_v39  ;;  %467 = vmatpush.msrb.mxu1 %v2472_v40  ;;  %3441 = vst [vmem:[#allocation29_spill] sm:$0xff] %v2523_v57  ;;  %v2576_v34 = vld [vmem:[#allocation10] sm:$0xff] }
  0x37   :  { %507 = vmatpush.msrb.mxu3 %v2476_v41  ;;  %487 = vmatpush.msrb.mxu2 %v2478_v42  ;;  %3442 = vst [vmem:[#allocation30_spill] sm:$0xff] %v2528_v58 }
  0x38   :  { %448 = vmatpush.msrb.mxu0 %v2481_v43  ;;  %468 = vmatpush.msrb.mxu1 %v2483_v44  ;;  %3443 = vst [vmem:[#allocation31_spill] sm:$0xff] %v2530_v59 }
  0x39   :  { %508 = vmatpush.msrb.mxu3 %v2488_v45  ;;  %488 = vmatpush.msrb.mxu2 %v2490_v46  ;;  %3444 = vst [vmem:[#allocation32_spill] sm:$0xff] %v2536_v61 }
  0x3a   :  { %1863 = vmatmul.msk.f32.gmra.mxu0 %vm148_vm0, %v125_v47  ;;  %1871 = vmatmul.msk.f32.gmra.mxu1 %vm148_vm0, %v125_v47  ;;  %3445 = vst [vmem:[#allocation33_spill] sm:$0xff] %v2538_v62 }
  0x3b   :  { %1879 = vmatmul.msk.f32.gmra.mxu2 %vm148_vm0, %v125_v47  ;;  %1887 = vmatmul.msk.f32.gmra.mxu3 %vm148_vm0, %v125_v47  ;;  %3446 = vst [vmem:[#allocation34_spill] sm:$0xff] %v2544_v63  ;;  %v2578_v47 = vld [vmem:[#allocation10 + $0x8] sm:$0xff] }
  0x3c   :  { %449 = vmatpush.msrb.mxu0 %v2496_v48  ;;  %469 = vmatpush.msrb.mxu1 %v2498_v49  ;;  %3447 = vst [vmem:[#allocation35_spill] sm:$0xff] %v2546_v0 }
  0x3d   :  { %509 = vmatpush.msrb.mxu3 %v2504_v50  ;;  %489 = vmatpush.msrb.mxu2 %v2506_v51  ;;  %3448 = vst [vmem:[#allocation36_spill] sm:$0xff] %v2550_v1 }
  0x3e   :  { %450 = vmatpush.msrb.mxu0 %v2510_v52  ;;  %470 = vmatpush.msrb.mxu1 %v2512_v53  ;;  %3449 = vst [vmem:[#allocation37_spill] sm:$0xff] %v2552_v2 }
  0x3f   :  { %510 = vmatpush.msrb.mxu3 %v2516_v54  ;;  %490 = vmatpush.msrb.mxu2 %v2518_v55  ;;  %3450 = vst [vmem:[#allocation38_spill] sm:$0xff] %v2556_v3 }
  0x40   :  { %451 = vmatpush.msrb.mxu0 %v2521_v56  ;;  %471 = vmatpush.msrb.mxu1 %v2523_v57  ;;  %3451 = vst [vmem:[#allocation39_spill] sm:$0xff] %v2558_v4 }
  0x41   :  { %511 = vmatpush.msrb.mxu3 %v2528_v58  ;;  %491 = vmatpush.msrb.mxu2 %v2530_v59  ;;  %3452 = vst [vmem:[#allocation40_spill] sm:$0xff] %v2561_v5 }
  0x42   :  { %1864 = vmatmul.msk.f32.gmra.mxu0 %vm148_vm0, %v126_v60  ;;  %1872 = vmatmul.msk.f32.gmra.mxu1 %vm148_vm0, %v126_v60  ;;  %3453 = vst [vmem:[#allocation41_spill] sm:$0xff] %v2563_v6 }
  0x43   :  { %1880 = vmatmul.msk.f32.gmra.mxu2 %vm148_vm0, %v126_v60  ;;  %1888 = vmatmul.msk.f32.gmra.mxu3 %vm148_vm0, %v126_v60  ;;  %3454 = vst [vmem:[#allocation42_spill] sm:$0xff] %v2568_v7  ;;  %v2584_v60 = vld [vmem:[#allocation10 + $0x10] sm:$0xff] }
  0x44   :  { %452 = vmatpush.msrb.mxu0 %v2536_v61  ;;  %472 = vmatpush.msrb.mxu1 %v2538_v62  ;;  %3455 = vst [vmem:[#allocation43_spill] sm:$0xff] %v2570_v8 }
  0x45   :  { %512 = vmatpush.msrb.mxu3 %v2544_v63  ;;  %492 = vmatpush.msrb.mxu2 %v2546_v0  ;;  %3456 = vst [vmem:[#allocation44_spill] sm:$0xff] %v2576_v34 }
  0x46   :  { %453 = vmatpush.msrb.mxu0 %v2550_v1  ;;  %473 = vmatpush.msrb.mxu1 %v2552_v2  ;;  %3457 = vst [vmem:[#allocation45_spill] sm:$0xff] %v2578_v47 }
  0x47   :  { %513 = vmatpush.msrb.mxu3 %v2556_v3  ;;  %493 = vmatpush.msrb.mxu2 %v2558_v4  ;;  %3458 = vst [vmem:[#allocation46_spill] sm:$0xff] %v2584_v60  ;;  %v2586_v3 = vld [vmem:[#allocation10 + $0x18] sm:$0xff] }
  0x48   :  { %454 = vmatpush.msrb.mxu0 %v2561_v5  ;;  %474 = vmatpush.msrb.mxu1 %v2563_v6  ;;  %3459 = vst [vmem:[#allocation47_spill] sm:$0xff] %v2586_v3 }
  0x49   :  { %494 = vmatpush.msrb.mxu2 %v2568_v7  ;;  %514 = vmatpush.msrb.mxu3 %v2570_v8  ;;  %v128_v8 = vld [vmem:[#allocation5 + $0x30] sm:$0xff] }
  0x4a   :  { %1865 = vmatmul.msk.f32.gmra.mxu0 %vm148_vm0, %v127_v20  ;;  %1873 = vmatmul.msk.f32.gmra.mxu1 %vm148_vm0, %v127_v20 }
  0x4b   :  { %1881 = vmatmul.msk.f32.gmra.mxu2 %vm148_vm0, %v127_v20  ;;  %1889 = vmatmul.msk.f32.gmra.mxu3 %vm148_vm0, %v127_v20  ;;  %v129_v20 = vld [vmem:[#allocation5 + $0x38] sm:$0xff] }
  0x4c   :  { %455 = vmatpush.msrb.mxu0 %v2576_v34  ;;  %475 = vmatpush.msrb.mxu1 %v2578_v47 }
  0x4d   :  { %495 = vmatpush.msrb.mxu2 %v2584_v60  ;;  %515 = vmatpush.msrb.mxu3 %v2586_v3 }
  0x4e   :  { %596 = vmatpush.msra.mxu0 %v2378_v9  ;;  %616 = vmatpush.msra.mxu1 %v2380_v10 }
  0x4f   :  { %636 = vmatpush.msra.mxu2 %v2396_v15  ;;  %656 = vmatpush.msra.mxu3 %v2384_v11 }
  0x50   :  { %597 = vmatpush.msra.mxu0 %v2388_v12  ;;  %617 = vmatpush.msra.mxu1 %v2390_v13 }
  0x51   :  { %637 = vmatpush.msra.mxu2 %v2404_v18  ;;  %657 = vmatpush.msra.mxu3 %v2394_v14 }
  0x52   :  { %1866 = vmatmul.msk.f32.gmra.mxu0 %vm148_vm0, %v128_v8  ;;  %1874 = vmatmul.msk.f32.gmra.mxu1 %vm148_vm0, %v128_v8 }
  0x53   :  { %1882 = vmatmul.msk.f32.gmra.mxu2 %vm148_vm0, %v128_v8  ;;  %1890 = vmatmul.msk.f32.gmra.mxu3 %vm148_vm0, %v128_v8  ;;  %v2313_v8 = vmov 0.0  }
  0x54   :  { %598 = vmatpush.msra.mxu0 %v2399_v16  ;;  %618 = vmatpush.msra.mxu1 %v2401_v17 }
  0x55   :  { %638 = vmatpush.msra.mxu2 %v2412_v21  ;;  %658 = vmatpush.msra.mxu3 %v2408_v19 }
  0x56   :  { %599 = vmatpush.msra.mxu0 %v2416_v22  ;;  %619 = vmatpush.msra.mxu1 %v2418_v23 }
  0x57   :  { %639 = vmatpush.msra.mxu2 %v2426_v25  ;;  %659 = vmatpush.msra.mxu3 %v2424_v24 }
  0x58   :  { %600 = vmatpush.msra.mxu0 %v2430_v26  ;;  %620 = vmatpush.msra.mxu1 %v2432_v27 }
  0x59   :  { %640 = vmatpush.msra.mxu2 %v2438_v29  ;;  %660 = vmatpush.msra.mxu3 %v2436_v28 }
  0x5a   :  { %1867 = vmatmul.msk.f32.gmra.mxu0 %vm148_vm0, %v129_v20  ;;  %1875 = vmatmul.msk.f32.gmra.mxu1 %vm148_vm0, %v129_v20 }
  0x5b   :  { %1883 = vmatmul.msk.f32.gmra.mxu2 %vm148_vm0, %v129_v20  ;;  %1891 = vmatmul.msk.f32.gmra.mxu3 %vm148_vm0, %v129_v20  ;;  %v3460_v20 = vld [vmem:[#allocation38_spill] sm:$0xff] }
  0x5c   :  { %601 = vmatpush.msra.mxu0 %v2441_v30  ;;  %621 = vmatpush.msra.mxu1 %v2443_v31 }
  0x5d   :  { %641 = vmatpush.msra.mxu2 %v2450_v33  ;;  %661 = vmatpush.msra.mxu3 %v2448_v32 }
  0x5e   :  { %602 = vmatpush.msra.mxu0 %v2456_v35  ;;  %622 = vmatpush.msra.mxu1 %v2458_v36 }
  0x5f   :  { %642 = vmatpush.msra.mxu2 %v2466_v38  ;;  %662 = vmatpush.msra.mxu3 %v2464_v37 }
  0x60   :  { %603 = vmatpush.msra.mxu0 %v2470_v39  ;;  %623 = vmatpush.msra.mxu1 %v2472_v40 }
  0x61   :  { %643 = vmatpush.msra.mxu2 %v2478_v42  ;;  %663 = vmatpush.msra.mxu3 %v2476_v41 }
  0x62   :  { %456 = vmatmul.f32.vlgmr.msrb.gmra.mxu0 %v2313_v8  ;;  %476 = vmatmul.f32.vlgmr.msrb.gmra.mxu1 %v2313_v8 }
  0x63   :  { %496 = vmatmul.f32.vlgmr.msrb.gmra.mxu2 %v2313_v8  ;;  %516 = vmatmul.f32.vlgmr.msrb.gmra.mxu3 %v2313_v8  ;;  %v3461_v8 = vld [vmem:[#allocation43_spill] sm:$0xff] }
  0x64   :  { %604 = vmatpush.msra.mxu0 %v2481_v43  ;;  %624 = vmatpush.msra.mxu1 %v2483_v44 }
  0x65   :  { %644 = vmatpush.msra.mxu2 %v2490_v46  ;;  %664 = vmatpush.msra.mxu3 %v2488_v45 }
  0x66   :  { %605 = vmatpush.msra.mxu0 %v2496_v48  ;;  %625 = vmatpush.msra.mxu1 %v2498_v49 }
  0x67   :  { %645 = vmatpush.msra.mxu2 %v2506_v51  ;;  %665 = vmatpush.msra.mxu3 %v2504_v50 }
  0x68   :  { %606 = vmatpush.msra.mxu0 %v2510_v52  ;;  %626 = vmatpush.msra.mxu1 %v2512_v53 }
  0x69   :  { %646 = vmatpush.msra.mxu2 %v2518_v55  ;;  %666 = vmatpush.msra.mxu3 %v2516_v54 }
  0x6a   :  { %607 = vmatpush.msra.mxu0 %v2521_v56  ;;  %627 = vmatpush.msra.mxu1 %v2523_v57 }
  0x6b   :  { %647 = vmatpush.msra.mxu2 %v2530_v59  ;;  %667 = vmatpush.msra.mxu3 %v2528_v58 }
  0x6c   :  { %608 = vmatpush.msra.mxu0 %v2536_v61  ;;  %628 = vmatpush.msra.mxu1 %v2538_v62 }
  0x6d   :  { %648 = vmatpush.msra.mxu2 %v2546_v0  ;;  %668 = vmatpush.msra.mxu3 %v2544_v63 }
  0x6e   :  { %609 = vmatpush.msra.mxu0 %v2550_v1  ;;  %629 = vmatpush.msra.mxu1 %v2552_v2 }
  0x6f   :  { %649 = vmatpush.msra.mxu2 %v2558_v4  ;;  %669 = vmatpush.msra.mxu3 %v3460_v20 }
  0x70   :  { %610 = vmatpush.msra.mxu0 %v2561_v5  ;;  %630 = vmatpush.msra.mxu1 %v2563_v6 }
  0x71   :  { %650 = vmatpush.msra.mxu2 %v2568_v7  ;;  %670 = vmatpush.msra.mxu3 %v3461_v8 }
  0x72   :  { %611 = vmatpush.msra.mxu0 %v2576_v34  ;;  %631 = vmatpush.msra.mxu1 %v2578_v47 }
  0x73   :  { %651 = vmatpush.msra.mxu2 %v2584_v60  ;;  %671 = vmatpush.msra.mxu3 %v2586_v3 }
  0x74   :  { %752 = vmatpush.msrb.mxu0 %v2378_v9  ;;  %772 = vmatpush.msrb.mxu1 %v2380_v10 }
  0x75   :  { %792 = vmatpush.msrb.mxu2 %v2396_v15  ;;  %812 = vmatpush.msrb.mxu3 %v2384_v11 }
  0x76   :  { %753 = vmatpush.msrb.mxu0 %v2388_v12  ;;  %773 = vmatpush.msrb.mxu1 %v2390_v13 }
  0x77   :  { %793 = vmatpush.msrb.mxu2 %v2404_v18  ;;  %813 = vmatpush.msrb.mxu3 %v2394_v14 }
  0x78   :  { %754 = vmatpush.msrb.mxu0 %v2399_v16  ;;  %774 = vmatpush.msrb.mxu1 %v2401_v17 }
  0x79   :  { %794 = vmatpush.msrb.mxu2 %v2412_v21  ;;  %814 = vmatpush.msrb.mxu3 %v2408_v19 }
  0x7a   :  { %755 = vmatpush.msrb.mxu0 %v2416_v22  ;;  %775 = vmatpush.msrb.mxu1 %v2418_v23 }
  0x7b   :  { %795 = vmatpush.msrb.mxu2 %v2426_v25  ;;  %815 = vmatpush.msrb.mxu3 %v2424_v24 }
  0x7c   :  { %756 = vmatpush.msrb.mxu0 %v2430_v26  ;;  %776 = vmatpush.msrb.mxu1 %v2432_v27 }
  0x7d   :  { %796 = vmatpush.msrb.mxu2 %v2438_v29  ;;  %816 = vmatpush.msrb.mxu3 %v2436_v28 }
  0x7e   :  { %757 = vmatpush.msrb.mxu0 %v2441_v30  ;;  %777 = vmatpush.msrb.mxu1 %v2443_v31 }
  0x7f   :  { %797 = vmatpush.msrb.mxu2 %v2450_v33  ;;  %817 = vmatpush.msrb.mxu3 %v2448_v32 }
  0x80   :  { %758 = vmatpush.msrb.mxu0 %v2456_v35  ;;  %778 = vmatpush.msrb.mxu1 %v2458_v36 }
  0x81   :  { %798 = vmatpush.msrb.mxu2 %v2466_v38  ;;  %818 = vmatpush.msrb.mxu3 %v2464_v37 }
  0x82   :  { %759 = vmatpush.msrb.mxu0 %v2470_v39  ;;  %779 = vmatpush.msrb.mxu1 %v2472_v40 }
  0x83   :  { %799 = vmatpush.msrb.mxu2 %v2478_v42  ;;  %819 = vmatpush.msrb.mxu3 %v2476_v41 }
  0x84   :  { %760 = vmatpush.msrb.mxu0 %v2481_v43  ;;  %780 = vmatpush.msrb.mxu1 %v2483_v44 }
  0x85   :  { %800 = vmatpush.msrb.mxu2 %v2490_v46  ;;  %820 = vmatpush.msrb.mxu3 %v2488_v45 }
  0x86   :  { %761 = vmatpush.msrb.mxu0 %v2496_v48  ;;  %781 = vmatpush.msrb.mxu1 %v2498_v49 }
  0x87   :  { %801 = vmatpush.msrb.mxu2 %v2506_v51  ;;  %821 = vmatpush.msrb.mxu3 %v2504_v50 }
  0x88   :  { %762 = vmatpush.msrb.mxu0 %v2510_v52  ;;  %782 = vmatpush.msrb.mxu1 %v2512_v53 }
  0x89   :  { %802 = vmatpush.msrb.mxu2 %v2518_v55  ;;  %822 = vmatpush.msrb.mxu3 %v2516_v54 }
  0x8a   :  { %763 = vmatpush.msrb.mxu0 %v2521_v56  ;;  %783 = vmatpush.msrb.mxu1 %v2523_v57 }
  0x8b   :  { %803 = vmatpush.msrb.mxu2 %v2530_v59  ;;  %823 = vmatpush.msrb.mxu3 %v2528_v58 }
  0x8c   :  { %764 = vmatpush.msrb.mxu0 %v2536_v61  ;;  %784 = vmatpush.msrb.mxu1 %v2538_v62 }
  0x8d   :  { %804 = vmatpush.msrb.mxu2 %v2546_v0  ;;  %824 = vmatpush.msrb.mxu3 %v2544_v63 }
  0x8e   :  { %765 = vmatpush.msrb.mxu0 %v2550_v1  ;;  %785 = vmatpush.msrb.mxu1 %v2552_v2  ;;  %v138_v1 = vld [vmem:[#allocation11] sm:$0xf] }
  0x8f   :  { %805 = vmatpush.msrb.mxu2 %v2558_v4  ;;  %825 = vmatpush.msrb.mxu3 %v3460_v20  ;;  %v140_v20 = vperm.slane %v138_v1, 0  ;;  %v141_v63 = vperm.slane %v138_v1, 1 }
  0x90   :  { %766 = vmatpush.msrb.mxu0 %v2561_v5  ;;  %786 = vmatpush.msrb.mxu1 %v2563_v6 }
  0x91   :  { %806 = vmatpush.msrb.mxu2 %v2568_v7  ;;  %826 = vmatpush.msrb.mxu3 %v3461_v8 }
  0x92   :  { %767 = vmatpush.msrb.mxu0 %v2576_v34  ;;  %787 = vmatpush.msrb.mxu1 %v2578_v47  ;;  %v2738_v47 = vperm.slane %v138_v1, 2 }
  0x93   :  { %807 = vmatpush.msrb.mxu2 %v2584_v60  ;;  %827 = vmatpush.msrb.mxu3 %v2586_v3  ;;  %v143_v60 = vperm.slane %v138_v1, 3 }
  0x9f   :  { %v190_v2 = vpop.f32.mrf.mxu0  ;;  %v231_v4 = vpop.f32.mrf.mxu1 }
  0xa6   :  { %v2730_v5 = vpop.f32.mrf.mxu2  ;;  %v2732_v6 = vpop.f32.mrf.mxu3 }
  0xa7   :  { %v193_v7 = vpop.f32.mrf.mxu0  ;;  %v234_v0 = vpop.f32.mrf.mxu1 }
  0xa8   :  { %v2734_v8 = vadd.f32 %v193_v7, %v140_v20  ;;  %v2736_v34 = vadd.f32 %v234_v0, %v141_v63 }
  0xaa   :  { %3462 = vst [vmem:[#allocation48_spill] sm:$0xff] %v2734_v8 }
  0xab   :  { %3463 = vst [vmem:[#allocation49_spill] sm:$0xff] %v2736_v34 }
  0xae   :  { %v275_v62 = vpop.f32.mrf.mxu2  ;;  %v316_v3 = vpop.f32.mrf.mxu3 }
  0xaf   :  { %v2741_v61 = vadd.f32 %v275_v62, %v2738_v47  ;;  %v2743_v58 = vadd.f32 %v316_v3, %v143_v60  ;;  %v196_v59 = vpop.f32.mrf.mxu0  ;;  %v237_v57 = vpop.f32.mrf.mxu1 }
  0xb0   :  { %v2745_v56 = vadd.f32 %v196_v59, %v140_v20  ;;  %v2747_v54 = vadd.f32 %v237_v57, %v141_v63 }
  0xb1   :  { %3464 = vst [vmem:[#allocation50_spill] sm:$0xff] %v2741_v61 }
  0xb2   :  { %3465 = vst [vmem:[#allocation51_spill] sm:$0xff] %v2743_v58 }
  0xb3   :  { %3466 = vst [vmem:[#allocation52_spill] sm:$0xff] %v2745_v56 }
  0xb4   :  { %3467 = vst [vmem:[#allocation53_spill] sm:$0xff] %v2747_v54 }
  0xb6   :  { %v278_v7 = vpop.f32.mrf.mxu2  ;;  %v319_v8 = vpop.f32.mrf.mxu3 }
  0xb7   :  { %v2750_v0 = vadd.f32 %v278_v7, %v2738_v47  ;;  %v2752_v34 = vadd.f32 %v319_v8, %v143_v60  ;;  %v199_v1 = vpop.f32.mrf.mxu0  ;;  %v240_v55 = vpop.f32.mrf.mxu1 }
  0xb8   :  { %v2754_v53 = vadd.f32 %v199_v1, %v140_v20  ;;  %v2756_v62 = vadd.f32 %v240_v55, %v141_v63 }
  0xb9   :  { %3468 = vst [vmem:[#allocation54_spill] sm:$0xff] %v2750_v0 }
  0xba   :  { %3469 = vst [vmem:[#allocation55_spill] sm:$0xff] %v2752_v34 }
  0xbb   :  { %3470 = vst [vmem:[#allocation56_spill] sm:$0xff] %v2754_v53 }
  0xbc   :  { %3471 = vst [vmem:[#allocation57_spill] sm:$0xff] %v2756_v62 }
  0xbe   :  { %v281_v3 = vpop.f32.mrf.mxu2  ;;  %v322_v61 = vpop.f32.mrf.mxu3 }
  0xbf   :  { %v2759_v59 = vadd.f32 %v281_v3, %v2738_v47  ;;  %v2761_v57 = vadd.f32 %v322_v61, %v143_v60  ;;  %v202_v54 = vpop.f32.mrf.mxu0  ;;  %v243_v56 = vpop.f32.mrf.mxu1 }
  0xc0   :  { %v2763_v58 = vadd.f32 %v202_v54, %v140_v20  ;;  %v2765_v7 = vadd.f32 %v243_v56, %v141_v63 }
  0xc1   :  { %3472 = vst [vmem:[#allocation58_spill] sm:$0xff] %v2759_v59 }
  0xc2   :  { %3473 = vst [vmem:[#allocation59_spill] sm:$0xff] %v2761_v57 }
  0xc3   :  { %3474 = vst [vmem:[#allocation60_spill] sm:$0xff] %v2763_v58 }
  0xc4   :  { %3475 = vst [vmem:[#allocation61_spill] sm:$0xff] %v2765_v7 }
  0xc6   :  { %v284_v8 = vpop.f32.mrf.mxu2  ;;  %v325_v0 = vpop.f32.mrf.mxu3 }
  0xc7   :  { %v2768_v1 = vadd.f32 %v284_v8, %v2738_v47  ;;  %v2770_v55 = vadd.f32 %v325_v0, %v143_v60  ;;  %v205_v62 = vpop.f32.mrf.mxu0  ;;  %v246_v53 = vpop.f32.mrf.mxu1 }
  0xc8   :  { %v2772_v34 = vadd.f32 %v205_v62, %v140_v20  ;;  %v2774_v3 = vadd.f32 %v246_v53, %v141_v63 }
  0xc9   :  { %3476 = vst [vmem:[#allocation62_spill] sm:$0xff] %v2768_v1 }
  0xca   :  { %3477 = vst [vmem:[#allocation63_spill] sm:$0xff] %v2770_v55 }
  0xcb   :  { %3478 = vst [vmem:[#allocation64_spill] sm:$0xff] %v2772_v34 }
  0xcc   :  { %3479 = vst [vmem:[#allocation65_spill] sm:$0xff] %v2774_v3 }
  0xce   :  { %v287_v61 = vpop.f32.mrf.mxu2  ;;  %v328_v59 = vpop.f32.mrf.mxu3 }
  0xcf   :  { %v2777_v54 = vadd.f32 %v287_v61, %v2738_v47  ;;  %v2779_v56 = vadd.f32 %v328_v59, %v143_v60  ;;  %v208_v7 = vpop.f32.mrf.mxu0  ;;  %v249_v58 = vpop.f32.mrf.mxu1  ;;  %v191_v59 = vadd.f32 %v190_v2, %v140_v20 }
  0xd0   :  { %v2781_v57 = vadd.f32 %v208_v7, %v140_v20  ;;  %v2783_v8 = vadd.f32 %v249_v58, %v141_v63 }
  0xd1   :  { %3480 = vst [vmem:[#allocation66_spill] sm:$0xff] %v2777_v54  ;;  %v232_v54 = vadd.f32 %v231_v4, %v141_v63 }
  0xd2   :  { %3481 = vst [vmem:[#allocation67_spill] sm:$0xff] %v2779_v56 }
  0xd3   :  { %3482 = vst [vmem:[#allocation68_spill] sm:$0xff] %v2781_v57 }
  0xd4   :  { %3483 = vst [vmem:[#allocation69_spill] sm:$0xff] %v2783_v8 }
  0xd6   :  { %v290_v0 = vpop.f32.mrf.mxu2  ;;  %v331_v1 = vpop.f32.mrf.mxu3 }
  0xd7   :  { %v2786_v62 = vadd.f32 %v290_v0, %v2738_v47  ;;  %v2788_v53 = vadd.f32 %v331_v1, %v143_v60  ;;  %v211_v3 = vpop.f32.mrf.mxu0  ;;  %v252_v34 = vpop.f32.mrf.mxu1 }
  0xd8   :  { %v2790_v55 = vadd.f32 %v211_v3, %v140_v20  ;;  %v2792_v61 = vadd.f32 %v252_v34, %v141_v63  ;;  %v314_v3 = vadd.f32 %v2732_v6, %v143_v60 }
  0xd9   :  { %3484 = vst [vmem:[#allocation70_spill] sm:$0xff] %v2786_v62 }
  0xda   :  { %3485 = vst [vmem:[#allocation71_spill] sm:$0xff] %v2788_v53 }
  0xdb   :  { %3486 = vst [vmem:[#allocation72_spill] sm:$0xff] %v2790_v55 }
  0xdc   :  { %3487 = vst [vmem:[#allocation73_spill] sm:$0xff] %v2792_v61 }
  0xde   :  { %v293_v56 = vpop.f32.mrf.mxu2  ;;  %v334_v7 = vpop.f32.mrf.mxu3 }
  0xdf   :  { %v2795_v58 = vadd.f32 %v293_v56, %v2738_v47  ;;  %v2797_v8 = vadd.f32 %v334_v7, %v143_v60  ;;  %v457_v57 = vpop.f32.mrf.mxu0  ;;  %v477_v0 = vpop.f32.mrf.mxu1 }
  0xe0   :  { %v520_v62 = vadd.f32 %v457_v57, %v191_v59  ;;  %v521_v1 = vadd.f32 %v477_v0, %v232_v54  ;;  %v273_v57 = vadd.f32 %v2730_v5, %v2738_v47 }
  0xe1   :  { %3488 = vst [vmem:[#allocation74_spill] sm:$0xff] %v2795_v58 }
  0xe2   :  { %3489 = vst [vmem:[#allocation75_spill] sm:$0xff] %v2797_v8  ;;  %v1892_v53 = vmul.f32 -1.442695, %v520_v62  ;;  %v1893_v52 = vmul.f32 -1.442695, %v521_v1 }
  0xe4   :  { %1931 = vpow2.f32 %v1892_v53 }
  0xe5   :  { %1933 = vpow2.f32 %v1893_v52 }
  0xe6   :  { %v517_v34 = vpop.f32.mrf.mxu3  ;;  %v497_v7 = vpop.f32.mrf.mxu2 }
  0xe7   :  { %v523_v2 = vadd.f32 %v517_v34, %v314_v3  ;;  %v522_v53 = vadd.f32 %v497_v7, %v273_v57 }
  0xe9   :  { %v1894_v63 = vmul.f32 -1.442695, %v523_v2 }
  0xea   :  { %v1932_v4 = vpop.eup %1931 }
  0xeb   :  { %v1934_v20 = vpop.eup %1933  ;;  %v533_v61 = vadd.f32 1.0, %v1932_v4  ;;  %1935 = vpow2.f32 %v1894_v63 }
  0xec   :  { %v534_v56 = vadd.f32 1.0, %v1934_v20 }
  0xed   :  { %1937 = vrcp.f32 %v533_v61  ;;  %v547_v1 = vand.u32 2147483648, %v533_v61  ;;  %v545_v2 = vand.u32 2147483647, %v533_v61  ;;  %vm541_vm3 = vweird.f32 %v533_v61 }
  0xee   :  { %1939 = vrcp.f32 %v534_v56  ;;  %v562_v3 = vand.u32 2147483648, %v534_v56  ;;  %v560_v4 = vand.u32 2147483647, %v534_v56  ;;  %vm556_vm4 = vweird.f32 %v534_v56 }
  0xef   :  { %v548_v47 = vor.u32 1.1754944e-38, %v547_v1  ;;  %vm546_vm6 = vcmp.eq.f32.partialorder %v545_v2, 8.507059e+37 }
  0xf0   :  { %v563_v57 = vor.u32 1.1754944e-38, %v562_v3  ;;  %vm561_vm8 = vcmp.eq.f32.partialorder %v560_v4, 8.507059e+37 }
  0xf1   :  { %v1936_v58 = vpop.eup %1935 }
  0xf2   :  { %v535_v54 = vadd.f32 1.0, %v1936_v58 }
  0xf3   :  { %v1938_v62 = vpop.eup %1937 }
  0xf4   :  { %v1940_v6 = vpop.eup %1939  ;;  %v537_v52 = vmul.f32 %v1938_v62, %v533_v61  ;;  %1941 = vrcp.f32 %v535_v54  ;;  %vm542_vm1 = vweird.f32 %v1938_v62  ;;  %vm571_vm10 = vweird.f32 %v535_v54 }
  0xf5   :  { %v552_v60 = vmul.f32 %v1940_v6, %v534_v56  ;;  %1943 = vtanh.f32 %v522_v53  ;;  %vm557_vm2 = vweird.f32 %v1940_v6  ;;  %vm543_vm5 = vmor %vm541_vm3, %vm542_vm1  ;;  %v577_v56 = vand.u32 2147483648, %v535_v54 }
  0xf6   :  { %v538_v59 = vsub.f32 1.0, %v537_v52  ;;  %vm558_vm7 = vmor %vm556_vm4, %vm557_vm2 }
  0xf7   :  { %v553_v0 = vsub.f32 1.0, %v552_v60  ;;  %v578_v3 = vor.u32 1.1754944e-38, %v577_v56 }
  0xf8   :  { %v539_v34 = vmul.f32 %v1938_v62, %v538_v59 }
  0xf9   :  { %v554_v63 = vmul.f32 %v1940_v6, %v553_v0 }
  0xfa   :  { %v1942_v20 = vpop.eup %1941  ;;  %v540_v5 = vadd.f32 %v1938_v62, %v539_v34 }
  0xfb   :  { %v555_v58 = vadd.f32 %v1940_v6, %v554_v63  ;;  %v567_v7 = vmul.f32 %v1942_v20, %v535_v54  ;;  %v1944_v53 = vpop.eup %1943  ;;  %vm572_vm9 = vweird.f32 %v1942_v20 }
  0xfc   :  { %v544_v52 = vsel %vm543_vm5, %v1938_v62, %v540_v5  ;;  %v575_v62 = vand.u32 2147483647, %v535_v54  ;;  %vm573_vm11 = vmor %vm571_vm10, %vm572_vm9 }
  0xfd   :  { %v549_v60 = vsel %vm546_vm6, %v548_v47, %v544_v52  ;;  %v559_v59 = vsel %vm558_vm7, %v1940_v6, %v555_v58  ;;  %v568_v8 = vsub.f32 1.0, %v567_v7  ;;  %v3519_v47 = vld [vmem:[#allocation50_spill] sm:$0xff] }
  0xfe   :  { %v564_v0 = vsel %vm561_vm8, %v563_v57, %v559_v59  ;;  %v584_v55 = vmul.f32 %v1944_v53, %v549_v60  ;;  %vm576_vm12 = vcmp.eq.f32.partialorder %v575_v62, 8.507059e+37 }
  0xff   :  { %v583_v50 = vmul.f32 0.0, %v564_v0  ;;  %v569_v51 = vmul.f32 %v1942_v20, %v568_v8 }
 0x101   :  { %v2802_v34 = vadd.f32 %v584_v55, %v583_v50  ;;  %v570_v61 = vadd.f32 %v1942_v20, %v569_v51 }
 0x103   :  { %1945 = vtanh.f32 %v2802_v34  ;;  %v574_v1 = vsel %vm573_vm11, %v1942_v20, %v570_v61 }
 0x104   :  { %v579_v2 = vsel %vm576_vm12, %v578_v3, %v574_v1 }
 0x109   :  { %v1946_v6 = vpop.eup %1945 }
 0x10a   :  { %v588_v63 = vmul.f32 %v1946_v6, %v579_v2 }
 0x10c   :  { %612 = vmatmul.f32.vlgmr.msra.gmra.mxu0 %v588_v63  ;;  %632 = vmatmul.f32.vlgmr.msra.gmra.mxu1 %v588_v63 }
 0x10d   :  { %652 = vmatmul.f32.vlgmr.msra.gmra.mxu2 %v588_v63  ;;  %672 = vmatmul.f32.vlgmr.msra.gmra.mxu3 %v588_v63 }
 0x10e   :  { %908 = vmatpush.msra.mxu0 %v2378_v9  ;;  %928 = vmatpush.msra.mxu1 %v2380_v10  ;;  %v3490_v9 = vld [vmem:[#allocation23_spill] sm:$0xff]  ;;  %v3491_v10 = vld [vmem:[#allocation22_spill] sm:$0xff] }
 0x10f   :  { %948 = vmatpush.msra.mxu2 %v2396_v15  ;;  %968 = vmatpush.msra.mxu3 %v2384_v11  ;;  %v3492_v11 = vld [vmem:[#allocation24_spill] sm:$0xff] }
 0x110   :  { %909 = vmatpush.msra.mxu0 %v2388_v12  ;;  %929 = vmatpush.msra.mxu1 %v2390_v13  ;;  %v3493_v12 = vld [vmem:[#allocation25_spill] sm:$0xff]  ;;  %v3494_v13 = vld [vmem:[#allocation27_spill] sm:$0xff]  ;;  %v3496_v15 = vld [vmem:[#allocation28_spill] sm:$0xff] }
 0x111   :  { %949 = vmatpush.msra.mxu2 %v2404_v18  ;;  %969 = vmatpush.msra.mxu3 %v2394_v14  ;;  %v3495_v14 = vld [vmem:[#allocation26_spill] sm:$0xff] }
 0x112   :  { %910 = vmatpush.msra.mxu0 %v2399_v16  ;;  %930 = vmatpush.msra.mxu1 %v2401_v17  ;;  %v3497_v16 = vld [vmem:[#allocation29_spill] sm:$0xff]  ;;  %v3498_v17 = vld [vmem:[#allocation31_spill] sm:$0xff]  ;;  %v3499_v18 = vld [vmem:[#allocation30_spill] sm:$0xff] }
 0x113   :  { %950 = vmatpush.msra.mxu2 %v2412_v21  ;;  %970 = vmatpush.msra.mxu3 %v2408_v19  ;;  %v3500_v19 = vld [vmem:[#allocation32_spill] sm:$0xff]  ;;  %v3501_v21 = vld [vmem:[#allocation33_spill] sm:$0xff] }
 0x114   :  { %911 = vmatpush.msra.mxu0 %v2416_v22  ;;  %931 = vmatpush.msra.mxu1 %v2418_v23  ;;  %v3502_v22 = vld [vmem:[#allocation35_spill] sm:$0xff]  ;;  %v3503_v23 = vld [vmem:[#allocation34_spill] sm:$0xff] }
 0x115   :  { %951 = vmatpush.msra.mxu2 %v2426_v25  ;;  %971 = vmatpush.msra.mxu3 %v2424_v24  ;;  %v3504_v24 = vld [vmem:[#allocation36_spill] sm:$0xff]  ;;  %v3505_v25 = vld [vmem:[#allocation37_spill] sm:$0xff] }
 0x116   :  { %912 = vmatpush.msra.mxu0 %v2430_v26  ;;  %932 = vmatpush.msra.mxu1 %v2432_v27  ;;  %v3506_v26 = vld [vmem:[#allocation39_spill] sm:$0xff]  ;;  %v3507_v27 = vld [vmem:[#allocation38_spill] sm:$0xff] }
 0x117   :  { %952 = vmatpush.msra.mxu2 %v2438_v29  ;;  %972 = vmatpush.msra.mxu3 %v2436_v28  ;;  %v3508_v28 = vld [vmem:[#allocation40_spill] sm:$0xff]  ;;  %v3509_v29 = vld [vmem:[#allocation41_spill] sm:$0xff] }
 0x118   :  { %913 = vmatpush.msra.mxu0 %v2441_v30  ;;  %933 = vmatpush.msra.mxu1 %v2443_v31  ;;  %v3510_v30 = vld [vmem:[#allocation42_spill] sm:$0xff]  ;;  %v3511_v31 = vld [vmem:[#allocation43_spill] sm:$0xff] }
 0x119   :  { %953 = vmatpush.msra.mxu2 %v2450_v33  ;;  %973 = vmatpush.msra.mxu3 %v2448_v32  ;;  %v3512_v32 = vld [vmem:[#allocation44_spill] sm:$0xff]  ;;  %v3513_v33 = vld [vmem:[#allocation45_spill] sm:$0xff] }
 0x11a   :  { %914 = vmatpush.msra.mxu0 %v2456_v35  ;;  %934 = vmatpush.msra.mxu1 %v2458_v36  ;;  %v3514_v35 = vld [vmem:[#allocation46_spill] sm:$0xff]  ;;  %v3515_v36 = vld [vmem:[#allocation47_spill] sm:$0xff] }
 0x11b   :  { %954 = vmatpush.msra.mxu2 %v2466_v38  ;;  %974 = vmatpush.msra.mxu3 %v2464_v37 }
 0x11c   :  { %915 = vmatpush.msra.mxu0 %v2470_v39  ;;  %935 = vmatpush.msra.mxu1 %v2472_v40  ;;  %v3516_v39 = vld [vmem:[#allocation48_spill] sm:$0xff] }
 0x11d   :  { %955 = vmatpush.msra.mxu2 %v2478_v42  ;;  %975 = vmatpush.msra.mxu3 %v2476_v41  ;;  %v3517_v41 = vld [vmem:[#allocation49_spill] sm:$0xff] }
 0x11e   :  { %916 = vmatpush.msra.mxu0 %v2481_v43  ;;  %936 = vmatpush.msra.mxu1 %v2483_v44 }
 0x11f   :  { %956 = vmatpush.msra.mxu2 %v2490_v46  ;;  %976 = vmatpush.msra.mxu3 %v2488_v45  ;;  %v3518_v46 = vld [vmem:[#allocation51_spill] sm:$0xff] }
 0x120   :  { %917 = vmatpush.msra.mxu0 %v2496_v48  ;;  %937 = vmatpush.msra.mxu1 %v2498_v49 }
 0x121   :  { %957 = vmatpush.msra.mxu2 %v3490_v9  ;;  %977 = vmatpush.msra.mxu3 %v3491_v10 }
 0x122   :  { %918 = vmatpush.msra.mxu0 %v3492_v11  ;;  %938 = vmatpush.msra.mxu1 %v3493_v12 }
 0x123   :  { %958 = vmatpush.msra.mxu2 %v3494_v13  ;;  %978 = vmatpush.msra.mxu3 %v3495_v14 }
 0x124   :  { %919 = vmatpush.msra.mxu0 %v3496_v15  ;;  %939 = vmatpush.msra.mxu1 %v3497_v16 }
 0x125   :  { %959 = vmatpush.msra.mxu2 %v3498_v17  ;;  %979 = vmatpush.msra.mxu3 %v3499_v18 }
 0x126   :  { %920 = vmatpush.msra.mxu0 %v3500_v19  ;;  %940 = vmatpush.msra.mxu1 %v3501_v21 }
 0x127   :  { %960 = vmatpush.msra.mxu2 %v3502_v22  ;;  %980 = vmatpush.msra.mxu3 %v3503_v23 }
 0x128   :  { %921 = vmatpush.msra.mxu0 %v3504_v24  ;;  %941 = vmatpush.msra.mxu1 %v3505_v25 }
 0x129   :  { %961 = vmatpush.msra.mxu2 %v3506_v26  ;;  %981 = vmatpush.msra.mxu3 %v3507_v27 }
 0x12a   :  { %922 = vmatpush.msra.mxu0 %v3508_v28  ;;  %942 = vmatpush.msra.mxu1 %v3509_v29 }
 0x12b   :  { %962 = vmatpush.msra.mxu2 %v3510_v30  ;;  %982 = vmatpush.msra.mxu3 %v3511_v31 }
 0x12c   :  { %923 = vmatpush.msra.mxu0 %v3512_v32  ;;  %943 = vmatpush.msra.mxu1 %v3513_v33 }
 0x12d   :  { %963 = vmatpush.msra.mxu2 %v3514_v35  ;;  %983 = vmatpush.msra.mxu3 %v3515_v36 }
 0x189   :  { %v613_v37 = vpop.f32.mrf.mxu0  ;;  %v633_v38 = vpop.f32.mrf.mxu1 }
 0x18a   :  { %v676_v40 = vadd.f32 %v613_v37, %v3516_v39  ;;  %v677_v42 = vadd.f32 %v633_v38, %v3517_v41  ;;  %v2880_v37 = vld [vmem:[#allocation10 + $0x1e8] sm:$0xff]  ;;  %v2883_v38 = vld [vmem:[#allocation10 + $0x1f0] sm:$0xff]  ;;  %v2886_v39 = vld [vmem:[#allocation10 + $0x1f8] sm:$0xff] }
 0x18b   :  { %v2892_v41 = vld [vmem:[#allocation10 + $0x1c8] sm:$0xff] }
 0x18c   :  { %v1895_v43 = vmul.f32 -1.442695, %v676_v40  ;;  %v1896_v44 = vmul.f32 -1.442695, %v677_v42  ;;  %v2889_v40 = vld [vmem:[#allocation10 + $0x1c0] sm:$0xff]  ;;  %v2895_v42 = vld [vmem:[#allocation10 + $0x1d0] sm:$0xff] }
 0x18e   :  { %1947 = vpow2.f32 %v1895_v43  ;;  %v2898_v43 = vld [vmem:[#allocation10 + $0x1d8] sm:$0xff] }
 0x18f   :  { %1949 = vpow2.f32 %v1896_v44  ;;  %v2901_v44 = vld [vmem:[#allocation10 + $0x1a0] sm:$0xff] }
 0x190   :  { %v673_v45 = vpop.f32.mrf.mxu3  ;;  %v653_v54 = vpop.f32.mrf.mxu2 }
 0x191   :  { %v679_v48 = vadd.f32 %v673_v45, %v3518_v46  ;;  %v678_v58 = vadd.f32 %v653_v54, %v3519_v47  ;;  %v2904_v45 = vld [vmem:[#allocation10 + $0x1a8] sm:$0xff]  ;;  %v2907_v46 = vld [vmem:[#allocation10 + $0x1b0] sm:$0xff] }
 0x192   :  { %v2928_v54 = vld [vmem:[#allocation10 + $0x168] sm:$0xff] }
 0x193   :  { %v1897_v49 = vmul.f32 -1.442695, %v679_v48  ;;  %v2910_v48 = vld [vmem:[#allocation10 + $0x1b8] sm:$0xff]  ;;  %v2940_v47 = vld [vmem:[#allocation10 + $0x148] sm:$0xff] }
 0x194   :  { %v1948_v50 = vpop.eup %1947 }
 0x195   :  { %v1950_v51 = vpop.eup %1949  ;;  %v689_v55 = vadd.f32 1.0, %v1948_v50  ;;  %1951 = vpow2.f32 %v1897_v49  ;;  %v2913_v49 = vld [vmem:[#allocation10 + $0x180] sm:$0xff]  ;;  %v2916_v50 = vld [vmem:[#allocation10 + $0x188] sm:$0xff] }
 0x196   :  { %v690_v8 = vadd.f32 1.0, %v1950_v51  ;;  %v2919_v51 = vld [vmem:[#allocation10 + $0x190] sm:$0xff] }
 0x197   :  { %1953 = vrcp.f32 %v689_v55  ;;  %v703_v59 = vand.u32 2147483648, %v689_v55  ;;  %v701_v56 = vand.u32 2147483647, %v689_v55  ;;  %vm697_vm15 = vweird.f32 %v689_v55 }
 0x198   :  { %1955 = vrcp.f32 %v690_v8  ;;  %v718_v0 = vand.u32 2147483648, %v690_v8  ;;  %v716_v1 = vand.u32 2147483647, %v690_v8  ;;  %vm712_vm0 = vweird.f32 %v690_v8 }
 0x199   :  { %v704_v2 = vor.u32 1.1754944e-38, %v703_v59  ;;  %vm702_vm3 = vcmp.eq.f32.partialorder %v701_v56, 8.507059e+37  ;;  %v2961_v59 = vld [vmem:[#allocation10 + $0x100] sm:$0xff]  ;;  %v2970_v56 = vld [vmem:[#allocation10 + $0x118] sm:$0xff] }
 0x19a   :  { %v719_v10 = vor.u32 1.1754944e-38, %v718_v0  ;;  %vm717_vm4 = vcmp.eq.f32.partialorder %v716_v1, 8.507059e+37  ;;  %v2964_v0 = vld [vmem:[#allocation10 + $0x108] sm:$0xff] }
 0x19b   :  { %v1952_v4 = vpop.eup %1951  ;;  %v2976_v1 = vld [vmem:[#allocation10 + $0xe8] sm:$0xff] }
 0x19c   :  { %v691_v20 = vadd.f32 1.0, %v1952_v4  ;;  %v2931_v4 = vld [vmem:[#allocation10 + $0x170] sm:$0xff] }
 0x19d   :  { %v1954_v5 = vpop.eup %1953 }
 0x19e   :  { %v1956_v7 = vpop.eup %1955  ;;  %v693_v57 = vmul.f32 %v1954_v5, %v689_v55  ;;  %1957 = vrcp.f32 %v691_v20  ;;  %vm698_vm13 = vweird.f32 %v1954_v5  ;;  %v733_v23 = vand.u32 2147483648, %v691_v20  ;;  %v2922_v55 = vld [vmem:[#allocation10 + $0x198] sm:$0xff] }
 0x19f   :  { %v708_v52 = vmul.f32 %v1956_v7, %v690_v8  ;;  %1959 = vtanh.f32 %v678_v58  ;;  %vm713_vm14 = vweird.f32 %v1956_v7  ;;  %vm699_vm1 = vmor %vm697_vm15, %vm698_vm13  ;;  %vm727_vm6 = vweird.f32 %v691_v20  ;;  %v2925_v8 = vld [vmem:[#allocation10 + $0x160] sm:$0xff]  ;;  %v2943_v58 = vld [vmem:[#allocation10 + $0x150] sm:$0xff] }
 0x1a0   :  { %v694_v53 = vsub.f32 1.0, %v693_v57  ;;  %vm714_vm2 = vmor %vm712_vm0, %vm713_vm14  ;;  %v731_v24 = vand.u32 2147483647, %v691_v20  ;;  %v734_v26 = vor.u32 1.1754944e-38, %v733_v23  ;;  %v2949_v57 = vld [vmem:[#allocation10 + $0x120] sm:$0xff]  ;;  %v3027_v23 = vld [vmem:[#allocation10 + $0x70] sm:$0xff] }
 0x1a1   :  { %v709_v60 = vsub.f32 1.0, %v708_v52  ;;  %v2952_v52 = vld [vmem:[#allocation10 + $0x128] sm:$0xff]  ;;  %3532 = vst [vmem:[#allocation35_spill] sm:$0xff] %v3027_v23 }
 0x1a2   :  { %v695_v61 = vmul.f32 %v1954_v5, %v694_v53  ;;  %vm732_vm8 = vcmp.eq.f32.partialorder %v731_v24, 8.507059e+37  ;;  %v2955_v53 = vld [vmem:[#allocation10 + $0x130] sm:$0xff]  ;;  %v3030_v24 = vld [vmem:[#allocation10 + $0x78] sm:$0xff] }
 0x1a3   :  { %v710_v62 = vmul.f32 %v1956_v7, %v709_v60  ;;  %v2958_v60 = vld [vmem:[#allocation10 + $0x138] sm:$0xff]  ;;  %3533 = vst [vmem:[#allocation34_spill] sm:$0xff] %v3030_v24 }
 0x1a4   :  { %v1958_v3 = vpop.eup %1957  ;;  %v696_v6 = vadd.f32 %v1954_v5, %v695_v61  ;;  %v2967_v61 = vld [vmem:[#allocation10 + $0x110] sm:$0xff] }
 0x1a5   :  { %v711_v63 = vadd.f32 %v1956_v7, %v710_v62  ;;  %v723_v9 = vmul.f32 %v1958_v3, %v691_v20  ;;  %v1960_v12 = vpop.eup %1959  ;;  %vm728_vm5 = vweird.f32 %v1958_v3  ;;  %v2934_v20 = vld [vmem:[#allocation10 + $0x178] sm:$0xff]  ;;  %v2973_v62 = vld [vmem:[#allocation10 + $0xe0] sm:$0xff] }
 0x1a6   :  { %v700_v11 = vsel %vm699_vm1, %v1954_v5, %v696_v6  ;;  %vm729_vm7 = vmor %vm727_vm6, %vm728_vm5  ;;  %v2937_v5 = vld [vmem:[#allocation10 + $0x140] sm:$0xff]  ;;  %v2982_v6 = vld [vmem:[#allocation10 + $0xf8] sm:$0xff] }
 0x1a7   :  { %v705_v13 = vsel %vm702_vm3, %v704_v2, %v700_v11  ;;  %v715_v14 = vsel %vm714_vm2, %v1956_v7, %v711_v63  ;;  %v724_v15 = vsub.f32 1.0, %v723_v9  ;;  %v2946_v7 = vld [vmem:[#allocation10 + $0x158] sm:$0xff]  ;;  %v2985_v2 = vld [vmem:[#allocation10 + $0xc0] sm:$0xff]  ;;  %v2988_v63 = vld [vmem:[#allocation10 + $0xc8] sm:$0xff] }
 0x1a8   :  { %v720_v16 = vsel %vm717_vm4, %v719_v10, %v715_v14  ;;  %v740_v17 = vmul.f32 %v1960_v12, %v705_v13  ;;  %v2991_v9 = vld [vmem:[#allocation10 + $0xd0] sm:$0xff]  ;;  %v2994_v10 = vld [vmem:[#allocation10 + $0xd8] sm:$0xff]  ;;  %v2997_v11 = vld [vmem:[#allocation10 + $0xa0] sm:$0xff] }
 0x1a9   :  { %v739_v18 = vmul.f32 %v720_v16, %v2802_v34  ;;  %v725_v19 = vmul.f32 %v1958_v3, %v724_v15  ;;  %v2877_v34 = vld [vmem:[#allocation10 + $0x1e0] sm:$0xff]  ;;  %3520 = vst [vmem:[#allocation23_spill] sm:$0xff] %v2991_v9  ;;  %v3000_v12 = vld [vmem:[#allocation10 + $0xa8] sm:$0xff]  ;;  %v3003_v13 = vld [vmem:[#allocation10 + $0xb0] sm:$0xff] }
 0x1aa   :  { %3521 = vst [vmem:[#allocation22_spill] sm:$0xff] %v2994_v10  ;;  %v3006_v14 = vld [vmem:[#allocation10 + $0xb8] sm:$0xff]  ;;  %v3009_v15 = vld [vmem:[#allocation10 + $0x80] sm:$0xff]  ;;  %v3012_v16 = vld [vmem:[#allocation10 + $0x88] sm:$0xff] }
 0x1ab   :  { %v2874_v21 = vadd.f32 %v740_v17, %v739_v18  ;;  %v726_v22 = vadd.f32 %v1958_v3, %v725_v19  ;;  %3522 = vst [vmem:[#allocation24_spill] sm:$0xff] %v2997_v11  ;;  %v3015_v17 = vld [vmem:[#allocation10 + $0x90] sm:$0xff]  ;;  %v3018_v18 = vld [vmem:[#allocation10 + $0x98] sm:$0xff]  ;;  %v3021_v19 = vld [vmem:[#allocation10 + $0x60] sm:$0xff] }
 0x1ac   :  { %3523 = vst [vmem:[#allocation25_spill] sm:$0xff] %v3000_v12 }
 0x1ad   :  { %1961 = vtanh.f32 %v2874_v21  ;;  %v730_v25 = vsel %vm729_vm7, %v1958_v3, %v726_v22  ;;  %v2979_v3 = vld [vmem:[#allocation10 + $0xf0] sm:$0xff]  ;;  %3524 = vst [vmem:[#allocation27_spill] sm:$0xff] %v3003_v13  ;;  %v3024_v22 = vld [vmem:[#allocation10 + $0x68] sm:$0xff] }
 0x1ae   :  { %v735_v28 = vsel %vm732_vm8, %v734_v26, %v730_v25  ;;  %3525 = vst [vmem:[#allocation26_spill] sm:$0xff] %v3006_v14  ;;  %v3033_v25 = vld [vmem:[#allocation10 + $0x40] sm:$0xff]  ;;  %v3036_v26 = vld [vmem:[#allocation10 + $0x48] sm:$0xff] }
 0x1af   :  { %3526 = vst [vmem:[#allocation28_spill] sm:$0xff] %v3009_v15 }
 0x1b0   :  { %3527 = vst [vmem:[#allocation29_spill] sm:$0xff] %v3012_v16 }
 0x1b1   :  { %3528 = vst [vmem:[#allocation31_spill] sm:$0xff] %v3015_v17 }
 0x1b2   :  { %3529 = vst [vmem:[#allocation30_spill] sm:$0xff] %v3018_v18 }
 0x1b3   :  { %v1962_v27 = vpop.eup %1961  ;;  %3530 = vst [vmem:[#allocation32_spill] sm:$0xff] %v3021_v19 }
 0x1b4   :  { %v744_v29 = vmul.f32 %v1962_v27, %v735_v28  ;;  %3531 = vst [vmem:[#allocation33_spill] sm:$0xff] %v3024_v22  ;;  %v3039_v27 = vld [vmem:[#allocation10 + $0x50] sm:$0xff]  ;;  %v3042_v28 = vld [vmem:[#allocation10 + $0x58] sm:$0xff] }
 0x1b5   :  { %3534 = vst [vmem:[#allocation36_spill] sm:$0xff] %v3033_v25 }
 0x1b6   :  { %768 = vmatmul.f32.vlgmr.msrb.gmra.mxu0 %v744_v29  ;;  %788 = vmatmul.f32.vlgmr.msrb.gmra.mxu1 %v744_v29  ;;  %3535 = vst [vmem:[#allocation37_spill] sm:$0xff] %v3036_v26 }
 0x1b7   :  { %808 = vmatmul.f32.vlgmr.msrb.gmra.mxu2 %v744_v29  ;;  %828 = vmatmul.f32.vlgmr.msrb.gmra.mxu3 %v744_v29  ;;  %3536 = vst [vmem:[#allocation39_spill] sm:$0xff] %v3039_v27  ;;  %v3045_v29 = vld [vmem:[#allocation10 + $0x20] sm:$0xff] }
 0x1b8   :  { %1064 = vmatpush.msrb.mxu0 %v2877_v34  ;;  %1084 = vmatpush.msrb.mxu1 %v2880_v37  ;;  %3537 = vst [vmem:[#allocation38_spill] sm:$0xff] %v3042_v28 }
 0x1b9   :  { %1104 = vmatpush.msrb.mxu2 %v2883_v38  ;;  %1124 = vmatpush.msrb.mxu3 %v2886_v39  ;;  %3538 = vst [vmem:[#allocation40_spill] sm:$0xff] %v3045_v29 }
 0x1ba   :  { %1065 = vmatpush.msrb.mxu0 %v2889_v40  ;;  %1085 = vmatpush.msrb.mxu1 %v2892_v41 }
 0x1bb   :  { %1105 = vmatpush.msrb.mxu2 %v2895_v42  ;;  %1125 = vmatpush.msrb.mxu3 %v2898_v43 }
 0x1bc   :  { %1066 = vmatpush.msrb.mxu0 %v2901_v44  ;;  %1086 = vmatpush.msrb.mxu1 %v2904_v45 }
 0x1bd   :  { %1106 = vmatpush.msrb.mxu2 %v2907_v46  ;;  %1126 = vmatpush.msrb.mxu3 %v2910_v48 }
 0x1be   :  { %1067 = vmatpush.msrb.mxu0 %v2913_v49  ;;  %1087 = vmatpush.msrb.mxu1 %v2916_v50 }
 0x1bf   :  { %1107 = vmatpush.msrb.mxu2 %v2919_v51  ;;  %1127 = vmatpush.msrb.mxu3 %v2922_v55 }
 0x1c0   :  { %1068 = vmatpush.msrb.mxu0 %v2925_v8  ;;  %1088 = vmatpush.msrb.mxu1 %v2928_v54 }
 0x1c1   :  { %1108 = vmatpush.msrb.mxu2 %v2931_v4  ;;  %1128 = vmatpush.msrb.mxu3 %v2934_v20 }
 0x1c2   :  { %1069 = vmatpush.msrb.mxu0 %v2937_v5  ;;  %1089 = vmatpush.msrb.mxu1 %v2940_v47 }
 0x1c3   :  { %1109 = vmatpush.msrb.mxu2 %v2943_v58  ;;  %1129 = vmatpush.msrb.mxu3 %v2946_v7 }
 0x1c4   :  { %1070 = vmatpush.msrb.mxu0 %v2949_v57  ;;  %1090 = vmatpush.msrb.mxu1 %v2952_v52 }
 0x1c5   :  { %1110 = vmatpush.msrb.mxu2 %v2955_v53  ;;  %1130 = vmatpush.msrb.mxu3 %v2958_v60 }
 0x1c6   :  { %1071 = vmatpush.msrb.mxu0 %v2961_v59  ;;  %1091 = vmatpush.msrb.mxu1 %v2964_v0 }
 0x1c7   :  { %1111 = vmatpush.msrb.mxu2 %v2967_v61  ;;  %1131 = vmatpush.msrb.mxu3 %v2970_v56 }
 0x1c8   :  { %1072 = vmatpush.msrb.mxu0 %v2973_v62  ;;  %1092 = vmatpush.msrb.mxu1 %v2976_v1 }
 0x1c9   :  { %1112 = vmatpush.msrb.mxu2 %v2979_v3  ;;  %1132 = vmatpush.msrb.mxu3 %v2982_v6 }
 0x1ca   :  { %1073 = vmatpush.msrb.mxu0 %v2985_v2  ;;  %1093 = vmatpush.msrb.mxu1 %v2988_v63 }
 0x1cb   :  { %1113 = vmatpush.msrb.mxu2 %v2991_v9  ;;  %1133 = vmatpush.msrb.mxu3 %v2994_v10 }
 0x1cc   :  { %1074 = vmatpush.msrb.mxu0 %v2997_v11  ;;  %1094 = vmatpush.msrb.mxu1 %v3000_v12 }
 0x1cd   :  { %1114 = vmatpush.msrb.mxu2 %v3003_v13  ;;  %1134 = vmatpush.msrb.mxu3 %v3006_v14 }
 0x1ce   :  { %1075 = vmatpush.msrb.mxu0 %v3009_v15  ;;  %1095 = vmatpush.msrb.mxu1 %v3012_v16 }
 0x1cf   :  { %1115 = vmatpush.msrb.mxu2 %v3015_v17  ;;  %1135 = vmatpush.msrb.mxu3 %v3018_v18 }
 0x1d0   :  { %1076 = vmatpush.msrb.mxu0 %v3021_v19  ;;  %1096 = vmatpush.msrb.mxu1 %v3024_v22 }
 0x1d1   :  { %1116 = vmatpush.msrb.mxu2 %v3027_v23  ;;  %1136 = vmatpush.msrb.mxu3 %v3030_v24  ;;  %v3048_v24 = vld [vmem:[#allocation10 + $0x28] sm:$0xff] }
 0x1d2   :  { %1077 = vmatpush.msrb.mxu0 %v3033_v25  ;;  %1097 = vmatpush.msrb.mxu1 %v3036_v26  ;;  %3539 = vst [vmem:[#allocation41_spill] sm:$0xff] %v3048_v24  ;;  %v3540_v26 = vld [vmem:[#allocation52_spill] sm:$0xff]  ;;  %v3541_v25 = vld [vmem:[#allocation53_spill] sm:$0xff] }
 0x1d3   :  { %1117 = vmatpush.msrb.mxu2 %v3039_v27  ;;  %1137 = vmatpush.msrb.mxu3 %v3042_v28 }
 0x1d4   :  { %1078 = vmatpush.msrb.mxu0 %v3045_v29  ;;  %1098 = vmatpush.msrb.mxu1 %v3048_v24 }
 0x1d5   :  { %1118 = vmatpush.msrb.mxu2 %v3510_v30  ;;  %1138 = vmatpush.msrb.mxu3 %v3511_v31  ;;  %v3542_v31 = vld [vmem:[#allocation55_spill] sm:$0xff] }
 0x1d6   :  { %1079 = vmatpush.msrb.mxu0 %v3512_v32  ;;  %1099 = vmatpush.msrb.mxu1 %v3513_v33 }
 0x1d7   :  { %1119 = vmatpush.msrb.mxu2 %v3514_v35  ;;  %1139 = vmatpush.msrb.mxu3 %v3515_v36 }
 0x233   :  { %v769_v28 = vpop.f32.mrf.mxu0  ;;  %v789_v27 = vpop.f32.mrf.mxu1 }
 0x234   :  { %v832_v29 = vadd.f32 %v769_v28, %v3540_v26  ;;  %v833_v23 = vadd.f32 %v789_v27, %v3541_v25  ;;  %v3543_v25 = vld [vmem:[#allocation54_spill] sm:$0xff] }
 0x236   :  { %v1898_v22 = vmul.f32 -1.442695, %v832_v29  ;;  %v1899_v24 = vmul.f32 -1.442695, %v833_v23 }
 0x238   :  { %1963 = vpow2.f32 %v1898_v22 }
 0x239   :  { %1965 = vpow2.f32 %v1899_v24 }
 0x23a   :  { %v829_v30 = vpop.f32.mrf.mxu3  ;;  %v809_v36 = vpop.f32.mrf.mxu2 }
 0x23b   :  { %v835_v19 = vadd.f32 %v829_v30, %v3542_v31  ;;  %v834_v27 = vadd.f32 %v809_v36, %v3543_v25 }
 0x23d   :  { %v1900_v32 = vmul.f32 -1.442695, %v835_v19 }
 0x23e   :  { %v1964_v18 = vpop.eup %1963 }
 0x23f   :  { %v1966_v33 = vpop.eup %1965  ;;  %v845_v17 = vadd.f32 1.0, %v1964_v18  ;;  %1967 = vpow2.f32 %v1900_v32 }
 0x240   :  { %v846_v35 = vadd.f32 1.0, %v1966_v33 }
 0x241   :  { %1969 = vrcp.f32 %v845_v17  ;;  %v859_v19 = vand.u32 2147483648, %v845_v17  ;;  %v857_v32 = vand.u32 2147483647, %v845_v17  ;;  %vm853_vm11 = vweird.f32 %v845_v17 }
 0x242   :  { %1971 = vrcp.f32 %v846_v35  ;;  %v874_v31 = vand.u32 2147483648, %v846_v35  ;;  %v872_v15 = vand.u32 2147483647, %v846_v35  ;;  %vm868_vm12 = vweird.f32 %v846_v35 }
 0x243   :  { %v860_v36 = vor.u32 1.1754944e-38, %v859_v19  ;;  %vm858_vm15 = vcmp.eq.f32.partialorder %v857_v32, 8.507059e+37 }
 0x244   :  { %vm873_vm0 = vcmp.eq.f32.partialorder %v872_v15, 8.507059e+37 }
 0x245   :  { %v1968_v16 = vpop.eup %1967 }
 0x246   :  { %v847_v26 = vadd.f32 1.0, %v1968_v16 }
 0x247   :  { %v1970_v28 = vpop.eup %1969 }
 0x248   :  { %v1972_v23 = vpop.eup %1971  ;;  %v849_v22 = vmul.f32 %v1970_v28, %v845_v17  ;;  %1973 = vrcp.f32 %v847_v26  ;;  %vm854_vm9 = vweird.f32 %v1970_v28  ;;  %v889_v19 = vand.u32 2147483648, %v847_v26 }
 0x249   :  { %v864_v24 = vmul.f32 %v1972_v23, %v846_v35  ;;  %1975 = vtanh.f32 %v834_v27  ;;  %vm869_vm10 = vweird.f32 %v1972_v23  ;;  %vm855_vm13 = vmor %vm853_vm11, %vm854_vm9  ;;  %vm883_vm2 = vweird.f32 %v847_v26 }
 0x24a   :  { %v850_v29 = vsub.f32 1.0, %v849_v22  ;;  %vm870_vm14 = vmor %vm868_vm12, %vm869_vm10  ;;  %v875_v22 = vor.u32 1.1754944e-38, %v874_v31  ;;  %v890_v32 = vor.u32 1.1754944e-38, %v889_v19  ;;  %v3562_v19 = vld [vmem:[#allocation40_spill] sm:$0xff] }
 0x24b   :  { %v865_v30 = vsub.f32 1.0, %v864_v24 }
 0x24c   :  { %v851_v18 = vmul.f32 %v1970_v28, %v850_v29 }
 0x24d   :  { %v866_v33 = vmul.f32 %v1972_v23, %v865_v30 }
 0x24e   :  { %v1974_v14 = vpop.eup %1973  ;;  %v852_v16 = vadd.f32 %v1970_v28, %v851_v18 }
 0x24f   :  { %v867_v25 = vadd.f32 %v1972_v23, %v866_v33  ;;  %v879_v13 = vmul.f32 %v1974_v14, %v847_v26  ;;  %v1976_v27 = vpop.eup %1975  ;;  %vm884_vm1 = vweird.f32 %v1974_v14  ;;  %v3551_v33 = vld [vmem:[#allocation29_spill] sm:$0xff] }
 0x250   :  { %v856_v24 = vsel %vm855_vm13, %v1970_v28, %v852_v16  ;;  %v887_v28 = vand.u32 2147483647, %v847_v26  ;;  %vm885_vm3 = vmor %vm883_vm2, %vm884_vm1  ;;  %v3550_v26 = vld [vmem:[#allocation28_spill] sm:$0xff]  ;;  %v3552_v16 = vld [vmem:[#allocation31_spill] sm:$0xff] }
 0x251   :  { %v861_v12 = vsel %vm858_vm15, %v860_v36, %v856_v24  ;;  %v871_v29 = vsel %vm870_vm14, %v1972_v23, %v867_v25  ;;  %v880_v11 = vsub.f32 1.0, %v879_v13  ;;  %v3553_v36 = vld [vmem:[#allocation30_spill] sm:$0xff]  ;;  %v3554_v25 = vld [vmem:[#allocation32_spill] sm:$0xff]  ;;  %v3556_v24 = vld [vmem:[#allocation35_spill] sm:$0xff] }
 0x252   :  { %v876_v30 = vsel %vm873_vm0, %v875_v22, %v871_v29  ;;  %v896_v10 = vmul.f32 %v1976_v27, %v861_v12  ;;  %vm888_vm4 = vcmp.eq.f32.partialorder %v887_v28, 8.507059e+37  ;;  %v3548_v12 = vld [vmem:[#allocation27_spill] sm:$0xff]  ;;  %v3555_v22 = vld [vmem:[#allocation33_spill] sm:$0xff]  ;;  %v3557_v27 = vld [vmem:[#allocation34_spill] sm:$0xff] }
 0x253   :  { %v895_v9 = vmul.f32 %v876_v30, %v2874_v21  ;;  %v881_v18 = vmul.f32 %v1974_v14, %v880_v11  ;;  %v3544_v21 = vld [vmem:[#allocation23_spill] sm:$0xff]  ;;  %v3547_v11 = vld [vmem:[#allocation25_spill] sm:$0xff]  ;;  %v3558_v29 = vld [vmem:[#allocation36_spill] sm:$0xff] }
 0x254   :  { %v3559_v30 = vld [vmem:[#allocation37_spill] sm:$0xff] }
 0x255   :  { %v3062_v17 = vadd.f32 %v896_v10, %v895_v9  ;;  %v882_v35 = vadd.f32 %v1974_v14, %v881_v18  ;;  %v3545_v9 = vld [vmem:[#allocation22_spill] sm:$0xff]  ;;  %v3546_v10 = vld [vmem:[#allocation24_spill] sm:$0xff]  ;;  %v3560_v18 = vld [vmem:[#allocation39_spill] sm:$0xff] }
 0x256   :  { %v3563_v28 = vld [vmem:[#allocation41_spill] sm:$0xff] }
 0x257   :  { %1977 = vtanh.f32 %v3062_v17  ;;  %v886_v31 = vsel %vm885_vm3, %v1974_v14, %v882_v35  ;;  %v3549_v14 = vld [vmem:[#allocation26_spill] sm:$0xff] }
 0x258   :  { %v891_v13 = vsel %vm888_vm4, %v890_v32, %v886_v31  ;;  %v3561_v35 = vld [vmem:[#allocation38_spill] sm:$0xff]  ;;  %v3126_v32 = vld [vmem:[#allocation10 + $0x38] sm:$0xff] }
 0x259   :  { %v3123_v31 = vld [vmem:[#allocation10 + $0x30] sm:$0xff]  ;;  %3565 = vst [vmem:[#allocation43_spill] sm:$0xff] %v3126_v32 }
 0x25a   :  { %3564 = vst [vmem:[#allocation42_spill] sm:$0xff] %v3123_v31 }
 0x25d   :  { %v1978_v15 = vpop.eup %1977 }
 0x25e   :  { %v900_v23 = vmul.f32 %v1978_v15, %v891_v13  ;;  %v3129_v15 = vld [vmem:[#allocation10] sm:$0xff]  ;;  %v3132_v13 = vld [vmem:[#allocation10 + $0x8] sm:$0xff] }
 0x25f   :  { %3566 = vst [vmem:[#allocation44_spill] sm:$0xff] %v3129_v15 }
 0x260   :  { %924 = vmatmul.f32.vlgmr.msra.gmra.mxu0 %v900_v23  ;;  %944 = vmatmul.f32.vlgmr.msra.gmra.mxu1 %v900_v23  ;;  %3567 = vst [vmem:[#allocation45_spill] sm:$0xff] %v3132_v13 }
 0x261   :  { %964 = vmatmul.f32.vlgmr.msra.gmra.mxu2 %v900_v23  ;;  %984 = vmatmul.f32.vlgmr.msra.gmra.mxu3 %v900_v23  ;;  %v3135_v23 = vld [vmem:[#allocation10 + $0x10] sm:$0xff] }
 0x262   :  { %1220 = vmatpush.msra.mxu0 %v2877_v34  ;;  %1240 = vmatpush.msra.mxu1 %v2880_v37  ;;  %3568 = vst [vmem:[#allocation46_spill] sm:$0xff] %v3135_v23 }
 0x263   :  { %1260 = vmatpush.msra.mxu2 %v2883_v38  ;;  %1280 = vmatpush.msra.mxu3 %v2886_v39 }
 0x264   :  { %1221 = vmatpush.msra.mxu0 %v2889_v40  ;;  %1241 = vmatpush.msra.mxu1 %v2892_v41 }
 0x265   :  { %1261 = vmatpush.msra.mxu2 %v2895_v42  ;;  %1281 = vmatpush.msra.mxu3 %v2898_v43 }
 0x266   :  { %1222 = vmatpush.msra.mxu0 %v2901_v44  ;;  %1242 = vmatpush.msra.mxu1 %v2904_v45 }
 0x267   :  { %1262 = vmatpush.msra.mxu2 %v2907_v46  ;;  %1282 = vmatpush.msra.mxu3 %v2910_v48 }
 0x268   :  { %1223 = vmatpush.msra.mxu0 %v2913_v49  ;;  %1243 = vmatpush.msra.mxu1 %v2916_v50 }
 0x269   :  { %1263 = vmatpush.msra.mxu2 %v2919_v51  ;;  %1283 = vmatpush.msra.mxu3 %v2922_v55 }
 0x26a   :  { %1224 = vmatpush.msra.mxu0 %v2925_v8  ;;  %1244 = vmatpush.msra.mxu1 %v2928_v54 }
 0x26b   :  { %1264 = vmatpush.msra.mxu2 %v2931_v4  ;;  %1284 = vmatpush.msra.mxu3 %v2934_v20 }
 0x26c   :  { %1225 = vmatpush.msra.mxu0 %v2937_v5  ;;  %1245 = vmatpush.msra.mxu1 %v2940_v47 }
 0x26d   :  { %1265 = vmatpush.msra.mxu2 %v2943_v58  ;;  %1285 = vmatpush.msra.mxu3 %v2946_v7 }
 0x26e   :  { %1226 = vmatpush.msra.mxu0 %v2949_v57  ;;  %1246 = vmatpush.msra.mxu1 %v2952_v52 }
 0x26f   :  { %1266 = vmatpush.msra.mxu2 %v2955_v53  ;;  %1286 = vmatpush.msra.mxu3 %v2958_v60 }
 0x270   :  { %1227 = vmatpush.msra.mxu0 %v2961_v59  ;;  %1247 = vmatpush.msra.mxu1 %v2964_v0 }
 0x271   :  { %1267 = vmatpush.msra.mxu2 %v2967_v61  ;;  %1287 = vmatpush.msra.mxu3 %v2970_v56 }
 0x272   :  { %1228 = vmatpush.msra.mxu0 %v2973_v62  ;;  %1248 = vmatpush.msra.mxu1 %v2976_v1 }
 0x273   :  { %1268 = vmatpush.msra.mxu2 %v2979_v3  ;;  %1288 = vmatpush.msra.mxu3 %v2982_v6 }
 0x274   :  { %1229 = vmatpush.msra.mxu0 %v2985_v2  ;;  %1249 = vmatpush.msra.mxu1 %v2988_v63 }
 0x275   :  { %1269 = vmatpush.msra.mxu2 %v3544_v21  ;;  %1289 = vmatpush.msra.mxu3 %v3545_v9 }
 0x276   :  { %1230 = vmatpush.msra.mxu0 %v3546_v10  ;;  %1250 = vmatpush.msra.mxu1 %v3547_v11 }
 0x277   :  { %1270 = vmatpush.msra.mxu2 %v3548_v12  ;;  %1290 = vmatpush.msra.mxu3 %v3549_v14 }
 0x278   :  { %1231 = vmatpush.msra.mxu0 %v3550_v26  ;;  %1251 = vmatpush.msra.mxu1 %v3551_v33 }
 0x279   :  { %1271 = vmatpush.msra.mxu2 %v3552_v16  ;;  %1291 = vmatpush.msra.mxu3 %v3553_v36 }
 0x27a   :  { %1232 = vmatpush.msra.mxu0 %v3554_v25  ;;  %1252 = vmatpush.msra.mxu1 %v3555_v22 }
 0x27b   :  { %1272 = vmatpush.msra.mxu2 %v3556_v24  ;;  %1292 = vmatpush.msra.mxu3 %v3557_v27 }
 0x27c   :  { %1233 = vmatpush.msra.mxu0 %v3558_v29  ;;  %1253 = vmatpush.msra.mxu1 %v3559_v30 }
 0x27d   :  { %1273 = vmatpush.msra.mxu2 %v3560_v18  ;;  %1293 = vmatpush.msra.mxu3 %v3561_v35  ;;  %v3570_v35 = vld [vmem:[#allocation56_spill] sm:$0xff]  ;;  %v3571_v18 = vld [vmem:[#allocation57_spill] sm:$0xff] }
 0x27e   :  { %1234 = vmatpush.msra.mxu0 %v3562_v19  ;;  %1254 = vmatpush.msra.mxu1 %v3563_v28  ;;  %v3138_v28 = vld [vmem:[#allocation10 + $0x18] sm:$0xff] }
 0x27f   :  { %1274 = vmatpush.msra.mxu2 %v3123_v31  ;;  %1294 = vmatpush.msra.mxu3 %v3126_v32  ;;  %3569 = vst [vmem:[#allocation47_spill] sm:$0xff] %v3138_v28 }
 0x280   :  { %1235 = vmatpush.msra.mxu0 %v3129_v15  ;;  %1255 = vmatpush.msra.mxu1 %v3132_v13  ;;  %v3572_v13 = vld [vmem:[#allocation59_spill] sm:$0xff] }
 0x281   :  { %1275 = vmatpush.msra.mxu2 %v3135_v23  ;;  %1295 = vmatpush.msra.mxu3 %v3138_v28 }
 0x2dd   :  { %v925_v31 = vpop.f32.mrf.mxu0  ;;  %v945_v19 = vpop.f32.mrf.mxu1 }
 0x2de   :  { %v988_v32 = vadd.f32 %v925_v31, %v3570_v35  ;;  %v989_v30 = vadd.f32 %v945_v19, %v3571_v18  ;;  %v3573_v18 = vld [vmem:[#allocation58_spill] sm:$0xff] }
 0x2e0   :  { %v1901_v29 = vmul.f32 -1.442695, %v988_v32  ;;  %v1902_v15 = vmul.f32 -1.442695, %v989_v30 }
 0x2e2   :  { %1979 = vpow2.f32 %v1901_v29 }
 0x2e3   :  { %1981 = vpow2.f32 %v1902_v15 }
 0x2e4   :  { %v985_v27 = vpop.f32.mrf.mxu3  ;;  %v965_v28 = vpop.f32.mrf.mxu2 }
 0x2e5   :  { %v991_v24 = vadd.f32 %v985_v27, %v3572_v13  ;;  %v990_v19 = vadd.f32 %v965_v28, %v3573_v18 }
 0x2e7   :  { %v1903_v22 = vmul.f32 -1.442695, %v991_v24 }
 0x2e8   :  { %v1980_v25 = vpop.eup %1979 }
 0x2e9   :  { %v1982_v23 = vpop.eup %1981  ;;  %v1001_v36 = vadd.f32 1.0, %v1980_v25  ;;  %1983 = vpow2.f32 %v1903_v22 }
 0x2ea   :  { %v1002_v16 = vadd.f32 1.0, %v1982_v23 }
 0x2eb   :  { %1985 = vrcp.f32 %v1001_v36  ;;  %v1015_v24 = vand.u32 2147483648, %v1001_v36  ;;  %v1013_v22 = vand.u32 2147483647, %v1001_v36  ;;  %vm1009_vm7 = vweird.f32 %v1001_v36 }
 0x2ec   :  { %1987 = vrcp.f32 %v1002_v16  ;;  %v1030_v13 = vand.u32 2147483648, %v1002_v16  ;;  %v1028_v26 = vand.u32 2147483647, %v1002_v16  ;;  %vm1024_vm8 = vweird.f32 %v1002_v16 }
 0x2ed   :  { %v1016_v28 = vor.u32 1.1754944e-38, %v1015_v24  ;;  %vm1014_vm11 = vcmp.eq.f32.partialorder %v1013_v22, 8.507059e+37 }
 0x2ee   :  { %vm1029_vm12 = vcmp.eq.f32.partialorder %v1028_v26, 8.507059e+37 }
 0x2ef   :  { %v1984_v33 = vpop.eup %1983 }
 0x2f0   :  { %v1003_v35 = vadd.f32 1.0, %v1984_v33 }
 0x2f1   :  { %v1986_v31 = vpop.eup %1985 }
 0x2f2   :  { %v1988_v30 = vpop.eup %1987  ;;  %v1005_v29 = vmul.f32 %v1986_v31, %v1001_v36  ;;  %1989 = vrcp.f32 %v1003_v35  ;;  %vm1010_vm5 = vweird.f32 %v1986_v31  ;;  %v1045_v24 = vand.u32 2147483648, %v1003_v35 }
 0x2f3   :  { %v1020_v32 = vmul.f32 %v1988_v30, %v1002_v16  ;;  %1991 = vtanh.f32 %v990_v19  ;;  %vm1025_vm6 = vweird.f32 %v1988_v30  ;;  %vm1011_vm9 = vmor %vm1009_vm7, %vm1010_vm5  ;;  %vm1039_vm14 = vweird.f32 %v1003_v35 }
 0x2f4   :  { %v1006_v15 = vsub.f32 1.0, %v1005_v29  ;;  %vm1026_vm10 = vmor %vm1024_vm8, %vm1025_vm6  ;;  %v1031_v29 = vor.u32 1.1754944e-38, %v1030_v13  ;;  %v1046_v22 = vor.u32 1.1754944e-38, %v1045_v24  ;;  %v3592_v24 = vld [vmem:[#allocation40_spill] sm:$0xff] }
 0x2f5   :  { %v1021_v27 = vsub.f32 1.0, %v1020_v32 }
 0x2f6   :  { %v1007_v25 = vmul.f32 %v1986_v31, %v1006_v15 }
 0x2f7   :  { %v1022_v23 = vmul.f32 %v1988_v30, %v1021_v27 }
 0x2f8   :  { %v1990_v14 = vpop.eup %1989  ;;  %v1008_v33 = vadd.f32 %v1986_v31, %v1007_v25 }
 0x2f9   :  { %v1023_v18 = vadd.f32 %v1988_v30, %v1022_v23  ;;  %v1035_v12 = vmul.f32 %v1990_v14, %v1003_v35  ;;  %v1992_v19 = vpop.eup %1991  ;;  %vm1040_vm13 = vweird.f32 %v1990_v14  ;;  %v3581_v23 = vld [vmem:[#allocation29_spill] sm:$0xff] }
 0x2fa   :  { %v1012_v32 = vsel %vm1011_vm9, %v1986_v31, %v1008_v33  ;;  %v1043_v31 = vand.u32 2147483647, %v1003_v35  ;;  %vm1041_vm15 = vmor %vm1039_vm14, %vm1040_vm13  ;;  %v3580_v35 = vld [vmem:[#allocation28_spill] sm:$0xff]  ;;  %v3582_v33 = vld [vmem:[#allocation31_spill] sm:$0xff] }
 0x2fb   :  { %v1017_v11 = vsel %vm1014_vm11, %v1016_v28, %v1012_v32  ;;  %v1027_v15 = vsel %vm1026_vm10, %v1988_v30, %v1023_v18  ;;  %v1036_v10 = vsub.f32 1.0, %v1035_v12  ;;  %v3583_v28 = vld [vmem:[#allocation30_spill] sm:$0xff]  ;;  %v3584_v18 = vld [vmem:[#allocation32_spill] sm:$0xff]  ;;  %v3586_v32 = vld [vmem:[#allocation35_spill] sm:$0xff] }
 0x2fc   :  { %v1032_v27 = vsel %vm1029_vm12, %v1031_v29, %v1027_v15  ;;  %v1052_v9 = vmul.f32 %v1992_v19, %v1017_v11  ;;  %vm1044_vm0 = vcmp.eq.f32.partialorder %v1043_v31, 8.507059e+37  ;;  %v3578_v11 = vld [vmem:[#allocation27_spill] sm:$0xff]  ;;  %v3585_v29 = vld [vmem:[#allocation33_spill] sm:$0xff]  ;;  %v3587_v19 = vld [vmem:[#allocation34_spill] sm:$0xff] }
 0x2fd   :  { %v1051_v21 = vmul.f32 %v1032_v27, %v3062_v17  ;;  %v1037_v25 = vmul.f32 %v1990_v14, %v1036_v10  ;;  %v3574_v17 = vld [vmem:[#allocation23_spill] sm:$0xff]  ;;  %v3577_v10 = vld [vmem:[#allocation25_spill] sm:$0xff]  ;;  %v3588_v15 = vld [vmem:[#allocation36_spill] sm:$0xff] }
 0x2fe   :  { %v3589_v27 = vld [vmem:[#allocation37_spill] sm:$0xff] }
 0x2ff   :  { %v3146_v36 = vadd.f32 %v1052_v9, %v1051_v21  ;;  %v1038_v16 = vadd.f32 %v1990_v14, %v1037_v25  ;;  %v3575_v21 = vld [vmem:[#allocation22_spill] sm:$0xff]  ;;  %v3576_v9 = vld [vmem:[#allocation24_spill] sm:$0xff]  ;;  %v3590_v25 = vld [vmem:[#allocation39_spill] sm:$0xff] }
 0x300   :  { %v3593_v31 = vld [vmem:[#allocation41_spill] sm:$0xff] }
 0x301   :  { %1993 = vtanh.f32 %v3146_v36  ;;  %v1042_v13 = vsel %vm1041_vm15, %v1990_v14, %v1038_v16  ;;  %v3579_v14 = vld [vmem:[#allocation26_spill] sm:$0xff] }
 0x302   :  { %v1047_v12 = vsel %vm1044_vm0, %v1046_v22, %v1042_v13  ;;  %v3591_v16 = vld [vmem:[#allocation38_spill] sm:$0xff]  ;;  %v3595_v22 = vld [vmem:[#allocation43_spill] sm:$0xff] }
 0x303   :  { %v3594_v13 = vld [vmem:[#allocation42_spill] sm:$0xff] }
 0x307   :  { %v1994_v26 = vpop.eup %1993 }
 0x308   :  { %v1056_v30 = vmul.f32 %v1994_v26, %v1047_v12  ;;  %v3596_v26 = vld [vmem:[#allocation44_spill] sm:$0xff]  ;;  %v3597_v12 = vld [vmem:[#allocation45_spill] sm:$0xff] }
 0x30a   :  { %1080 = vmatmul.f32.vlgmr.msrb.gmra.mxu0 %v1056_v30  ;;  %1100 = vmatmul.f32.vlgmr.msrb.gmra.mxu1 %v1056_v30 }
 0x30b   :  { %1120 = vmatmul.f32.vlgmr.msrb.gmra.mxu2 %v1056_v30  ;;  %1140 = vmatmul.f32.vlgmr.msrb.gmra.mxu3 %v1056_v30  ;;  %v3598_v30 = vld [vmem:[#allocation46_spill] sm:$0xff] }
 0x30c   :  { %1376 = vmatpush.msrb.mxu0 %v2877_v34  ;;  %1396 = vmatpush.msrb.mxu1 %v2880_v37 }
 0x30d   :  { %1416 = vmatpush.msrb.mxu2 %v2883_v38  ;;  %1436 = vmatpush.msrb.mxu3 %v2886_v39 }
 0x30e   :  { %1377 = vmatpush.msrb.mxu0 %v2889_v40  ;;  %1397 = vmatpush.msrb.mxu1 %v2892_v41 }
 0x30f   :  { %1417 = vmatpush.msrb.mxu2 %v2895_v42  ;;  %1437 = vmatpush.msrb.mxu3 %v2898_v43 }
 0x310   :  { %1378 = vmatpush.msrb.mxu0 %v2901_v44  ;;  %1398 = vmatpush.msrb.mxu1 %v2904_v45 }
 0x311   :  { %1418 = vmatpush.msrb.mxu2 %v2907_v46  ;;  %1438 = vmatpush.msrb.mxu3 %v2910_v48 }
 0x312   :  { %1379 = vmatpush.msrb.mxu0 %v2913_v49  ;;  %1399 = vmatpush.msrb.mxu1 %v2916_v50 }
 0x313   :  { %1419 = vmatpush.msrb.mxu2 %v2919_v51  ;;  %1439 = vmatpush.msrb.mxu3 %v2922_v55 }
 0x314   :  { %1380 = vmatpush.msrb.mxu0 %v2925_v8  ;;  %1400 = vmatpush.msrb.mxu1 %v2928_v54 }
 0x315   :  { %1420 = vmatpush.msrb.mxu2 %v2931_v4  ;;  %1440 = vmatpush.msrb.mxu3 %v2934_v20 }
 0x316   :  { %1381 = vmatpush.msrb.mxu0 %v2937_v5  ;;  %1401 = vmatpush.msrb.mxu1 %v2940_v47 }
 0x317   :  { %1421 = vmatpush.msrb.mxu2 %v2943_v58  ;;  %1441 = vmatpush.msrb.mxu3 %v2946_v7 }
 0x318   :  { %1382 = vmatpush.msrb.mxu0 %v2949_v57  ;;  %1402 = vmatpush.msrb.mxu1 %v2952_v52 }
 0x319   :  { %1422 = vmatpush.msrb.mxu2 %v2955_v53  ;;  %1442 = vmatpush.msrb.mxu3 %v2958_v60 }
 0x31a   :  { %1383 = vmatpush.msrb.mxu0 %v2961_v59  ;;  %1403 = vmatpush.msrb.mxu1 %v2964_v0 }
 0x31b   :  { %1423 = vmatpush.msrb.mxu2 %v2967_v61  ;;  %1443 = vmatpush.msrb.mxu3 %v2970_v56 }
 0x31c   :  { %1384 = vmatpush.msrb.mxu0 %v2973_v62  ;;  %1404 = vmatpush.msrb.mxu1 %v2976_v1 }
 0x31d   :  { %1424 = vmatpush.msrb.mxu2 %v2979_v3  ;;  %1444 = vmatpush.msrb.mxu3 %v2982_v6 }
 0x31e   :  { %1385 = vmatpush.msrb.mxu0 %v2985_v2  ;;  %1405 = vmatpush.msrb.mxu1 %v2988_v63 }
 0x31f   :  { %1425 = vmatpush.msrb.mxu2 %v3574_v17  ;;  %1445 = vmatpush.msrb.mxu3 %v3575_v21 }
 0x320   :  { %1386 = vmatpush.msrb.mxu0 %v3576_v9  ;;  %1406 = vmatpush.msrb.mxu1 %v3577_v10 }
 0x321   :  { %1426 = vmatpush.msrb.mxu2 %v3578_v11  ;;  %1446 = vmatpush.msrb.mxu3 %v3579_v14 }
 0x322   :  { %1387 = vmatpush.msrb.mxu0 %v3580_v35  ;;  %1407 = vmatpush.msrb.mxu1 %v3581_v23 }
 0x323   :  { %1427 = vmatpush.msrb.mxu2 %v3582_v33  ;;  %1447 = vmatpush.msrb.mxu3 %v3583_v28 }
 0x324   :  { %1388 = vmatpush.msrb.mxu0 %v3584_v18  ;;  %1408 = vmatpush.msrb.mxu1 %v3585_v29 }
 0x325   :  { %1428 = vmatpush.msrb.mxu2 %v3586_v32  ;;  %1448 = vmatpush.msrb.mxu3 %v3587_v19  ;;  %v3600_v19 = vld [vmem:[#allocation60_spill] sm:$0xff]  ;;  %v3601_v32 = vld [vmem:[#allocation61_spill] sm:$0xff] }
 0x326   :  { %1389 = vmatpush.msrb.mxu0 %v3588_v15  ;;  %1409 = vmatpush.msrb.mxu1 %v3589_v27  ;;  %v3599_v15 = vld [vmem:[#allocation47_spill] sm:$0xff] }
 0x327   :  { %1429 = vmatpush.msrb.mxu2 %v3590_v25  ;;  %1449 = vmatpush.msrb.mxu3 %v3591_v16 }
 0x328   :  { %1390 = vmatpush.msrb.mxu0 %v3592_v24  ;;  %1410 = vmatpush.msrb.mxu1 %v3593_v31 }
 0x329   :  { %1430 = vmatpush.msrb.mxu2 %v3594_v13  ;;  %1450 = vmatpush.msrb.mxu3 %v3595_v22  ;;  %v3602_v22 = vld [vmem:[#allocation63_spill] sm:$0xff] }
 0x32a   :  { %1391 = vmatpush.msrb.mxu0 %v3596_v26  ;;  %1411 = vmatpush.msrb.mxu1 %v3597_v12 }
 0x32b   :  { %1431 = vmatpush.msrb.mxu2 %v3598_v30  ;;  %1451 = vmatpush.msrb.mxu3 %v3599_v15 }
 0x387   :  { %v1081_v27 = vpop.f32.mrf.mxu0  ;;  %v1101_v25 = vpop.f32.mrf.mxu1 }
 0x388   :  { %v1144_v16 = vadd.f32 %v1081_v27, %v3600_v19  ;;  %v1145_v24 = vadd.f32 %v1101_v25, %v3601_v32  ;;  %v3603_v32 = vld [vmem:[#allocation62_spill] sm:$0xff] }
 0x38a   :  { %v1904_v29 = vmul.f32 -1.442695, %v1144_v16  ;;  %v1905_v31 = vmul.f32 -1.442695, %v1145_v24 }
 0x38c   :  { %1995 = vpow2.f32 %v1904_v29 }
 0x38d   :  { %1997 = vpow2.f32 %v1905_v31 }
 0x38e   :  { %v1141_v13 = vpop.f32.mrf.mxu3  ;;  %v1121_v15 = vpop.f32.mrf.mxu2 }
 0x38f   :  { %v1147_v18 = vadd.f32 %v1141_v13, %v3602_v22  ;;  %v1146_v25 = vadd.f32 %v1121_v15, %v3603_v32 }
 0x391   :  { %v1906_v26 = vmul.f32 -1.442695, %v1147_v18 }
 0x392   :  { %v1996_v28 = vpop.eup %1995 }
 0x393   :  { %v1998_v12 = vpop.eup %1997  ;;  %v1157_v33 = vadd.f32 1.0, %v1996_v28  ;;  %1999 = vpow2.f32 %v1906_v26 }
 0x394   :  { %v1158_v30 = vadd.f32 1.0, %v1998_v12 }
 0x395   :  { %2001 = vrcp.f32 %v1157_v33  ;;  %v1171_v18 = vand.u32 2147483648, %v1157_v33  ;;  %v1169_v26 = vand.u32 2147483647, %v1157_v33  ;;  %vm1165_vm3 = vweird.f32 %v1157_v33 }
 0x396   :  { %2003 = vrcp.f32 %v1158_v30  ;;  %v1186_v22 = vand.u32 2147483648, %v1158_v30  ;;  %v1184_v35 = vand.u32 2147483647, %v1158_v30  ;;  %vm1180_vm4 = vweird.f32 %v1158_v30 }
 0x397   :  { %v1172_v15 = vor.u32 1.1754944e-38, %v1171_v18  ;;  %vm1170_vm7 = vcmp.eq.f32.partialorder %v1169_v26, 8.507059e+37 }
 0x398   :  { %vm1185_vm8 = vcmp.eq.f32.partialorder %v1184_v35, 8.507059e+37 }
 0x399   :  { %v2000_v23 = vpop.eup %1999 }
 0x39a   :  { %v1159_v19 = vadd.f32 1.0, %v2000_v23 }
 0x39b   :  { %v2002_v27 = vpop.eup %2001 }
 0x39c   :  { %v2004_v16 = vpop.eup %2003  ;;  %v1161_v29 = vmul.f32 %v2002_v27, %v1157_v33  ;;  %2005 = vrcp.f32 %v1159_v19  ;;  %vm1166_vm1 = vweird.f32 %v2002_v27  ;;  %v1201_v18 = vand.u32 2147483648, %v1159_v19 }
 0x39d   :  { %v1176_v24 = vmul.f32 %v2004_v16, %v1158_v30  ;;  %2007 = vtanh.f32 %v1146_v25  ;;  %vm1181_vm2 = vweird.f32 %v2004_v16  ;;  %vm1167_vm5 = vmor %vm1165_vm3, %vm1166_vm1  ;;  %vm1195_vm10 = vweird.f32 %v1159_v19 }
 0x39e   :  { %v1162_v31 = vsub.f32 1.0, %v1161_v29  ;;  %vm1182_vm6 = vmor %vm1180_vm4, %vm1181_vm2  ;;  %v1187_v29 = vor.u32 1.1754944e-38, %v1186_v22  ;;  %v1202_v26 = vor.u32 1.1754944e-38, %v1201_v18 }
 0x39f   :  { %v1177_v13 = vsub.f32 1.0, %v1176_v24 }
 0x3a0   :  { %v1163_v28 = vmul.f32 %v2002_v27, %v1162_v31 }
 0x3a1   :  { %v1178_v12 = vmul.f32 %v2004_v16, %v1177_v13 }
 0x3a2   :  { %v2006_v14 = vpop.eup %2005  ;;  %v1164_v23 = vadd.f32 %v2002_v27, %v1163_v28 }
 0x3a3   :  { %v1179_v32 = vadd.f32 %v2004_v16, %v1178_v12  ;;  %v1191_v11 = vmul.f32 %v2006_v14, %v1159_v19  ;;  %v2008_v25 = vpop.eup %2007  ;;  %vm1196_vm9 = vweird.f32 %v2006_v14 }
 0x3a4   :  { %v1168_v24 = vsel %vm1167_vm5, %v2002_v27, %v1164_v23  ;;  %v1199_v27 = vand.u32 2147483647, %v1159_v19  ;;  %vm1197_vm11 = vmor %vm1195_vm10, %vm1196_vm9  ;;  %v3633_v23 = vld [vmem:[#allocation66_spill] sm:$0xff] }
 0x3a5   :  { %v1173_v10 = vsel %vm1170_vm7, %v1172_v15, %v1168_v24  ;;  %v1183_v31 = vsel %vm1182_vm6, %v2004_v16, %v1179_v32  ;;  %v1192_v9 = vsub.f32 1.0, %v1191_v11 }
 0x3a6   :  { %v1188_v13 = vsel %vm1185_vm8, %v1187_v29, %v1183_v31  ;;  %v1208_v21 = vmul.f32 %v2008_v25, %v1173_v10  ;;  %vm1200_vm12 = vcmp.eq.f32.partialorder %v1199_v27, 8.507059e+37 }
 0x3a7   :  { %v1207_v17 = vmul.f32 %v1188_v13, %v3146_v36  ;;  %v1193_v28 = vmul.f32 %v2006_v14, %v1192_v9 }
 0x3a9   :  { %v3218_v33 = vadd.f32 %v1208_v21, %v1207_v17  ;;  %v1194_v30 = vadd.f32 %v2006_v14, %v1193_v28 }
 0x3ab   :  { %2009 = vtanh.f32 %v3218_v33  ;;  %v1198_v22 = vsel %vm1197_vm11, %v2006_v14, %v1194_v30 }
 0x3ac   :  { %v1203_v11 = vsel %vm1200_vm12, %v1202_v26, %v1198_v22 }
 0x3b1   :  { %v2010_v35 = vpop.eup %2009 }
 0x3b2   :  { %v1212_v16 = vmul.f32 %v2010_v35, %v1203_v11 }
 0x3b4   :  { %1236 = vmatmul.f32.vlgmr.msra.gmra.mxu0 %v1212_v16  ;;  %1256 = vmatmul.f32.vlgmr.msra.gmra.mxu1 %v1212_v16 }
 0x3b5   :  { %1276 = vmatmul.f32.vlgmr.msra.gmra.mxu2 %v1212_v16  ;;  %1296 = vmatmul.f32.vlgmr.msra.gmra.mxu3 %v1212_v16 }
 0x3b6   :  { %1532 = vmatpush.msra.mxu0 %v2877_v34  ;;  %1552 = vmatpush.msra.mxu1 %v2880_v37  ;;  %v3604_v34 = vld [vmem:[#allocation23_spill] sm:$0xff]  ;;  %v3605_v37 = vld [vmem:[#allocation22_spill] sm:$0xff] }
 0x3b7   :  { %1572 = vmatpush.msra.mxu2 %v2883_v38  ;;  %1592 = vmatpush.msra.mxu3 %v2886_v39  ;;  %v3606_v38 = vld [vmem:[#allocation24_spill] sm:$0xff]  ;;  %v3607_v39 = vld [vmem:[#allocation25_spill] sm:$0xff] }
 0x3b8   :  { %1533 = vmatpush.msra.mxu0 %v2889_v40  ;;  %1553 = vmatpush.msra.mxu1 %v2892_v41  ;;  %v3608_v40 = vld [vmem:[#allocation27_spill] sm:$0xff]  ;;  %v3609_v41 = vld [vmem:[#allocation26_spill] sm:$0xff] }
 0x3b9   :  { %1573 = vmatpush.msra.mxu2 %v2895_v42  ;;  %1593 = vmatpush.msra.mxu3 %v2898_v43  ;;  %v3610_v42 = vld [vmem:[#allocation28_spill] sm:$0xff]  ;;  %v3611_v43 = vld [vmem:[#allocation29_spill] sm:$0xff] }
 0x3ba   :  { %1534 = vmatpush.msra.mxu0 %v2901_v44  ;;  %1554 = vmatpush.msra.mxu1 %v2904_v45  ;;  %v3612_v44 = vld [vmem:[#allocation31_spill] sm:$0xff]  ;;  %v3613_v45 = vld [vmem:[#allocation30_spill] sm:$0xff] }
 0x3bb   :  { %1574 = vmatpush.msra.mxu2 %v2907_v46  ;;  %1594 = vmatpush.msra.mxu3 %v2910_v48  ;;  %v3614_v46 = vld [vmem:[#allocation32_spill] sm:$0xff]  ;;  %v3615_v48 = vld [vmem:[#allocation33_spill] sm:$0xff] }
 0x3bc   :  { %1535 = vmatpush.msra.mxu0 %v2913_v49  ;;  %1555 = vmatpush.msra.mxu1 %v2916_v50  ;;  %v3616_v49 = vld [vmem:[#allocation35_spill] sm:$0xff]  ;;  %v3617_v50 = vld [vmem:[#allocation34_spill] sm:$0xff] }
 0x3bd   :  { %1575 = vmatpush.msra.mxu2 %v2919_v51  ;;  %1595 = vmatpush.msra.mxu3 %v2922_v55  ;;  %v3618_v51 = vld [vmem:[#allocation36_spill] sm:$0xff]  ;;  %v3619_v55 = vld [vmem:[#allocation37_spill] sm:$0xff] }
 0x3be   :  { %1536 = vmatpush.msra.mxu0 %v2925_v8  ;;  %1556 = vmatpush.msra.mxu1 %v2928_v54  ;;  %v3620_v8 = vld [vmem:[#allocation39_spill] sm:$0xff]  ;;  %v3621_v54 = vld [vmem:[#allocation38_spill] sm:$0xff] }
 0x3bf   :  { %1576 = vmatpush.msra.mxu2 %v2931_v4  ;;  %1596 = vmatpush.msra.mxu3 %v2934_v20  ;;  %v3622_v4 = vld [vmem:[#allocation40_spill] sm:$0xff]  ;;  %v3623_v20 = vld [vmem:[#allocation41_spill] sm:$0xff] }
 0x3c0   :  { %1537 = vmatpush.msra.mxu0 %v2937_v5  ;;  %1557 = vmatpush.msra.mxu1 %v2940_v47  ;;  %v3624_v5 = vld [vmem:[#allocation42_spill] sm:$0xff]  ;;  %v3625_v47 = vld [vmem:[#allocation43_spill] sm:$0xff] }
 0x3c1   :  { %1577 = vmatpush.msra.mxu2 %v2943_v58  ;;  %1597 = vmatpush.msra.mxu3 %v2946_v7  ;;  %v3626_v58 = vld [vmem:[#allocation44_spill] sm:$0xff]  ;;  %v3627_v7 = vld [vmem:[#allocation45_spill] sm:$0xff] }
 0x3c2   :  { %1538 = vmatpush.msra.mxu0 %v2949_v57  ;;  %1558 = vmatpush.msra.mxu1 %v2952_v52  ;;  %v3628_v57 = vld [vmem:[#allocation46_spill] sm:$0xff]  ;;  %v3629_v52 = vld [vmem:[#allocation47_spill] sm:$0xff] }
 0x3c3   :  { %1578 = vmatpush.msra.mxu2 %v2955_v53  ;;  %1598 = vmatpush.msra.mxu3 %v2958_v60 }
 0x3c4   :  { %1539 = vmatpush.msra.mxu0 %v2961_v59  ;;  %1559 = vmatpush.msra.mxu1 %v2964_v0  ;;  %v3630_v59 = vld [vmem:[#allocation64_spill] sm:$0xff] }
 0x3c5   :  { %1579 = vmatpush.msra.mxu2 %v2967_v61  ;;  %1599 = vmatpush.msra.mxu3 %v2970_v56  ;;  %v3631_v61 = vld [vmem:[#allocation65_spill] sm:$0xff] }
 0x3c6   :  { %1540 = vmatpush.msra.mxu0 %v2973_v62  ;;  %1560 = vmatpush.msra.mxu1 %v2976_v1 }
 0x3c7   :  { %1580 = vmatpush.msra.mxu2 %v2979_v3  ;;  %1600 = vmatpush.msra.mxu3 %v2982_v6  ;;  %v3632_v6 = vld [vmem:[#allocation67_spill] sm:$0xff] }
 0x3c8   :  { %1541 = vmatpush.msra.mxu0 %v2985_v2  ;;  %1561 = vmatpush.msra.mxu1 %v2988_v63 }
 0x3c9   :  { %1581 = vmatpush.msra.mxu2 %v3604_v34  ;;  %1601 = vmatpush.msra.mxu3 %v3605_v37 }
 0x3ca   :  { %1542 = vmatpush.msra.mxu0 %v3606_v38  ;;  %1562 = vmatpush.msra.mxu1 %v3607_v39 }
 0x3cb   :  { %1582 = vmatpush.msra.mxu2 %v3608_v40  ;;  %1602 = vmatpush.msra.mxu3 %v3609_v41 }
 0x3cc   :  { %1543 = vmatpush.msra.mxu0 %v3610_v42  ;;  %1563 = vmatpush.msra.mxu1 %v3611_v43 }
 0x3cd   :  { %1583 = vmatpush.msra.mxu2 %v3612_v44  ;;  %1603 = vmatpush.msra.mxu3 %v3613_v45 }
 0x3ce   :  { %1544 = vmatpush.msra.mxu0 %v3614_v46  ;;  %1564 = vmatpush.msra.mxu1 %v3615_v48 }
 0x3cf   :  { %1584 = vmatpush.msra.mxu2 %v3616_v49  ;;  %1604 = vmatpush.msra.mxu3 %v3617_v50 }
 0x3d0   :  { %1545 = vmatpush.msra.mxu0 %v3618_v51  ;;  %1565 = vmatpush.msra.mxu1 %v3619_v55 }
 0x3d1   :  { %1585 = vmatpush.msra.mxu2 %v3620_v8  ;;  %1605 = vmatpush.msra.mxu3 %v3621_v54 }
 0x3d2   :  { %1546 = vmatpush.msra.mxu0 %v3622_v4  ;;  %1566 = vmatpush.msra.mxu1 %v3623_v20 }
 0x3d3   :  { %1586 = vmatpush.msra.mxu2 %v3624_v5  ;;  %1606 = vmatpush.msra.mxu3 %v3625_v47  ;;  %v3634_v47 = vld [vmem:[#allocation68_spill] sm:$0xff] }
 0x3d4   :  { %1547 = vmatpush.msra.mxu0 %v3626_v58  ;;  %1567 = vmatpush.msra.mxu1 %v3627_v7  ;;  %v3635_v7 = vld [vmem:[#allocation69_spill] sm:$0xff] }
 0x3d5   :  { %1587 = vmatpush.msra.mxu2 %v3628_v57  ;;  %1607 = vmatpush.msra.mxu3 %v3629_v52 }
 0x431   :  { %v1237_v53 = vpop.f32.mrf.mxu0  ;;  %v1257_v60 = vpop.f32.mrf.mxu1 }
 0x432   :  { %v1300_v0 = vadd.f32 %v1237_v53, %v3630_v59  ;;  %v1301_v56 = vadd.f32 %v1257_v60, %v3631_v61  ;;  %v3636_v59 = vld [vmem:[#allocation71_spill] sm:$0xff] }
 0x434   :  { %v1907_v62 = vmul.f32 -1.442695, %v1300_v0  ;;  %v1908_v1 = vmul.f32 -1.442695, %v1301_v56 }
 0x436   :  { %2011 = vpow2.f32 %v1907_v62 }
 0x437   :  { %2013 = vpow2.f32 %v1908_v1 }
 0x438   :  { %v1297_v3 = vpop.f32.mrf.mxu3  ;;  %v1277_v10 = vpop.f32.mrf.mxu2 }
 0x439   :  { %v1303_v2 = vadd.f32 %v1297_v3, %v3632_v6  ;;  %v1302_v15 = vadd.f32 %v1277_v10, %v3633_v23 }
 0x43b   :  { %v1909_v63 = vmul.f32 -1.442695, %v1303_v2 }
 0x43c   :  { %v2012_v36 = vpop.eup %2011 }
 0x43d   :  { %v2014_v17 = vpop.eup %2013  ;;  %v1313_v21 = vadd.f32 1.0, %v2012_v36  ;;  %2015 = vpow2.f32 %v1909_v63 }
 0x43e   :  { %v1314_v9 = vadd.f32 1.0, %v2014_v17  ;;  %v3637_v17 = vld [vmem:[#allocation70_spill] sm:$0xff] }
 0x43f   :  { %2017 = vrcp.f32 %v1313_v21  ;;  %v1327_v13 = vand.u32 2147483648, %v1313_v21  ;;  %v1325_v18 = vand.u32 2147483647, %v1313_v21  ;;  %vm1321_vm15 = vweird.f32 %v1313_v21 }
 0x440   :  { %2019 = vrcp.f32 %v1314_v9  ;;  %v1342_v28 = vand.u32 2147483648, %v1314_v9  ;;  %v1340_v22 = vand.u32 2147483647, %v1314_v9  ;;  %vm1336_vm0 = vweird.f32 %v1314_v9 }
 0x441   :  { %v1328_v11 = vor.u32 1.1754944e-38, %v1327_v13  ;;  %vm1326_vm3 = vcmp.eq.f32.partialorder %v1325_v18, 8.507059e+37 }
 0x442   :  { %v1343_v37 = vor.u32 1.1754944e-38, %v1342_v28  ;;  %vm1341_vm4 = vcmp.eq.f32.partialorder %v1340_v22, 8.507059e+37 }
 0x443   :  { %v2016_v14 = vpop.eup %2015 }
 0x444   :  { %v1315_v19 = vadd.f32 1.0, %v2016_v14 }
 0x445   :  { %v2018_v12 = vpop.eup %2017 }
 0x446   :  { %v2020_v32 = vpop.eup %2019  ;;  %v1317_v29 = vmul.f32 %v2018_v12, %v1313_v21  ;;  %2021 = vrcp.f32 %v1315_v19  ;;  %vm1322_vm13 = vweird.f32 %v2018_v12  ;;  %v1357_v50 = vand.u32 2147483648, %v1315_v19 }
 0x447   :  { %v1332_v24 = vmul.f32 %v2020_v32, %v1314_v9  ;;  %2023 = vtanh.f32 %v1302_v15  ;;  %vm1337_vm14 = vweird.f32 %v2020_v32  ;;  %vm1323_vm1 = vmor %vm1321_vm15, %vm1322_vm13  ;;  %vm1351_vm6 = vweird.f32 %v1315_v19 }
 0x448   :  { %v1318_v25 = vsub.f32 1.0, %v1317_v29  ;;  %vm1338_vm2 = vmor %vm1336_vm0, %vm1337_vm14  ;;  %v1355_v51 = vand.u32 2147483647, %v1315_v19  ;;  %v1358_v8 = vor.u32 1.1754944e-38, %v1357_v50 }
 0x449   :  { %v1333_v31 = vsub.f32 1.0, %v1332_v24 }
 0x44a   :  { %v1319_v30 = vmul.f32 %v2018_v12, %v1318_v25  ;;  %vm1356_vm8 = vcmp.eq.f32.partialorder %v1355_v51, 8.507059e+37  ;;  %v1714_v51 = vld [vmem:[#allocation13 + $0xf8] sm:$0xff] }
 0x44b   :  { %v1334_v27 = vmul.f32 %v2020_v32, %v1333_v31 }
 0x44c   :  { %v2022_v26 = vpop.eup %2021  ;;  %v1320_v35 = vadd.f32 %v2018_v12, %v1319_v30 }
 0x44d   :  { %v1335_v16 = vadd.f32 %v2020_v32, %v1334_v27  ;;  %v1347_v34 = vmul.f32 %v2022_v26, %v1315_v19  ;;  %v2024_v39 = vpop.eup %2023  ;;  %vm1352_vm5 = vweird.f32 %v2022_v26 }
 0x44e   :  { %v1324_v38 = vsel %vm1323_vm1, %v2018_v12, %v1320_v35  ;;  %vm1353_vm7 = vmor %vm1351_vm6, %vm1352_vm5 }
 0x44f   :  { %v1329_v40 = vsel %vm1326_vm3, %v1328_v11, %v1324_v38  ;;  %v1339_v41 = vsel %vm1338_vm2, %v2020_v32, %v1335_v16  ;;  %v1348_v42 = vsub.f32 1.0, %v1347_v34 }
 0x450   :  { %v1344_v43 = vsel %vm1341_vm4, %v1343_v37, %v1339_v41  ;;  %v1364_v44 = vmul.f32 %v2024_v39, %v1329_v40 }
 0x451   :  { %v1363_v45 = vmul.f32 %v1344_v43, %v3218_v33  ;;  %v1349_v46 = vmul.f32 %v2022_v26, %v1348_v42 }
 0x453   :  { %v3290_v48 = vadd.f32 %v1364_v44, %v1363_v45  ;;  %v1350_v49 = vadd.f32 %v2022_v26, %v1349_v46 }
 0x455   :  { %2025 = vtanh.f32 %v3290_v48  ;;  %v1354_v55 = vsel %vm1353_vm7, %v2022_v26, %v1350_v49 }
 0x456   :  { %v1359_v4 = vsel %vm1356_vm8, %v1358_v8, %v1354_v55  ;;  %v1711_v55 = vld [vmem:[#allocation13 + $0xe0] sm:$0xff]  ;;  %v1712_v8 = vld [vmem:[#allocation13 + $0xe8] sm:$0xff] }
 0x45b   :  { %v2026_v54 = vpop.eup %2025 }
 0x45c   :  { %v1368_v20 = vmul.f32 %v2026_v54, %v1359_v4  ;;  %v1709_v54 = vld [vmem:[#allocation13 + $0xd0] sm:$0xff]  ;;  %v1710_v4 = vld [vmem:[#allocation13 + $0xd8] sm:$0xff] }
 0x45e   :  { %1392 = vmatmul.f32.vlgmr.msrb.gmra.mxu0 %v1368_v20  ;;  %1412 = vmatmul.f32.vlgmr.msrb.gmra.mxu1 %v1368_v20 }
 0x45f   :  { %1432 = vmatmul.f32.vlgmr.msrb.gmra.mxu2 %v1368_v20  ;;  %1452 = vmatmul.f32.vlgmr.msrb.gmra.mxu3 %v1368_v20  ;;  %v1707_v20 = vld [vmem:[#allocation13 + $0xc0] sm:$0xff] }
 0x460   :  { %1741 = vmatpush.msrb.mxu1 %v1714_v51 }
 0x462   :  { %1742 = vmatpush.msrb.mxu1 %v1712_v8  ;;  %v1773_v8 = vld [vmem:[#allocation14 + $0x50] sm:$0xff] }
 0x464   :  { %1743 = vmatpush.msrb.mxu1 %v1710_v4 }
 0x4db   :  { %v1393_v33 = vpop.f32.mrf.mxu0  ;;  %v1413_v5 = vpop.f32.mrf.mxu1 }
 0x4dc   :  { %v1456_v58 = vadd.f32 %v1393_v33, %v3634_v47  ;;  %v1457_v57 = vadd.f32 %v1413_v5, %v3635_v7  ;;  %v1708_v33 = vld [vmem:[#allocation13 + $0xc8] sm:$0xff]  ;;  %v1705_v5 = vld [vmem:[#allocation13 + $0xb0] sm:$0xff]  ;;  %v1706_v47 = vld [vmem:[#allocation13 + $0xb8] sm:$0xff] }
 0x4dd   :  { %1744 = vmatpush.msrb.mxu1 %v1708_v33  ;;  %v1704_v7 = vld [vmem:[#allocation13 + $0xa8] sm:$0xff] }
 0x4de   :  { %v1910_v52 = vmul.f32 -1.442695, %v1456_v58  ;;  %v1911_v53 = vmul.f32 -1.442695, %v1457_v57  ;;  %v1703_v58 = vld [vmem:[#allocation13 + $0xa0] sm:$0xff]  ;;  %v1701_v57 = vld [vmem:[#allocation13 + $0x90] sm:$0xff] }
 0x4df   :  { %1745 = vmatpush.msrb.mxu1 %v1706_v47  ;;  %v1772_v33 = vld [vmem:[#allocation14 + $0x48] sm:$0xff] }
 0x4e0   :  { %2027 = vpow2.f32 %v1910_v52  ;;  %v1702_v52 = vld [vmem:[#allocation13 + $0x98] sm:$0xff] }
 0x4e1   :  { %2029 = vpow2.f32 %v1911_v53  ;;  %1746 = vmatpush.msrb.mxu1 %v1704_v7  ;;  %v1699_v53 = vld [vmem:[#allocation13 + $0x80] sm:$0xff] }
 0x4e2   :  { %v1453_v60 = vpop.f32.mrf.mxu3  ;;  %v1433_v6 = vpop.f32.mrf.mxu2 }
 0x4e3   :  { %v1459_v0 = vadd.f32 %v1453_v60, %v3636_v59  ;;  %v1458_v21 = vadd.f32 %v1433_v6, %v3637_v17  ;;  %1747 = vmatpush.msrb.mxu1 %v1702_v52  ;;  %v1700_v60 = vld [vmem:[#allocation13 + $0x88] sm:$0xff]  ;;  %v1697_v59 = vld [vmem:[#allocation13 + $0x70] sm:$0xff]  ;;  %v1694_v17 = vld [vmem:[#allocation13 + $0x58] sm:$0xff] }
 0x4e5   :  { %v1912_v61 = vmul.f32 -1.442695, %v1459_v0  ;;  %1748 = vmatpush.msrb.mxu1 %v1700_v60  ;;  %v1698_v0 = vld [vmem:[#allocation13 + $0x78] sm:$0xff]  ;;  %v1787_v60 = vld [vmem:[#allocation14 + $0xc0] sm:$0xff] }
 0x4e6   :  { %v2028_v56 = vpop.eup %2027 }
 0x4e7   :  { %v2030_v62 = vpop.eup %2029  ;;  %v1469_v1 = vadd.f32 1.0, %v2028_v56  ;;  %2031 = vpow2.f32 %v1912_v61  ;;  %1749 = vmatpush.msrb.mxu1 %v1698_v0  ;;  %v1695_v61 = vld [vmem:[#allocation13 + $0x60] sm:$0xff]  ;;  %v1696_v56 = vld [vmem:[#allocation13 + $0x68] sm:$0xff] }
 0x4e8   :  { %v1470_v3 = vadd.f32 1.0, %v2030_v62 }
 0x4e9   :  { %2033 = vrcp.f32 %v1469_v1  ;;  %v1483_v23 = vand.u32 2147483648, %v1469_v1  ;;  %v1481_v29 = vand.u32 2147483647, %v1469_v1  ;;  %vm1477_vm11 = vweird.f32 %v1469_v1  ;;  %1750 = vmatpush.msrb.mxu1 %v1696_v56 }
 0x4ea   :  { %2035 = vrcp.f32 %v1470_v3  ;;  %v1498_v15 = vand.u32 2147483648, %v1470_v3  ;;  %v1496_v25 = vand.u32 2147483647, %v1470_v3  ;;  %vm1492_vm12 = vweird.f32 %v1470_v3 }
 0x4eb   :  { %v1484_v28 = vor.u32 1.1754944e-38, %v1483_v23  ;;  %vm1482_vm15 = vcmp.eq.f32.partialorder %v1481_v29, 8.507059e+37  ;;  %1751 = vmatpush.msrb.mxu1 %v1694_v17  ;;  %v1687_v23 = vld [vmem:[#allocation13 + $0x20] sm:$0xff]  ;;  %v1685_v29 = vld [vmem:[#allocation13 + $0x10] sm:$0xff] }
 0x4ec   :  { %v1499_v27 = vor.u32 1.1754944e-38, %v1498_v15  ;;  %vm1497_vm0 = vcmp.eq.f32.partialorder %v1496_v25, 8.507059e+37  ;;  %v1688_v15 = vld [vmem:[#allocation13 + $0x28] sm:$0xff]  ;;  %v3640_v25 = vld [vmem:[#allocation75_spill] sm:$0xff] }
 0x4ed   :  { %v2032_v2 = vpop.eup %2031  ;;  %v1769_v17 = vld [vmem:[#allocation14 + $0x30] sm:$0xff] }
 0x4ee   :  { %v1471_v63 = vadd.f32 1.0, %v2032_v2  ;;  %v3639_v2 = vld [vmem:[#allocation73_spill] sm:$0xff] }
 0x4ef   :  { %v2034_v36 = vpop.eup %2033 }
 0x4f0   :  { %v2036_v9 = vpop.eup %2035  ;;  %v1473_v10 = vmul.f32 %v2034_v36, %v1469_v1  ;;  %2037 = vrcp.f32 %v1471_v63  ;;  %vm1478_vm9 = vweird.f32 %v2034_v36  ;;  %v1513_v42 = vand.u32 2147483648, %v1471_v63 }
 0x4f1   :  { %v1488_v14 = vmul.f32 %v2036_v9, %v1470_v3  ;;  %2039 = vtanh.f32 %v1458_v21  ;;  %vm1493_vm10 = vweird.f32 %v2036_v9  ;;  %vm1479_vm13 = vmor %vm1477_vm11, %vm1478_vm9  ;;  %vm1507_vm2 = vweird.f32 %v1471_v63  ;;  %v3638_v3 = vld [vmem:[#allocation72_spill] sm:$0xff] }
 0x4f2   :  { %v1474_v19 = vsub.f32 1.0, %v1473_v10  ;;  %vm1494_vm14 = vmor %vm1492_vm12, %vm1493_vm10  ;;  %v1511_v43 = vand.u32 2147483647, %v1471_v63  ;;  %v1514_v45 = vor.u32 1.1754944e-38, %v1513_v42  ;;  %v1691_v10 = vld [vmem:[#allocation13 + $0x40] sm:$0xff] }
 0x4f3   :  { %v1489_v12 = vsub.f32 1.0, %v1488_v14  ;;  %v1692_v14 = vld [vmem:[#allocation13 + $0x48] sm:$0xff]  ;;  %v1791_v42 = vld [vmem:[#allocation14 + $0xe0] sm:$0xff] }
 0x4f4   :  { %v1475_v32 = vmul.f32 %v2034_v36, %v1474_v19  ;;  %vm1512_vm4 = vcmp.eq.f32.partialorder %v1511_v43, 8.507059e+37  ;;  %1752 = vmatpush.msrb.mxu1 %v1692_v14  ;;  %v1689_v19 = vld [vmem:[#allocation13 + $0x30] sm:$0xff] }
 0x4f5   :  { %v1490_v24 = vmul.f32 %v2036_v9, %v1489_v12  ;;  %v1690_v12 = vld [vmem:[#allocation13 + $0x38] sm:$0xff] }
 0x4f6   :  { %v2038_v31 = vpop.eup %2037  ;;  %v1476_v13 = vadd.f32 %v2034_v36, %v1475_v32  ;;  %1753 = vmatpush.msrb.mxu1 %v1690_v12 }
 0x4f7   :  { %v1491_v30 = vadd.f32 %v2036_v9, %v1490_v24  ;;  %v1503_v18 = vmul.f32 %v2038_v31, %v1471_v63  ;;  %v2040_v26 = vpop.eup %2039  ;;  %vm1508_vm1 = vweird.f32 %v2038_v31  ;;  %v1686_v24 = vld [vmem:[#allocation13 + $0x18] sm:$0xff] }
 0x4f8   :  { %v1480_v22 = vsel %vm1479_vm13, %v2034_v36, %v1476_v13  ;;  %vm1509_vm3 = vmor %vm1507_vm2, %vm1508_vm1  ;;  %v1693_v36 = vld [vmem:[#allocation13 + $0x50] sm:$0xff]  ;;  %1754 = vmatpush.msrb.mxu1 %v1688_v15  ;;  %v1683_v13 = vld [vmem:[#allocation13] sm:$0xff] }
 0x4f9   :  { %v1485_v35 = vsel %vm1482_vm15, %v1484_v28, %v1480_v22  ;;  %v1495_v11 = vsel %vm1494_vm14, %v2036_v9, %v1491_v30  ;;  %v1504_v16 = vsub.f32 1.0, %v1503_v18  ;;  %v1684_v28 = vld [vmem:[#allocation13 + $0x8] sm:$0xff] }
 0x4fa   :  { %v1500_v34 = vsel %vm1497_vm0, %v1499_v27, %v1495_v11  ;;  %v1520_v37 = vmul.f32 %v2040_v26, %v1485_v35  ;;  %1755 = vmatpush.msrb.mxu1 %v1686_v24  ;;  %v1778_v35 = vld [vmem:[#allocation14 + $0x78] sm:$0xff]  ;;  %v1768_v15 = vld [vmem:[#allocation14 + $0x28] sm:$0xff] }
 0x4fb   :  { %v1519_v38 = vmul.f32 %v1500_v34, %v3290_v48  ;;  %v1505_v39 = vmul.f32 %v2038_v31, %v1504_v16  ;;  %v1713_v48 = vld [vmem:[#allocation13 + $0xf0] sm:$0xff]  ;;  %v1794_v11 = vld [vmem:[#allocation14 + $0xf8] sm:$0xff]  ;;  %1799 = vmatpush.msrb.mxu2 %v1778_v35 }
 0x4fc   :  { %1721 = vmatpush.msrb.mxu0 %v1713_v48  ;;  %1756 = vmatpush.msrb.mxu1 %v1684_v28  ;;  %v1777_v16 = vld [vmem:[#allocation14 + $0x70] sm:$0xff] }
 0x4fd   :  { %v3298_v40 = vadd.f32 %v1520_v37, %v1519_v38  ;;  %v1506_v41 = vadd.f32 %v2038_v31, %v1505_v39  ;;  %1819 = vmatpush.msrb.mxu3 %v1794_v11  ;;  %v1793_v34 = vld [vmem:[#allocation14 + $0xf0] sm:$0xff]  ;;  %v1776_v37 = vld [vmem:[#allocation14 + $0x68] sm:$0xff]  ;;  %1800 = vmatpush.msrb.mxu2 %v1777_v16 }
 0x4fe   :  { %1722 = vmatpush.msrb.mxu0 %v1711_v55  ;;  %v1792_v38 = vld [vmem:[#allocation14 + $0xe8] sm:$0xff] }
 0x4ff   :  { %2041 = vtanh.f32 %v3298_v40  ;;  %v1510_v44 = vsel %vm1509_vm3, %v2038_v31, %v1506_v41  ;;  %1820 = vmatpush.msrb.mxu3 %v1793_v34  ;;  %v1775_v41 = vld [vmem:[#allocation14 + $0x60] sm:$0xff]  ;;  %1801 = vmatpush.msrb.mxu2 %v1776_v37  ;;  %v1765_v34 = vld [vmem:[#allocation14 + $0x10] sm:$0xff] }
 0x500   :  { %v1515_v49 = vsel %vm1512_vm4, %v1514_v45, %v1510_v44  ;;  %1723 = vmatpush.msrb.mxu0 %v1709_v54  ;;  %v1774_v45 = vld [vmem:[#allocation14 + $0x58] sm:$0xff]  ;;  %v1789_v54 = vld [vmem:[#allocation14 + $0xd0] sm:$0xff] }
 0x501   :  { %1821 = vmatpush.msrb.mxu3 %v1792_v38  ;;  %1802 = vmatpush.msrb.mxu2 %v1775_v41  ;;  %v1781_v37 = vld [vmem:[#allocation14 + $0x90] sm:$0xff]  ;;  %v1764_v38 = vld [vmem:[#allocation14 + $0x8] sm:$0xff]  ;;  %v1763_v41 = vld [vmem:[#allocation14] sm:$0xff] }
 0x502   :  { %1724 = vmatpush.msrb.mxu0 %v1707_v20 }
 0x503   :  { %1822 = vmatpush.msrb.mxu3 %v1791_v42  ;;  %1803 = vmatpush.msrb.mxu2 %v1774_v45  ;;  %v1779_v42 = vld [vmem:[#allocation14 + $0x80] sm:$0xff] }
 0x504   :  { %1725 = vmatpush.msrb.mxu0 %v1705_v5  ;;  %v1788_v5 = vld [vmem:[#allocation14 + $0xc8] sm:$0xff] }
 0x505   :  { %v2042_v46 = vpop.eup %2041  ;;  %1804 = vmatpush.msrb.mxu2 %v1773_v8  ;;  %v1930_v8 = vld [vmem:[%s3345_s7] ss:$0 sm:$0xff] }
 0x506   :  { %v1524_v50 = vmul.f32 %v2042_v46, %v1515_v49  ;;  %1726 = vmatpush.msrb.mxu0 %v1703_v58  ;;  %v1790_v46 = vld [vmem:[#allocation14 + $0xd8] sm:$0xff] }
 0x507   :  { %1823 = vmatpush.msrb.mxu3 %v1790_v46  ;;  %1805 = vmatpush.msrb.mxu2 %v1772_v33 }
 0x508   :  { %1548 = vmatmul.f32.vlgmr.msra.gmra.mxu0 %v1524_v50  ;;  %1568 = vmatmul.f32.vlgmr.msra.gmra.mxu1 %v1524_v50 }
 0x509   :  { %1588 = vmatmul.f32.vlgmr.msra.gmra.mxu2 %v1524_v50  ;;  %1608 = vmatmul.f32.vlgmr.msra.gmra.mxu3 %v1524_v50  ;;  %v3641_v50 = vld [vmem:[#allocation74_spill] sm:$0xff] }
 0x50a   :  { %1727 = vmatpush.msrb.mxu0 %v1701_v57  ;;  %1824 = vmatpush.msrb.mxu3 %v1789_v54 }
 0x50c   :  { %1728 = vmatpush.msrb.mxu0 %v1699_v53  ;;  %v1771_v53 = vld [vmem:[#allocation14 + $0x40] sm:$0xff]  ;;  %1825 = vmatpush.msrb.mxu3 %v1788_v5 }
 0x50d   :  { %1806 = vmatpush.msrb.mxu2 %v1771_v53 }
 0x50e   :  { %1729 = vmatpush.msrb.mxu0 %v1697_v59  ;;  %1826 = vmatpush.msrb.mxu3 %v1787_v60 }
 0x510   :  { %1730 = vmatpush.msrb.mxu0 %v1695_v61 }
 0x512   :  { %1731 = vmatpush.msrb.mxu0 %v1693_v36 }
 0x514   :  { %1732 = vmatpush.msrb.mxu0 %v1691_v10 }
 0x516   :  { %1733 = vmatpush.msrb.mxu0 %v1689_v19 }
 0x518   :  { %1734 = vmatpush.msrb.mxu0 %v1687_v23 }
 0x51a   :  { %1735 = vmatpush.msrb.mxu0 %v1685_v29 }
 0x51c   :  { %1736 = vmatpush.msrb.mxu0 %v1683_v13 }
 0x585   :  { %v1549_v62 = vpop.f32.mrf.mxu0  ;;  %v1569_v1 = vpop.f32.mrf.mxu1 }
 0x586   :  { %v1612_v6 = vadd.f32 %v1549_v62, %v3638_v3  ;;  %v1613_v63 = vadd.f32 %v1569_v1, %v3639_v2  ;;  %v1770_v62 = vld [vmem:[#allocation14 + $0x38] sm:$0xff] }
 0x587   :  { %v1786_v1 = vld [vmem:[#allocation14 + $0xb8] sm:$0xff]  ;;  %1807 = vmatpush.msrb.mxu2 %v1770_v62 }
 0x588   :  { %v1913_v21 = vmul.f32 -1.442695, %v1612_v6  ;;  %v1914_v9 = vmul.f32 -1.442695, %v1613_v63  ;;  %1827 = vmatpush.msrb.mxu3 %v1786_v1 }
 0x589   :  { %1808 = vmatpush.msrb.mxu2 %v1769_v17 }
 0x58a   :  { %2043 = vpow2.f32 %v1913_v21  ;;  %v1785_v21 = vld [vmem:[#allocation14 + $0xb0] sm:$0xff] }
 0x58b   :  { %2045 = vpow2.f32 %v1914_v9  ;;  %1828 = vmatpush.msrb.mxu3 %v1785_v21  ;;  %1809 = vmatpush.msrb.mxu2 %v1768_v15 }
 0x58c   :  { %v1609_v32 = vpop.f32.mrf.mxu3  ;;  %v1589_v39 = vpop.f32.mrf.mxu2 }
 0x58d   :  { %v1615_v31 = vadd.f32 %v1609_v32, %v3640_v25  ;;  %v1614_v48 = vadd.f32 %v1589_v39, %v3641_v50  ;;  %v1784_v32 = vld [vmem:[#allocation14 + $0xa8] sm:$0xff]  ;;  %v1767_v25 = vld [vmem:[#allocation14 + $0x20] sm:$0xff] }
 0x58e   :  { %1829 = vmatpush.msrb.mxu3 %v1784_v32  ;;  %1810 = vmatpush.msrb.mxu2 %v1767_v25  ;;  %v1780_v39 = vld [vmem:[#allocation14 + $0x88] sm:$0xff] }
 0x58f   :  { %v1915_v30 = vmul.f32 -1.442695, %v1615_v31  ;;  %v1783_v31 = vld [vmem:[#allocation14 + $0xa0] sm:$0xff] }
 0x590   :  { %v2044_v18 = vpop.eup %2043  ;;  %1830 = vmatpush.msrb.mxu3 %v1783_v31 }
 0x591   :  { %v2046_v27 = vpop.eup %2045  ;;  %v3304_v22 = vadd.f32 1.0, %v2044_v18  ;;  %2047 = vpow2.f32 %v1915_v30  ;;  %v1766_v30 = vld [vmem:[#allocation14 + $0x18] sm:$0xff] }
 0x592   :  { %v3306_v26 = vadd.f32 1.0, %v2046_v27  ;;  %v1782_v18 = vld [vmem:[#allocation14 + $0x98] sm:$0xff]  ;;  %1811 = vmatpush.msrb.mxu2 %v1766_v30 }
 0x593   :  { %2049 = vrcp.f32 %v3304_v22  ;;  %v1639_v58 = vand.u32 2147483648, %v3304_v22  ;;  %v1637_v52 = vand.u32 2147483647, %v3304_v22  ;;  %vm1633_vm7 = vweird.f32 %v3304_v22  ;;  %1831 = vmatpush.msrb.mxu3 %v1782_v18 }
 0x594   :  { %2051 = vrcp.f32 %v3306_v26  ;;  %v1654_v7 = vand.u32 2147483648, %v3306_v26  ;;  %v1652_v0 = vand.u32 2147483647, %v3306_v26  ;;  %vm1648_vm8 = vweird.f32 %v3306_v26  ;;  %1812 = vmatpush.msrb.mxu2 %v1765_v34 }
 0x595   :  { %v1640_v3 = vor.u32 1.1754944e-38, %v1639_v58  ;;  %vm1638_vm11 = vcmp.eq.f32.partialorder %v1637_v52, 8.507059e+37  ;;  %1832 = vmatpush.msrb.mxu3 %v1781_v37 }
 0x596   :  { %v1655_v63 = vor.u32 1.1754944e-38, %v1654_v7  ;;  %vm1653_vm12 = vcmp.eq.f32.partialorder %v1652_v0, 8.507059e+37  ;;  %1813 = vmatpush.msrb.mxu2 %v1764_v38 }
 0x597   :  { %v2048_v43 = vpop.eup %2047  ;;  %1833 = vmatpush.msrb.mxu3 %v1780_v39 }
 0x598   :  { %v3310_v44 = vadd.f32 1.0, %v2048_v43  ;;  %1814 = vmatpush.msrb.mxu2 %v1763_v41  ;;  %v1715_v43 = vld [vmem:[%s3343_s5] sm:$0x3]  ;;  %s1847_s5 = sshll.u32 %s3346_s8, 4  ;;  %s1848_s5 = int_to_ptr.hbm [resolvable:$true] %s1847_s5 }
 0x599   :  { %v2050_v49 = vpop.eup %2049  ;;  %1834 = vmatpush.msrb.mxu3 %v1779_v42  ;;  %v1718_v45 = vperm.slane %v1715_v43, 1 }
 0x59a   :  { %v2052_v51 = vpop.eup %2051  ;;  %v1629_v55 = vmul.f32 %v2050_v49, %v3304_v22  ;;  %2053 = vrcp.f32 %v3310_v44  ;;  %vm1634_vm5 = vweird.f32 %v2050_v49  ;;  %v1669_v27 = vand.u32 2147483648, %v3310_v44 }
 0x59b   :  { %v1644_v4 = vmul.f32 %v2052_v51, %v3306_v26  ;;  %2055 = vtanh.f32 %v1614_v48  ;;  %vm1649_vm6 = vweird.f32 %v2052_v51  ;;  %vm1635_vm9 = vmor %vm1633_vm7, %vm1634_vm5  ;;  %vm1663_vm14 = vweird.f32 %v3310_v44 }
 0x59c   :  { %v1630_v20 = vsub.f32 1.0, %v1629_v55  ;;  %vm1650_vm10 = vmor %vm1648_vm8, %vm1649_vm6  ;;  %v1670_v26 = vor.u32 1.1754944e-38, %v1669_v27 }
 0x59d   :  { %v1645_v47 = vsub.f32 1.0, %v1644_v4 }
 0x59e   :  { %v1631_v57 = vmul.f32 %v2050_v49, %v1630_v20 }
 0x59f   :  { %v1646_v59 = vmul.f32 %v2052_v51, %v1645_v47 }
 0x5a0   :  { %v2054_v61 = vpop.eup %2053  ;;  %v1632_v56 = vadd.f32 %v2050_v49, %v1631_v57 }
 0x5a1   :  { %v1647_v6 = vadd.f32 %v2052_v51, %v1646_v59  ;;  %v1659_v2 = vmul.f32 %v2054_v61, %v3310_v44  ;;  %v2056_v9 = vpop.eup %2055  ;;  %vm1664_vm13 = vweird.f32 %v2054_v61 }
 0x5a2   :  { %v1636_v36 = vsel %vm1635_vm9, %v2050_v49, %v1632_v56  ;;  %vm1665_vm15 = vmor %vm1663_vm14, %vm1664_vm13 }
 0x5a3   :  { %v1641_v10 = vsel %vm1638_vm11, %v1640_v3, %v1636_v36  ;;  %v1651_v14 = vsel %vm1650_vm10, %v2052_v51, %v1647_v6  ;;  %v1660_v19 = vsub.f32 1.0, %v1659_v2 }
 0x5a4   :  { %v1656_v12 = vsel %vm1653_vm12, %v1655_v63, %v1651_v14  ;;  %v1676_v23 = vmul.f32 %v2056_v9, %v1641_v10 }
 0x5a5   :  { %v1675_v29 = vmul.f32 %v1656_v12, %v3298_v40  ;;  %v1661_v24 = vmul.f32 %v2054_v61, %v1660_v19  ;;  %v1667_v40 = vand.u32 2147483647, %v3310_v44  ;;  %v1717_v44 = vperm.slane %v1715_v43, 0 }
 0x5a7   :  { %v1677_v13 = vadd.f32 %v1676_v23, %v1675_v29  ;;  %v1662_v28 = vadd.f32 %v2054_v61, %v1661_v24  ;;  %vm1668_vm0 = vcmp.eq.f32.partialorder %v1667_v40, 8.507059e+37 }
 0x5a9   :  { %2057 = vtanh.f32 %v1677_v13  ;;  %v1666_v22 = vsel %vm1665_vm15, %v2054_v61, %v1662_v28 }
 0x5aa   :  { %v1671_v11 = vsel %vm1668_vm0, %v1670_v26, %v1666_v22 }
 0x5af   :  { %v2058_v35 = vpop.eup %2057 }
 0x5b0   :  { %v1680_v16 = vmul.f32 %v2058_v35, %v1671_v11 }
 0x5b2   :  { %1737 = vmatmul.f32.vlgmr.msrb.gmra.mxu0 %v1680_v16  ;;  %1757 = vmatmul.f32.vlgmr.msrb.gmra.mxu1 %v1680_v16 }
 0x62f   :  { %v1738_v46 = vpop.f32.mrf.mxu0  ;;  %v1758_v49 = vpop.f32.mrf.mxu1 }
 0x630   :  { %v1739_v50 = vadd.f32 %v1738_v46, %v1717_v44  ;;  %v1759_v48 = vadd.f32 %v1758_v49, %v1718_v45 }
 0x632   :  { %v1761_v51 = vmax.f32 %v1739_v50, 0.0  ;;  %v1762_v55 = vmax.f32 %v1759_v48, 0.0 }
 0x634   :  { %1815 = vmatmul.f32.vlgmr.msrb.gmra.mxu2 %v1761_v51  ;;  %1835 = vmatmul.f32.vlgmr.msrb.gmra.mxu3 %v1762_v55 }
 0x6b7   :  { %v1816_v54 = vpop.f32.mrf.mxu2  ;;  %v1836_v20 = vpop.f32.mrf.mxu3 }
 0x6b8   :  { %v1817_v4 = vadd.f32 %v1930_v8, %v1816_v54 }
 0x6ba   :  { %v1837_v33 = vadd.f32 %v1836_v20, %v1817_v4 }
 0x6bc   :  { %1839 = vst [vmem:[#allocation16] sm:$0xff] %v1837_v33 }
 0x6bd   :  { %1850 = dma.vmem_to_hbm [thread:$0]  %s1846_s18, 128, %s1848_s5, [#allocation7]  }
 0x6be   :  { %2299 = dma.done.wait [#allocation7], 128  }
 0x6bf   :  { %2300 = vsyncadd [#allocation7], 4294967168 }
 0x6c0   :  { %1855 = vsyncpa [#allocation6], 1 }
 0x6c1   :  { %1856 = vsyncpa [#allocation9], 1 }
 0x6c2   :  { %1857 = vsyncpa [#allocation12], 1 }
 0x6c3   :  { %1858 = vsyncpa [#allocation15], 1 }
 0x6c4   :  { %1859 = vsyncpa [#allocation7], 1 }

</bundles_post_ra>
